<compile_context>
chip_gen: v7x
topology: tpu7x:2x2x1
jax: 0.10.0
libtpu: 0.0.40
codegen_flags: <defaults>
</compile_context>

<pallas_src>
import functools

import jax
import jax.numpy as jnp
from jax import lax
from jax.experimental import pallas as pl
from jax.experimental.pallas import tpu as pltpu


def _multilabel_tags_kernel(k_tags, x_ref, w_ref, b_ref, emb_ref,
                            tags_ref, embs_ref):
    # x: (B, F), w: (F, T) pre-transposed (lane-dense), b: (1, T), emb: (T, E)
    x = x_ref[...]
    w = w_ref[...]
    b = b_ref[...]

    # Linear layer on the MXU (weight already (F, T): no in-kernel transpose).
    logits = jnp.dot(x, w, preferred_element_type=jnp.float32) + b  # (B, T)
    B, T = logits.shape

    # Softmax along the tag axis (dim=1 in the PyTorch module).
    m = jnp.max(logits, axis=-1, keepdims=True)
    e = jnp.exp(logits - m)
    tags_ref[...] = e * pl.reciprocal(jnp.sum(e, axis=-1, keepdims=True),
                                      approx=False)

    # Vectorized top-k via ranks (no serial K-loop, no scratch round-trip).
    # rank[b,t] = number of entries that beat entry t in a stable descending
    # sort: strictly greater value, or equal value at a lower index.
    v_t = logits[:, :, None]                                      # (B, T, 1)
    v_tp = logits[:, None, :]                                     # (B, 1, T)
    t_idx = lax.broadcasted_iota(jnp.int32, (B, T, T), 1)         # candidate t
    tp_idx = lax.broadcasted_iota(jnp.int32, (B, T, T), 2)        # other t'
    beats = (v_tp > v_t) | ((v_tp == v_t) & (tp_idx < t_idx))     # (B, T, T)
    rank = jnp.sum(beats.astype(jnp.int32), axis=-1)              # (B, T)

    # one-hot[b,k,t] = (rank[b,t] == k); the whole (B*K, T) one-hot stays in
    # registers (2 vregs at B=2, K=8, T=128).
    k_iota = lax.broadcasted_iota(jnp.int32, (B, k_tags, T), 1)   # (B, K, T)
    onehot = (rank[:, None, :] == k_iota).astype(jnp.float32)     # (B, K, T)
    onehots = onehot.reshape(B * k_tags, T)                       # (B*K, T)

    # Single batched one-hot gather on the MXU, single dense slab store.
    embs_ref[...] = jnp.dot(onehots, emb_ref[...],
                            preferred_element_type=jnp.float32)   # (B*K, E)


@functools.partial(jax.jit, static_argnames=("k_tags",))
def multilabel_tags_forward(features, weight, bias, emb_table, k_tags):
    """features (B,F) f32, weight (T,F) (nn.Linear layout), bias (T,), emb_table (T,E)."""
    B, F = features.shape
    T, _ = weight.shape
    E = emb_table.shape[1]

    # Lane-dense (F, T) layout for the kernel. In a real model the parameter
    # would simply be stored this way; here the transpose is a one-time tiny
    # HLO op inside the jitted program.
    weight_ft = weight.T
    bias2d = bias.reshape(1, T)

    cost = pl.CostEstimate(
        flops=int(2 * B * F * T + 2 * (B * k_tags) * T * E + 3 * B * T * T),
        transcendentals=int(B * T),
        bytes_accessed=int(4 * (B * F + F * T + T + T * E + B * T
                                + B * k_tags * E)),
    )

    kernel = functools.partial(_multilabel_tags_kernel, k_tags)
    tags, embs_flat = pl.pallas_call(
        kernel,
        out_shape=(
            jax.ShapeDtypeStruct((B, T), jnp.float32),
            jax.ShapeDtypeStruct((B * k_tags, E), jnp.float32),
        ),
        in_specs=[pl.BlockSpec(memory_space=pltpu.MemorySpace.VMEM)] * 4,
        out_specs=(
            pl.BlockSpec(memory_space=pltpu.MemorySpace.VMEM),
            pl.BlockSpec(memory_space=pltpu.MemorySpace.VMEM),
        ),
        cost_estimate=cost,
    )(features, weight_ft, bias2d, emb_table)
    # Final (B, K, E) view is a free wrapper-side reshape.
    return tags, embs_flat.reshape(B, k_tags, E)


def _reference(features, weight, bias, emb_table, k_tags):
    logits = features @ weight.T + bias
    tags = jax.nn.softmax(logits, axis=1)
    _, idx = lax.top_k(tags, k_tags)
    embs = emb_table[idx]
    return tags, embs


if __name__ == "__main__":
    # Small shapes consistent with the module.
    B = 2
    n_in_features = 32
    conf = {
        "n_tags": 128,
        "tag_emb_size": 32,
        "top_k_tags": 8,
        "init_linear": 0.1,
        "init_embs": 0.1,
    }

    key = jax.random.PRNGKey(0)
    k_x, k_w, k_b, k_e = jax.random.split(key, 4)

    features = jax.random.normal(k_x, (B, n_in_features), dtype=jnp.float32)

    # Deterministic init mirroring _init_linear / _init_embs: uniform(-v, v).
    v_lin = abs(conf["init_linear"])
    v_emb = abs(conf["init_embs"])
    weight = jax.random.uniform(k_w, (conf["n_tags"], n_in_features),
                                minval=-v_lin, maxval=v_lin, dtype=jnp.float32)
    # nn.Linear bias default init: uniform(-1/sqrt(fan_in), 1/sqrt(fan_in))
    bound = 1.0 / (n_in_features ** 0.5)
    bias = jax.random.uniform(k_b, (conf["n_tags"],),
                              minval=-bound, maxval=bound, dtype=jnp.float32)
    emb_table = jax.random.uniform(k_e, (conf["n_tags"], conf["tag_emb_size"]),
                                   minval=-v_emb, maxval=v_emb, dtype=jnp.float32)

    tags, embs = multilabel_tags_forward(features, weight, bias, emb_table,
                                         conf["top_k_tags"])
    jax.block_until_ready((tags, embs))

    ref_tags, ref_embs = _reference(features, weight, bias, emb_table,
                                    conf["top_k_tags"])
    assert tags.shape == (B, conf["n_tags"])
    assert embs.shape == (B, conf["top_k_tags"], conf["tag_emb_size"])
    assert jnp.allclose(tags, ref_tags, atol=1e-5)
    assert jnp.allclose(embs, ref_embs, atol=1e-5)

    print("KERNEL_OK")
</pallas_src>

<mosaic_0001>
module attributes {stable_mosaic.version = 11 : i64} {
  func.func @_multilabel_tags_kernel(%arg0: memref<2x32xf32, #tpu.memory_space<vmem>>, %arg1: memref<32x128xf32, #tpu.memory_space<vmem>>, %arg2: memref<1x128xf32, #tpu.memory_space<vmem>>, %arg3: memref<128x32xf32, #tpu.memory_space<vmem>>, %arg4: memref<2x128xf32, #tpu.memory_space<vmem>>, %arg5: memref<16x32xf32, #tpu.memory_space<vmem>>) attributes {dimension_semantics = [], scalar_prefetch = 0 : i64, scratch_operands = 0 : i64, tpu.core_type = #tpu.core_type<tc>} {
    %c0 = arith.constant 0 : index
    %c0_0 = arith.constant 0 : index
    %0 = vector.load %arg0[%c0, %c0_0] : memref<2x32xf32, #tpu.memory_space<vmem>>, vector<2x32xf32>
    %c0_1 = arith.constant 0 : index
    %c0_2 = arith.constant 0 : index
    %1 = vector.load %arg1[%c0_1, %c0_2] : memref<32x128xf32, #tpu.memory_space<vmem>>, vector<32x128xf32>
    %c0_3 = arith.constant 0 : index
    %c0_4 = arith.constant 0 : index
    %2 = vector.load %arg2[%c0_3, %c0_4] : memref<1x128xf32, #tpu.memory_space<vmem>>, vector<1x128xf32>
    %cst = arith.constant dense<0.000000e+00> : vector<2x128xf32>
    %3 = tpu.matmul %0, %1, %cst {dimension_numbers = #tpu.dot_dimension_numbers<[1], [0], [0], [1], [0, 0, 1, 1], [], []>} : vector<2x32xf32>, vector<32x128xf32>, vector<2x128xf32> -> vector<2x128xf32>
    %4 = vector.broadcast %2 : vector<1x128xf32> to vector<2x128xf32>
    %5 = arith.addf %3, %4 : vector<2x128xf32>
    %cst_5 = arith.constant dense<0xFF800000> : vector<2xf32>
    %6 = vector.multi_reduction <maximumf>, %5, %cst_5 [1] : vector<2x128xf32> to vector<2xf32>
    %7 = vector.shape_cast %6 : vector<2xf32> to vector<2x1xf32>
    %8 = vector.broadcast %7 : vector<2x1xf32> to vector<2x128xf32>
    %9 = arith.subf %5, %8 : vector<2x128xf32>
    %10 = math.exp %9 : vector<2x128xf32>
    %cst_6 = arith.constant dense<0.000000e+00> : vector<2xf32>
    %11 = vector.multi_reduction <add>, %10, %cst_6 [1] : vector<2x128xf32> to vector<2xf32>
    %12 = vector.shape_cast %11 : vector<2xf32> to vector<2x1xf32>
    %13 = tpu.reciprocal %12 : vector<2x1xf32> -> vector<2x1xf32>
    %14 = vector.broadcast %13 : vector<2x1xf32> to vector<2x128xf32>
    %15 = arith.mulf %10, %14 : vector<2x128xf32>
    %c0_7 = arith.constant 0 : index
    %c0_8 = arith.constant 0 : index
    %16 = vector.load %arg4[%c0_7, %c0_8] : memref<2x128xf32, #tpu.memory_space<vmem>>, vector<2x128xf32>
    tpu.vector_store %arg4[%c0_7, %c0_8], %15 {strides = array<i32>} : memref<2x128xf32, #tpu.memory_space<vmem>>, vector<2x128xf32>,
    %17 = vector.shape_cast %5 : vector<2x128xf32> to vector<2x128x1xf32>
    %18 = vector.shape_cast %5 : vector<2x128xf32> to vector<2x1x128xf32>
    %19 = tpu.iota {dimensions = array<i32: 1>} : vector<2x128x128xi32>
    %20 = tpu.iota {dimensions = array<i32: 2>} : vector<2x128x128xi32>
    %21 = vector.broadcast %18 : vector<2x1x128xf32> to vector<2x128x128xf32>
    %22 = vector.broadcast %17 : vector<2x128x1xf32> to vector<2x128x128xf32>
    %23 = arith.cmpf ogt, %21, %22 : vector<2x128x128xf32>
    %24 = vector.broadcast %18 : vector<2x1x128xf32> to vector<2x128x128xf32>
    %25 = vector.broadcast %17 : vector<2x128x1xf32> to vector<2x128x128xf32>
    %26 = arith.cmpf oeq, %24, %25 : vector<2x128x128xf32>
    %27 = arith.cmpi slt, %20, %19 : vector<2x128x128xi32>
    %28 = arith.andi %26, %27 : vector<2x128x128xi1>
    %29 = arith.ori %23, %28 : vector<2x128x128xi1>
    %30 = arith.extui %29 : vector<2x128x128xi1> to vector<2x128x128xi32>
    %cst_9 = arith.constant dense<0> : vector<2x128xi32>
    %31 = vector.multi_reduction <add>, %30, %cst_9 [2] : vector<2x128x128xi32> to vector<2x128xi32>
    %32 = tpu.iota {dimensions = array<i32: 1>} : vector<2x8x128xi32>
    %33 = vector.shape_cast %31 : vector<2x128xi32> to vector<2x1x128xi32>
    %34 = vector.broadcast %33 : vector<2x1x128xi32> to vector<2x8x128xi32>
    %35 = arith.cmpi eq, %34, %32 : vector<2x8x128xi32>
    %36 = arith.extui %35 : vector<2x8x128xi1> to vector<2x8x128xi32>
    %37 = arith.sitofp %36 : vector<2x8x128xi32> to vector<2x8x128xf32>
    %38 = vector.shape_cast %37 : vector<2x8x128xf32> to vector<16x128xf32>
    %c0_10 = arith.constant 0 : index
    %c0_11 = arith.constant 0 : index
    %39 = vector.load %arg3[%c0_10, %c0_11] : memref<128x32xf32, #tpu.memory_space<vmem>>, vector<128x32xf32>
    %cst_12 = arith.constant dense<0.000000e+00> : vector<16x32xf32>
    %40 = tpu.matmul %38, %39, %cst_12 {dimension_numbers = #tpu.dot_dimension_numbers<[1], [0], [0], [1], [0, 0, 1, 1], [], []>} : vector<16x128xf32>, vector<128x32xf32>, vector<16x32xf32> -> vector<16x32xf32>
    %c0_13 = arith.constant 0 : index
    %c0_14 = arith.constant 0 : index
    %41 = vector.load %arg5[%c0_13, %c0_14] : memref<16x32xf32, #tpu.memory_space<vmem>>, vector<16x32xf32>
    tpu.vector_store %arg5[%c0_13, %c0_14], %40 {strides = array<i32>} : memref<16x32xf32, #tpu.memory_space<vmem>>, vector<16x32xf32>,
    return
  }
}

</mosaic_0001>

<bundles_post_ra>
// kernel: multilabel_tags_forward.1
= control target key start
LH: loop header
LB: loop body
LE: loop exit
PB: predicated region body
PF: predicated region fallthrough
CT: control target
= control target key end

     0   :  { %11 = vsyncpa [#allocation3], 0  ;;  %v5198_v3 = vmov 0.0|0.0   ;;  %vm5199_vm0 = vmmov 0   ;;  %v9178_v6 = vmov 0.0   ;;  %s9137_s0 = inlined_call_operand.vmem [shape: f32[2,32], index: 0, kind: input, shape index: {}]   ;;  %s9138_s1 = inlined_call_operand.vmem [shape: f32[32,128], index: 1, kind: input, shape index: {}]   ;;  %s9139_s2 = inlined_call_operand.vmem [shape: f32[1,128], index: 2, kind: input, shape index: {}]   ;;  %s9140_s3 = inlined_call_operand.vmem [shape: f32[128,32], index: 3, kind: input, shape index: {}]   ;;  %s9141_s4 = inlined_call_operand.hbm [shape: f32[2,128], index: 4, kind: output, shape index: {0}]   ;;  %s9142_s5 = inlined_call_operand.hbm [shape: f32[16,32], index: 5, kind: output, shape index: {1}]  }
   0x1   :  { %v22_v0 = vld [vmem:[%s9138_s1] sm:$0xff]  ;;  %v23_v1 = vld [vmem:[%s9138_s1 + $0x8] sm:$0xff]  ;;  %v24_v2 = vld [vmem:[%s9138_s1 + $0x10] sm:$0xff]  ;;  %4457 = vmatprep.subr.bf16.mxu0 %v5198_v3  ;;  %4419 = vmatprep.mubr.msk.f32.mxu0 %vm5199_vm0, %v9178_v6 }
   0x2   :  { %v4458_v4 = vpack.c.bf16 %v23_v1, %v22_v0  ;;  %v25_v5 = vld [vmem:[%s9138_s1 + $0x18] sm:$0xff] }
   0x3   :  { %12 = vsyncpa [#allocation5], 0  ;;  %v4461_v7 = vpack.c.bf16 %v25_v5, %v24_v2  ;;  %v21_v8 = vld [vmem:[%s9137_s0] sm:$0x3]  ;;  %vm9143_vm1 = vcmask 261120   ;;  %v120_v9 = vlaneseq  ;;  %v5202_v14 = vmov 0  }
   0x4   :  { %4459 = vmatpush3.bf16.msra.mxu0 %v4458_v4  ;;  %v5201_v10 = vmov 1966171168   ;;  %4504 = vset.pattern.permute.xlu0 %v5202_v14  ;;  %v4130_v15 = vld [vmem:[%s9139_s2] ss:$0 sm:$0xff]  ;;  %vm9144_vm2 = vcmask 1041408   ;;  %v9358_v57 = vmov 0 }
   0x5   :  { %4460 = vmatprep.subr.bf16.mxu0 %v5198_v3  ;;  %v256_v11 = vunpack.c.l.s4 %v5201_v10  ;;  %v5254_v12 = vshrl.u32 %v120_v9, 7  ;;  %4510 = vset.pattern.permute.xlu1 %v5202_v14  ;;  %v5278_v29 = vand.u32 127, %v120_v9 }
   0x7   :  { %9333 = vst [vmem:[#allocation8_spill] sm:$0xff] %v5254_v12  ;;  %v257_v13 = vunpack.c.0.s8 %v256_v11  ;;  %v5262_v16 = vsub.s32 0, %v5254_v12  ;;  %v189_v26 = vsub.s32 1, %v5254_v12  ;;  %vm370_vm3 = vcmp.lt.s32.totalorder %v5278_v29, %v5254_v12 }
   0x8   :  { %4462 = vmatpush3.bf16.msra.mxu0 %v4461_v7  ;;  %v5286_v31 = vadd.s32 8, %v5254_v12  ;;  %v5303_v47 = vadd.s32 24, %v5254_v12  ;;  %v5311_v49 = vadd.s32 32, %v5254_v12  ;;  %v5316_v51 = vadd.s32 16, %v5254_v12 }
   0x9   :  { %v260_v17 = vsub.s32 %v257_v13, %v5254_v12  ;;  %v5328_v53 = vadd.s32 40, %v5254_v12  ;;  %v5335_v55 = vadd.s32 48, %v5254_v12  ;;  %v5346_v58 = vadd.s32 56, %v5254_v12 }
   0xa   :  { %vm9153_vm7 = vcmp.lt.s32.totalorder %v5278_v29, %v5286_v31  ;;  %vm9148_vm13 = vcmp.lt.s32.totalorder %v5278_v29, %v5303_v47  ;;  %v5364_v61 = vadd.s32 64, %v5254_v12  ;;  %v5386_v3 = vadd.s32 72, %v5254_v12 }
   0xb   :  { %4420 = vmatmul.mubr.msk.f32.vlgmr.msra.gmra.mrb[0].mxu0 %vm9143_vm1, %v21_v8  ;;  %vm9146_vm1 = vcmp.lt.s32.totalorder %v5278_v29, %v5335_v55  ;;  %v5408_v13 = vadd.s32 80, %v5254_v12 }
  0xde   :  { %v103_v18 = vpop.f32.mrb[0].mxu0 }
  0xdf   :  { %v5265_v19 = vadd.f32 %v4130_v15, %v103_v18  ;;  %v4421_v20 = vpop.f32.mrb[1].mxu0 }
  0xe0   :  { %v5433_v20 = vadd.s32 96, %v5254_v12 }
  0xe1   :  { %v123_v21 = vrot.slane %v5265_v19, %v5262_v16  ;;  %v261_v22 = vrot.slane %v5265_v19, %v260_v17  ;;  %v108_v23 = vsel %vm9144_vm2, %v5265_v19, -inf  ;;  %v190_v27 = vrot.slane %v5265_v19, %v189_v26 }
  0xe2   :  { %109 = vmax.xlane.f32.xlu0 %v108_v23 }
  0xe3   :  { %v262_v24 = vcombine.high %v261_v22, %v261_v22  ;;  %125 = vbcast.lane.b32.xlu1 %v123_v21, 256  ;;  %v269_v28 = vrot.slane %v261_v22, %v260_v17 }
  0xe5   :  { %v5272_v25 = vrot.slane %v262_v24, %v260_v17  ;;  %v5281_v30 = vrot.slane %v269_v28, %v5262_v16 }
  0xe7   :  { %129 = vbcast.lane.b32.xlu1 %v123_v21, 264 }
  0xeb   :  { %137 = vbcast.lane.b32.xlu1 %v123_v21, 280 }
  0xef   :  { %141 = vbcast.lane.b32.xlu1 %v123_v21, 288 }
  0xf3   :  { %145 = vbcast.lane.b32.xlu1 %v123_v21, 296 }
  0xf7   :  { %149 = vbcast.lane.b32.xlu1 %v123_v21, 304 }
  0xf8   :  { %133 = vbcast.lane.b32.xlu0 %v123_v21, 272 }
  0xfb   :  { %153 = vbcast.lane.b32.xlu1 %v123_v21, 312 }
  0xfc   :  { %161 = vbcast.lane.b32.xlu0 %v123_v21, 328 }
  0xff   :  { %157 = vbcast.lane.b32.xlu1 %v123_v21, 320 }
 0x100   :  { %169 = vbcast.lane.b32.xlu0 %v123_v21, 344 }
 0x103   :  { %165 = vbcast.lane.b32.xlu1 %v123_v21, 336 }
 0x104   :  { %177 = vbcast.lane.b32.xlu0 %v123_v21, 360 }
 0x107   :  { %173 = vbcast.lane.b32.xlu1 %v123_v21, 352 }
 0x108   :  { %185 = vbcast.lane.b32.xlu0 %v123_v21, 376 }
 0x10b   :  { %181 = vbcast.lane.b32.xlu1 %v123_v21, 368 }
 0x10c   :  { %196 = vbcast.lane.b32.xlu0 %v190_v27, 264 }
 0x10f   :  { %192 = vbcast.lane.b32.xlu1 %v190_v27, 256 }
 0x110   :  { %204 = vbcast.lane.b32.xlu0 %v190_v27, 280 }
 0x113   :  { %200 = vbcast.lane.b32.xlu1 %v190_v27, 272 }
 0x114   :  { %212 = vbcast.lane.b32.xlu0 %v190_v27, 296 }
 0x117   :  { %208 = vbcast.lane.b32.xlu1 %v190_v27, 288 }
 0x118   :  { %220 = vbcast.lane.b32.xlu0 %v190_v27, 312 }
 0x11b   :  { %216 = vbcast.lane.b32.xlu1 %v190_v27, 304 }
 0x11c   :  { %228 = vbcast.lane.b32.xlu0 %v190_v27, 328 }
 0x11f   :  { %224 = vbcast.lane.b32.xlu1 %v190_v27, 320 }
 0x120   :  { %236 = vbcast.lane.b32.xlu0 %v190_v27, 344 }
 0x123   :  { %232 = vbcast.lane.b32.xlu1 %v190_v27, 336 }
 0x124   :  { %244 = vbcast.lane.b32.xlu0 %v190_v27, 360 }
 0x127   :  { %240 = vbcast.lane.b32.xlu1 %v190_v27, 352 }
 0x128   :  { %252 = vbcast.lane.b32.xlu0 %v190_v27, 376 }
 0x12b   :  { %248 = vbcast.lane.b32.xlu1 %v190_v27, 368  ;;  %v9379_v27 = vmov 0 }
 0x155   :  { %v126_v32 = vpop.permute.xlu1 %125 }
 0x156   :  { %vm306_vm4 = vcmp.gt.f32.partialorder %v5281_v30, %v126_v32  ;;  %vm338_vm5 = vcmp.eq.f32.partialorder %v5281_v30, %v126_v32 }
 0x157   :  { %vm386_vm6 = vmand %vm338_vm5, %vm370_vm3 }
 0x158   :  { %vm418_vm8 = vmor %vm306_vm4, %vm386_vm6  ;;  %vm9151_vm4 = vcmp.lt.s32.totalorder %v5278_v29, %v5311_v49  ;;  %vm372_vm6 = vcmp.lt.s32.totalorder %v5278_v29, %v5316_v51 }
 0x159   :  { %v130_v33 = vpop.permute.xlu1 %129  ;;  %v450_v34 = vsel %vm418_vm8, 1, %v5202_v14 }
 0x15a   :  { %vm307_vm9 = vcmp.gt.f32.partialorder %v5281_v30, %v130_v33  ;;  %vm339_vm10 = vcmp.eq.f32.partialorder %v5281_v30, %v130_v33  ;;  %v482_v35 = vand.u32 65535, %v450_v34  ;;  %v483_v36 = vshrl.u32 %v450_v34, 16 }
 0x15b   :  { %vm387_vm11 = vmand %vm339_vm10, %vm9153_vm7  ;;  %v5470_v34 = vadd.s32 88, %v5254_v12 }
 0x15c   :  { %v484_v37 = vcvt.s32.f32 %v482_v35  ;;  %v485_v38 = vcvt.s32.f32 %v483_v36  ;;  %vm419_vm12 = vmor %vm307_vm9, %vm387_vm11 }
 0x15d   :  { %v138_v39 = vpop.permute.xlu1 %137  ;;  %v451_v40 = vsel %vm419_vm12, 1, %v5202_v14 }
 0x15e   :  { %486 = vadd.xlane.f32.xlu1 %v484_v37  ;;  %488 = vadd.xlane.f32.xlu0 %v485_v38  ;;  %v495_v41 = vshrl.u32 %v451_v40, 16  ;;  %v494_v42 = vand.u32 65535, %v451_v40  ;;  %vm341_vm14 = vcmp.eq.f32.partialorder %v5281_v30, %v138_v39  ;;  %vm309_vm15 = vcmp.gt.f32.partialorder %v5281_v30, %v138_v39 }
 0x15f   :  { %vm389_vm0 = vmand %vm341_vm14, %vm9148_vm13  ;;  %vm9145_vm14 = vcmp.lt.s32.totalorder %v5278_v29, %v5328_v53  ;;  %v5485_v37 = vrot.slane %v5272_v25, %v5262_v16  ;;  %v5502_v39 = vadd.s32 104, %v5254_v12 }
 0x160   :  { %v497_v43 = vcvt.s32.f32 %v495_v41  ;;  %v496_v44 = vcvt.s32.f32 %v494_v42  ;;  %vm421_vm8 = vmor %vm309_vm15, %vm389_vm0 }
 0x161   :  { %v142_v45 = vpop.permute.xlu1 %141  ;;  %v453_v60 = vsel %vm421_vm8, 1, %v5202_v14 }
 0x162   :  { %500 = vadd.xlane.f32.xlu1 %v497_v43  ;;  %498 = vadd.xlane.f32.xlu0 %v496_v44  ;;  %vm342_vm5 = vcmp.eq.f32.partialorder %v5281_v30, %v142_v45  ;;  %vm310_vm9 = vcmp.gt.f32.partialorder %v5281_v30, %v142_v45  ;;  %v519_v5 = vshrl.u32 %v453_v60, 16  ;;  %v518_v7 = vand.u32 65535, %v453_v60 }
 0x163   :  { %vm5341_vm10 = vmand %vm342_vm5, %vm9151_vm4 }
 0x164   :  { %v521_v22 = vcvt.s32.f32 %v519_v5  ;;  %v520_v28 = vcvt.s32.f32 %v518_v7 }
 0x165   :  { %v146_v46 = vpop.permute.xlu1 %145 }
 0x166   :  { %vm343_vm15 = vcmp.eq.f32.partialorder %v5281_v30, %v146_v46  ;;  %vm311_vm8 = vcmp.gt.f32.partialorder %v5281_v30, %v146_v46 }
 0x169   :  { %v5305_v48 = vpop.permute.xlu1 %149 }
 0x16a   :  { %vm344_vm2 = vcmp.eq.f32.partialorder %v5281_v30, %v5305_v48 }
 0x16d   :  { %v5313_v50 = vpop.permute.xlu1 %153 }
 0x16f   :  { %v5318_v52 = vpop.xlane.xlu0 %109 }
 0x171   :  { %v5330_v54 = vpop.permute.xlu1 %157 }
 0x173   :  { %v134_v56 = vpop.permute.xlu0 %133 }
 0x174   :  { %vm308_vm11 = vcmp.gt.f32.partialorder %v5281_v30, %v134_v56  ;;  %vm340_vm12 = vcmp.eq.f32.partialorder %v5281_v30, %v134_v56 }
 0x175   :  { %vm388_vm0 = vmand %vm340_vm12, %vm372_vm6  ;;  %v5356_v59 = vpop.permute.xlu1 %165 }
 0x176   :  { %vm420_vm5 = vmor %vm308_vm11, %vm388_vm0  ;;  %vm9147_vm0 = vcmp.lt.s32.totalorder %v5278_v29, %v5346_v58  ;;  %vm316_vm7 = vcmp.gt.f32.partialorder %v5281_v30, %v5356_v59 }
 0x177   :  { %v5366_v62 = vpop.permute.xlu0 %161  ;;  %v452_v63 = vsel %vm420_vm5, 1, %v5202_v14  ;;  %vm422_vm11 = vmor %vm310_vm9, %vm5341_vm10  ;;  %vm345_vm5 = vcmp.eq.f32.partialorder %v5281_v30, %v5313_v50  ;;  %vm312_vm9 = vcmp.gt.f32.partialorder %v5281_v30, %v5305_v48 }
 0x178   :  { %vm5377_vm12 = vmand %vm343_vm15, %vm9145_vm14  ;;  %v507_v1 = vshrl.u32 %v452_v63, 16  ;;  %v506_v2 = vand.u32 65535, %v452_v63  ;;  %v454_v11 = vsel %vm422_vm11, 1, %v5202_v14  ;;  %vm9149_vm15 = vcmp.lt.s32.totalorder %v5278_v29, %v5364_v61 }
 0x179   :  { %v5388_v4 = vpop.permute.xlu1 %173  ;;  %vm5398_vm10 = vmand %vm344_vm2, %vm9146_vm1  ;;  %vm346_vm14 = vcmp.eq.f32.partialorder %v5281_v30, %v5330_v54  ;;  %vm313_vm11 = vcmp.gt.f32.partialorder %v5281_v30, %v5313_v50  ;;  %v531_v23 = vshrl.u32 %v454_v11, 16  ;;  %v530_v32 = vand.u32 65535, %v454_v11 }
 0x17a   :  { %v509_v9 = vcvt.s32.f32 %v507_v1  ;;  %v508_v10 = vcvt.s32.f32 %v506_v2  ;;  %vm5416_vm2 = vmor %vm311_vm8, %vm5377_vm12  ;;  %vm9150_vm8 = vcmp.lt.s32.totalorder %v5278_v29, %v5386_v3  ;;  %vm347_vm12 = vcmp.eq.f32.partialorder %v5281_v30, %v5366_v62 }
 0x17b   :  { %v5410_v15 = vpop.permute.xlu0 %169  ;;  %vm5428_vm1 = vmand %vm345_vm5, %vm9147_vm0  ;;  %vm314_vm0 = vcmp.gt.f32.partialorder %v5281_v30, %v5330_v54  ;;  %v455_v33 = vsel %vm5416_vm2, 1, %v5202_v14  ;;  %vm315_vm2 = vcmp.gt.f32.partialorder %v5281_v30, %v5366_v62  ;;  %v533_v40 = vcvt.s32.f32 %v531_v23 }
 0x17c   :  { %512 = vadd.xlane.f32.xlu1 %v509_v9  ;;  %510 = vadd.xlane.f32.xlu0 %v508_v10  ;;  %vm5446_vm5 = vmor %vm312_vm9, %vm5398_vm10  ;;  %vm9152_vm9 = vcmp.lt.s32.totalorder %v5278_v29, %v5408_v13  ;;  %vm348_vm10 = vcmp.eq.f32.partialorder %v5281_v30, %v5356_v59  ;;  %v543_v41 = vshrl.u32 %v455_v33, 16  ;;  %v542_v42 = vand.u32 65535, %v455_v33 }
 0x17d   :  { %v5439_v21 = vpop.permute.xlu1 %181  ;;  %vm5458_vm13 = vmand %vm346_vm14, %vm9149_vm15  ;;  %v456_v43 = vsel %vm5446_vm5, 1, %v5202_v14  ;;  %vm350_vm5 = vcmp.eq.f32.partialorder %v5281_v30, %v5388_v4  ;;  %v532_v46 = vcvt.s32.f32 %v530_v32  ;;  %vm349_vm4 = vcmp.eq.f32.partialorder %v5281_v30, %v5410_v15 }
 0x17e   :  { %vm5479_vm14 = vmor %vm313_vm11, %vm5428_vm1  ;;  %vm9154_vm1 = vcmp.lt.s32.totalorder %v5278_v29, %v5433_v20  ;;  %v5551_v54 = vadd.s32 112, %v5254_v12  ;;  %v555_v56 = vshrl.u32 %v456_v43, 16  ;;  %v545_v63 = vcvt.s32.f32 %v543_v41 }
 0x17f   :  { %v5472_v35 = vpop.permute.xlu0 %177  ;;  %vm5495_vm15 = vmand %vm347_vm12, %vm9150_vm8  ;;  %v544_v0 = vcvt.s32.f32 %v542_v42  ;;  %v554_v1 = vand.u32 65535, %v456_v43  ;;  %v457_v5 = vsel %vm5479_vm14, 1, %v5202_v14  ;;  %v9366_v9 = vmov 0 }
 0x180   :  { %524 = vadd.xlane.f32.xlu1 %v521_v22  ;;  %522 = vadd.xlane.f32.xlu0 %v520_v28  ;;  %vm5512_vm11 = vmor %vm314_vm0, %vm5458_vm13  ;;  %vm9155_vm0 = vcmp.lt.s32.totalorder %v5278_v29, %v5470_v34  ;;  %v557_v51 = vcvt.s32.f32 %v555_v56  ;;  %v9369_v59 = vmov 0  ;;  %v567_v17 = vshrl.u32 %v457_v5, 16 }
 0x181   :  { %v193_v25 = vpop.permute.xlu1 %192  ;;  %vm5522_vm12 = vmand %vm348_vm10, %vm9152_vm9  ;;  %v556_v11 = vcvt.s32.f32 %v554_v1  ;;  %v566_v18 = vand.u32 65535, %v457_v5  ;;  %v458_v22 = vsel %vm5512_vm11, 1, %v5202_v14  ;;  %vm9376_vm11 = vcmp.gt.f32.partialorder %v5281_v30, %v5410_v15 }
 0x182   :  { %vm322_vm8 = vcmp.gt.f32.partialorder %v5485_v37, %v193_v25  ;;  %vm354_vm13 = vcmp.eq.f32.partialorder %v5485_v37, %v193_v25  ;;  %vm5544_vm9 = vmor %vm315_vm2, %vm5495_vm15  ;;  %vm9156_vm2 = vcmp.lt.s32.totalorder %v5278_v29, %v5502_v39  ;;  %v569_v28 = vcvt.s32.f32 %v567_v17 }
 0x183   :  { %vm402_vm10 = vmand %vm354_vm13, %vm370_vm3  ;;  %v5537_v48 = vpop.permute.xlu0 %185  ;;  %v579_v32 = vshrl.u32 %v458_v22, 16  ;;  %v578_v33 = vand.u32 65535, %v458_v22  ;;  %v568_v36 = vcvt.s32.f32 %v566_v18  ;;  %v459_v38 = vsel %vm5544_vm9, 1, %v5202_v14 }
 0x184   :  { %536 = vadd.xlane.f32.xlu1 %v533_v40  ;;  %534 = vadd.xlane.f32.xlu0 %v532_v46  ;;  %vm5553_vm3 = vmor %vm322_vm8, %vm402_vm10  ;;  %v5688_v41 = vadd.s32 120, %v5254_v12  ;;  %v591_v44 = vshrl.u32 %v459_v38, 16  ;;  %v590_v45 = vand.u32 65535, %v459_v38  ;;  %v9396_v50 = vmov 0 }
 0x185   :  { %v9359_v57 = vsel %vm5553_vm3, 4294967295, %v9358_v57  ;;  %vm5563_vm15 = vmand %vm350_vm5, %vm9154_vm1  ;;  %v201_v62 = vpop.permute.xlu1 %200  ;;  %vm9384_vm3 = vcmp.lt.s32.totalorder %v5278_v29, %v5303_v47  ;;  %v581_v42 = vcvt.s32.f32 %v579_v32  ;;  %v580_v43 = vcvt.s32.f32 %v578_v33 }
 0x186   :  { %vm5575_vm8 = vmand %vm349_vm4, %vm9155_vm0  ;;  %vm324_vm13 = vcmp.gt.f32.partialorder %v5485_v37, %v201_v62  ;;  %vm356_vm10 = vcmp.eq.f32.partialorder %v5485_v37, %v201_v62  ;;  %vm9371_vm0 = vcmp.lt.s32.totalorder %v5278_v29, %v5286_v31  ;;  %v593_v62 = vcvt.s32.f32 %v591_v44 }
 0x187   :  { %vm404_vm1 = vmand %vm356_vm10, %vm372_vm6  ;;  %v197_v7 = vpop.permute.xlu0 %196  ;;  %v9407_v1 = vmov 0 }
 0x188   :  { %vm5594_vm4 = vmor %vm316_vm7, %vm5522_vm12  ;;  %vm355_vm14 = vcmp.eq.f32.partialorder %v5485_v37, %v197_v7  ;;  %548 = vadd.xlane.f32.xlu1 %v545_v63  ;;  %546 = vadd.xlane.f32.xlu0 %v544_v0  ;;  %vm9368_vm12 = vcmp.eq.f32.partialorder %v5281_v30, %v5472_v35 }
 0x189   :  { %vm5602_vm6 = vmor %vm324_vm13, %vm404_vm1  ;;  %v209_v10 = vpop.permute.xlu1 %208  ;;  %vm352_vm13 = vcmp.eq.f32.partialorder %v5281_v30, %v5439_v21  ;;  %v460_v46 = vsel %vm5594_vm4, 1, %v5202_v14 }
 0x18a   :  { %v9367_v9 = vsel %vm5602_vm6, 4294967295, %v9366_v9  ;;  %vm5614_vm10 = vmand %vm9368_vm12, %vm9156_vm2  ;;  %vm326_vm7 = vcmp.gt.f32.partialorder %v5485_v37, %v209_v10  ;;  %vm358_vm5 = vcmp.eq.f32.partialorder %v5485_v37, %v209_v10  ;;  %vm9372_vm12 = vcmp.gt.f32.partialorder %v5485_v37, %v197_v7 }
 0x18b   :  { %v9370_v59 = vsel %vm5614_vm10, 4294967295, %v9369_v59  ;;  %vm403_vm1 = vmand %vm355_vm14, %vm9371_vm0  ;;  %vm9375_vm14 = vcmp.lt.s32.totalorder %v5278_v29, %v5311_v49  ;;  %v205_v23 = vpop.permute.xlu0 %204  ;;  %v603_v63 = vshrl.u32 %v460_v46, 16  ;;  %v602_v0 = vand.u32 65535, %v460_v46 }
 0x18c   :  { %vm5630_vm2 = vmor %vm9372_vm12, %vm403_vm1  ;;  %vm357_vm10 = vcmp.eq.f32.partialorder %v5485_v37, %v205_v23  ;;  %560 = vadd.xlane.f32.xlu1 %v557_v51  ;;  %558 = vadd.xlane.f32.xlu0 %v556_v11  ;;  %vm9399_vm4 = vnez %v9370_v59 }
 0x18d   :  { %vm406_vm6 = vmand %vm358_vm5, %vm9375_vm14  ;;  %vm9381_vm5 = vcmp.lt.s32.totalorder %v5278_v29, %v5551_v54  ;;  %v217_v15 = vpop.permute.xlu1 %216  ;;  %v605_v8 = vcvt.s32.f32 %v603_v63  ;;  %v604_v51 = vcvt.s32.f32 %v602_v0  ;;  %v467_v0 = vsel %vm5630_vm2, 1, %v5202_v14 }
 0x18e   :  { %vm5646_vm1 = vmor %vm9376_vm11, %vm5575_vm8  ;;  %vm328_vm8 = vcmp.gt.f32.partialorder %v5485_v37, %v217_v15  ;;  %vm9391_vm11 = vcmp.lt.s32.totalorder %v5278_v29, %v5335_v55  ;;  %v686_v5 = vand.u32 65535, %v467_v0 }
 0x18f   :  { %vm5650_vm12 = vmor %vm326_vm7, %vm406_vm6  ;;  %vm360_vm6 = vcmp.eq.f32.partialorder %v5485_v37, %v217_v15  ;;  %vm9385_vm7 = vcmp.gt.f32.partialorder %v5281_v30, %v5388_v4  ;;  %v213_v40 = vpop.permute.xlu0 %212  ;;  %v9392_v4 = vmov 0  ;;  %v461_v2 = vsel %vm5646_vm1, 1, %v5202_v14 }
 0x190   :  { %v9380_v27 = vsel %vm5650_vm12, 4294967295, %v9379_v27  ;;  %vm5657_vm14 = vmand %vm352_vm13, %vm9381_vm5  ;;  %572 = vadd.xlane.f32.xlu1 %v569_v28  ;;  %570 = vadd.xlane.f32.xlu0 %v568_v36  ;;  %vm9415_vm1 = vcmp.lt.s32.totalorder %v5278_v29, %v5688_v41  ;;  %v615_v10 = vshrl.u32 %v461_v2, 16  ;;  %v614_v11 = vand.u32 65535, %v461_v2 }
 0x191   :  { %vm405_vm0 = vmand %vm357_vm10, %vm9384_vm3  ;;  %vm9388_vm3 = vcmp.gt.f32.partialorder %v5485_v37, %v205_v23  ;;  %v225_v55 = vpop.permute.xlu1 %224  ;;  %v687_v2 = vshrl.u32 %v467_v0, 16  ;;  %vm9439_vm2 = vnez %v9380_v27 }
 0x192   :  { %vm5674_vm13 = vmor %vm9385_vm7, %vm5563_vm15  ;;  %vm359_vm15 = vcmp.eq.f32.partialorder %v5485_v37, %v213_v40  ;;  %vm362_vm9 = vcmp.eq.f32.partialorder %v5485_v37, %v225_v55  ;;  %v616_v49 = vcvt.s32.f32 %v614_v11 }
 0x193   :  { %vm5680_vm10 = vmor %vm9388_vm3, %vm405_vm0  ;;  %vm9405_vm0 = vcmp.lt.s32.totalorder %v5278_v29, %v5346_v58  ;;  %v462_v59 = vsel %vm5674_vm13, 1, %v5202_v14  ;;  %v689_v7 = vcvt.s32.f32 %v687_v2 }
 0x194   :  { %vm408_vm5 = vmand %vm360_vm6, %vm9391_vm11  ;;  %vm9394_vm6 = vcmp.lt.s32.totalorder %v5278_v29, %v5328_v53  ;;  %vm330_vm11 = vcmp.gt.f32.partialorder %v5485_v37, %v225_v55  ;;  %v221_v53 = vpop.permute.xlu0 %220  ;;  %584 = vadd.xlane.f32.xlu1 %v581_v42  ;;  %582 = vadd.xlane.f32.xlu0 %v580_v43  ;;  %v627_v23 = vshrl.u32 %v462_v59, 16  ;;  %v626_v24 = vand.u32 65535, %v462_v59 }
 0x195   :  { %vm5692_vm7 = vmor %vm328_vm8, %vm408_vm5  ;;  %vm9395_vm8 = vcmp.gt.f32.partialorder %v5485_v37, %v213_v40  ;;  %vm361_vm12 = vcmp.eq.f32.partialorder %v5485_v37, %v221_v53  ;;  %v233_v60 = vpop.permute.xlu1 %232  ;;  %v469_v31 = vsel %vm5680_vm10, 1, %v5202_v14 }
 0x196   :  { %v9393_v4 = vsel %vm5692_vm7, 4294967295, %v9392_v4  ;;  %vm407_vm3 = vmand %vm359_vm15, %vm9394_vm6  ;;  %vm9398_vm15 = vcmp.lt.s32.totalorder %v5278_v29, %v5364_v61  ;;  %v9403_v61 = vmov 0  ;;  %v628_v33 = vcvt.s32.f32 %v626_v24 }
 0x197   :  { %vm5708_vm5 = vmor %vm9395_vm8, %vm407_vm3  ;;  %vm9400_vm3 = vcmp.gt.f32.partialorder %v5281_v30, %v5472_v35  ;;  %v592_v35 = vcvt.s32.f32 %v590_v45  ;;  %v711_v11 = vshrl.u32 %v469_v31, 16  ;;  %vm9441_vm10 = vnez %v9393_v4 }
 0x198   :  { %v9397_v50 = vsel %vm5708_vm5, 4294967295, %v9396_v50  ;;  %vm410_vm6 = vmand %vm362_vm9, %vm9398_vm15  ;;  %v229_v58 = vpop.permute.xlu0 %228  ;;  %596 = vadd.xlane.f32.xlu1 %v593_v62  ;;  %vm9418_vm15 = vcmp.lt.s32.totalorder %v5278_v29, %v5386_v3  ;;  %v472_v27 = vsel %vm9441_vm10, 1, %v5202_v14 }
 0x199   :  { %vm5724_vm8 = vmor %vm9400_vm3, %vm9399_vm4  ;;  %vm353_vm4 = vcmp.eq.f32.partialorder %v5281_v30, %v5537_v48  ;;  %vm332_vm3 = vcmp.gt.f32.partialorder %v5485_v37, %v233_v60  ;;  %vm363_vm5 = vcmp.eq.f32.partialorder %v5485_v37, %v229_v58  ;;  %594 = vadd.xlane.f32.xlu0 %v592_v35 }
 0x19a   :  { %vm5728_vm9 = vmor %vm330_vm11, %vm410_vm6  ;;  %vm364_vm11 = vcmp.eq.f32.partialorder %v5485_v37, %v233_v60  ;;  %vm9406_vm6 = vcmp.gt.f32.partialorder %v5485_v37, %v221_v53 }
 0x19b   :  { %v9404_v61 = vsel %vm5728_vm9, 4294967295, %v9403_v61  ;;  %vm409_vm7 = vmand %vm361_vm12, %vm9405_vm0  ;;  %vm9409_vm12 = vcmp.lt.s32.totalorder %v5278_v29, %v5408_v13  ;;  %v9413_v13 = vmov 0 }
 0x19c   :  { %vm5743_vm9 = vmor %vm9406_vm6, %vm409_vm7  ;;  %vm9410_vm7 = vcmp.gt.f32.partialorder %v5281_v30, %v5439_v21  ;;  %v241_v21 = vpop.permute.xlu1 %240  ;;  %v237_v3 = vpop.permute.xlu0 %236  ;;  %608 = vadd.xlane.f32.xlu1 %v605_v8 }
 0x19d   :  { %v9408_v1 = vsel %vm5743_vm9, 4294967295, %v9407_v1  ;;  %vm412_vm0 = vmand %vm364_vm11, %vm9409_vm12  ;;  %vm365_vm13 = vcmp.eq.f32.partialorder %v5485_v37, %v237_v3  ;;  %606 = vadd.xlane.f32.xlu0 %v604_v51 }
 0x19e   :  { %vm5760_vm6 = vmor %vm9410_vm7, %vm5657_vm14  ;;  %vm334_vm14 = vcmp.gt.f32.partialorder %v5485_v37, %v241_v21  ;;  %vm333_vm7 = vcmp.gt.f32.partialorder %v5485_v37, %v237_v3  ;;  %v710_v3 = vand.u32 65535, %v469_v31 }
 0x19f   :  { %vm5764_vm11 = vmor %vm332_vm3, %vm412_vm0  ;;  %vm366_vm3 = vcmp.eq.f32.partialorder %v5485_v37, %v241_v21  ;;  %v464_v55 = vsel %vm5760_vm6, 1, %v5202_v14  ;;  %vm9437_vm6 = vnez %v9359_v57  ;;  %v688_v21 = vcvt.s32.f32 %v686_v5 }
 0x1a0   :  { %v9414_v13 = vsel %vm5764_vm11, 4294967295, %v9413_v13  ;;  %vm5771_vm12 = vmand %vm353_vm4, %vm9415_vm1  ;;  %vm9419_vm4 = vcmp.gt.f32.partialorder %v5485_v37, %v229_v58  ;;  %v249_v22 = vpop.permute.xlu1 %248  ;;  %v245_v28 = vpop.permute.xlu0 %244  ;;  %v651_v42 = vshrl.u32 %v464_v55, 16  ;;  %v650_v43 = vand.u32 65535, %v464_v55 }
 0x1a1   :  { %vm411_vm9 = vmand %vm363_vm5, %vm9418_vm15  ;;  %vm9422_vm5 = vcmp.lt.s32.totalorder %v5278_v29, %v5433_v20  ;;  %v617_v20 = vcvt.s32.f32 %v615_v10  ;;  %618 = vadd.xlane.f32.xlu0 %v616_v49 }
 0x1a2   :  { %vm5785_vm0 = vmor %vm9419_vm4, %vm411_vm9  ;;  %vm9425_vm9 = vcmp.lt.s32.totalorder %v5278_v29, %v5470_v34  ;;  %v463_v34 = vsel %vm5724_vm8, 1, %v5202_v14  ;;  %v652_v45 = vcvt.s32.f32 %v650_v43 }
 0x1a3   :  { %vm414_vm15 = vmand %vm366_vm3, %vm9422_vm5  ;;  %vm336_vm3 = vcmp.gt.f32.partialorder %v5485_v37, %v249_v22  ;;  %vm368_vm5 = vcmp.eq.f32.partialorder %v5485_v37, %v249_v22  ;;  %620 = vadd.xlane.f32.xlu1 %v617_v20  ;;  %v639_v36 = vshrl.u32 %v463_v34, 16  ;;  %v638_v38 = vand.u32 65535, %v463_v34 }
 0x1a4   :  { %vm5794_vm1 = vmor %vm334_vm14, %vm414_vm15  ;;  %vm9428_vm14 = vcmp.lt.s32.totalorder %v5278_v29, %v5551_v54  ;;  %v629_v54 = vcvt.s32.f32 %v627_v23  ;;  %v253_v40 = vpop.permute.xlu0 %252  ;;  %v713_v22 = vcvt.s32.f32 %v711_v11  ;;  %v712_v23 = vcvt.s32.f32 %v710_v3 }
 0x1a5   :  { %vm413_vm4 = vmand %vm365_vm13, %vm9425_vm9  ;;  %vm335_vm9 = vcmp.gt.f32.partialorder %v5485_v37, %v245_v28  ;;  %630 = vadd.xlane.f32.xlu0 %v628_v33 }
 0x1a6   :  { %vm5803_vm11 = vmor %vm333_vm7, %vm413_vm4  ;;  %vm367_vm7 = vcmp.eq.f32.partialorder %v5485_v37, %v245_v28  ;;  %vm321_vm4 = vcmp.gt.f32.partialorder %v5281_v30, %v5537_v48  ;;  %v640_v48 = vcvt.s32.f32 %v638_v38  ;;  %v747_v38 = vshrl.u32 %v472_v27, 16 }
 0x1a7   :  { %vm416_vm15 = vmand %vm368_vm5, %vm9428_vm14  ;;  %vm9431_vm5 = vcmp.lt.s32.totalorder %v5278_v29, %v5502_v39  ;;  %632 = vadd.xlane.f32.xlu1 %v629_v54  ;;  %v641_v39 = vcvt.s32.f32 %v639_v36  ;;  %v477_v17 = vsel %vm5803_vm11, 1, %v5202_v14  ;;  %v892_v30 = vsub.s32 6, %v5254_v12 }
 0x1a8   :  { %vm5813_vm13 = vmor %vm336_vm3, %vm416_vm15  ;;  %vm337_vm3 = vcmp.gt.f32.partialorder %v5485_v37, %v253_v40  ;;  %vm369_vm15 = vcmp.eq.f32.partialorder %v5485_v37, %v253_v40  ;;  %v653_v37 = vcvt.s32.f32 %v651_v42  ;;  %v746_v40 = vand.u32 65535, %v472_v27 }
 0x1a9   :  { %vm415_vm14 = vmand %vm367_vm7, %vm9431_vm5  ;;  %642 = vadd.xlane.f32.xlu0 %v640_v48  ;;  %v749_v55 = vcvt.s32.f32 %v747_v38  ;;  %v807_v2 = vshrl.u32 %v477_v17, 16  ;;  %v806_v5 = vand.u32 65535, %v477_v17  ;;  %v480_v3 = vsel %vm5813_vm13, 1, %v5202_v14 }
 0x1aa   :  { %vm5824_vm8 = vmor %vm335_vm9, %vm415_vm14  ;;  %vm9434_vm9 = vcmp.lt.s32.totalorder %v5278_v29, %v5688_v41  ;;  %v466_v41 = vsel %vm9437_vm6, 1, %v5202_v14  ;;  %v888_v27 = vsub.s32 5, %v5254_v12  ;;  %vm9450_vm11 = vcmask 1041408  }
 0x1ab   :  { %vm433_vm7 = vmor %vm321_vm4, %vm5771_vm12  ;;  %644 = vadd.xlane.f32.xlu1 %v641_v39  ;;  %v675_v62 = vshrl.u32 %v466_v41, 16  ;;  %v674_v63 = vand.u32 65535, %v466_v41  ;;  %vm9438_vm12 = vnez %v9367_v9  ;;  %v470_v9 = vsel %vm9439_vm2, 1, %v5202_v14 }
 0x1ac   :  { %vm417_vm5 = vmand %vm369_vm15, %vm9434_vm9  ;;  %v465_v44 = vsel %vm433_vm7, 1, %v5202_v14  ;;  %v468_v57 = vsel %vm9438_vm12, 1, %v5202_v14  ;;  %v723_v24 = vshrl.u32 %v470_v9, 16  ;;  %v722_v20 = vand.u32 65535, %v470_v9 }
 0x1ad   :  { %vm5838_vm14 = vmor %vm337_vm3, %vm417_vm5  ;;  %v663_v46 = vshrl.u32 %v465_v44, 16  ;;  %v662_v53 = vand.u32 65535, %v465_v44  ;;  %654 = vadd.xlane.f32.xlu0 %v652_v45  ;;  %v677_v35 = vcvt.s32.f32 %v675_v62  ;;  %v676_v58 = vcvt.s32.f32 %v674_v63 }
 0x1ae   :  { %v699_v8 = vshrl.u32 %v468_v57, 16  ;;  %v698_v51 = vand.u32 65535, %v468_v57  ;;  %vm9440_vm4 = vnez %v9397_v50  ;;  %v725_v49 = vcvt.s32.f32 %v723_v24 }
 0x1af   :  { %656 = vadd.xlane.f32.xlu1 %v653_v37  ;;  %v665_v56 = vcvt.s32.f32 %v663_v46  ;;  %v664_v60 = vcvt.s32.f32 %v662_v53  ;;  %v471_v25 = vsel %vm9440_vm4, 1, %v5202_v14  ;;  %v724_v28 = vcvt.s32.f32 %v722_v20 }
 0x1b0   :  { %v701_v59 = vcvt.s32.f32 %v699_v8  ;;  %v700_v10 = vcvt.s32.f32 %v698_v51  ;;  %v735_v34 = vshrl.u32 %v471_v25, 16  ;;  %v734_v54 = vand.u32 65535, %v471_v25 }
 0x1b1   :  { %666 = vadd.xlane.f32.xlu0 %v664_v60  ;;  %vm9442_vm3 = vnez %v9408_v1  ;;  %v748_v39 = vcvt.s32.f32 %v746_v40  ;;  %vm9443_vm15 = vnez %v9404_v61  ;;  %v475_v1 = vsel %vm5785_vm0, 1, %v5202_v14 }
 0x1b2   :  { %v737_v33 = vcvt.s32.f32 %v735_v34  ;;  %v736_v36 = vcvt.s32.f32 %v734_v54  ;;  %v473_v50 = vsel %vm9442_vm3, 1, %v5202_v14  ;;  %v474_v4 = vsel %vm9443_vm15, 1, %v5202_v14 }
 0x1b3   :  { %668 = vadd.xlane.f32.xlu1 %v665_v56  ;;  %v759_v48 = vshrl.u32 %v473_v50, 16  ;;  %v758_v42 = vand.u32 65535, %v473_v50  ;;  %v771_v37 = vshrl.u32 %v474_v4, 16  ;;  %v770_v45 = vand.u32 65535, %v474_v4 }
 0x1b4   :  { %v783_v41 = vshrl.u32 %v475_v1, 16  ;;  %v782_v56 = vand.u32 65535, %v475_v1  ;;  %vm9444_vm7 = vnez %v9414_v13  ;;  %v478_v13 = vsel %vm5794_vm1, 1, %v5202_v14 }
 0x1b5   :  { %678 = vadd.xlane.f32.xlu0 %v676_v58  ;;  %v761_v43 = vcvt.s32.f32 %v759_v48  ;;  %v760_v44 = vcvt.s32.f32 %v758_v42  ;;  %v773_v46 = vcvt.s32.f32 %v771_v37  ;;  %v772_v53 = vcvt.s32.f32 %v770_v45 }
 0x1b6   :  { %v476_v61 = vsel %vm9444_vm7, 1, %v5202_v14  ;;  %v785_v60 = vcvt.s32.f32 %v783_v41  ;;  %v784_v62 = vcvt.s32.f32 %v782_v56  ;;  %v111_v57 = vsub.f32 %v5265_v19, %v5318_v52 }
 0x1b7   :  { %680 = vadd.xlane.f32.xlu1 %v677_v35  ;;  %v795_v63 = vshrl.u32 %v476_v61, 16  ;;  %v794_v0 = vand.u32 65535, %v476_v61  ;;  %v819_v8 = vshrl.u32 %v478_v13, 16  ;;  %v818_v15 = vand.u32 65535, %v478_v13 }
 0x1b8   :  { %v479_v51 = vsel %vm5824_vm8, 1, %v5202_v14  ;;  %v112_v31 = vmul.f32 1.442695, %v111_v57  ;;  %v843_v9 = vshrl.u32 %v480_v3, 16  ;;  %v481_v47 = vsel %vm5838_vm14, 1, %v5202_v14 }
 0x1b9   :  { %690 = vadd.xlane.f32.xlu0 %v688_v21  ;;  %v797_v35 = vcvt.s32.f32 %v795_v63  ;;  %v796_v58 = vcvt.s32.f32 %v794_v0  ;;  %v808_v21 = vcvt.s32.f32 %v806_v5  ;;  %v831_v18 = vshrl.u32 %v479_v51, 16 }
 0x1ba   :  { %v830_v11 = vand.u32 65535, %v479_v51  ;;  %5146 = vpow2.f32 %v112_v31  ;;  %v855_v20 = vshrl.u32 %v481_v47, 16  ;;  %v854_v25 = vand.u32 65535, %v481_v47 }
 0x1bb   :  { %692 = vadd.xlane.f32.xlu1 %v689_v7  ;;  %v809_v7 = vcvt.s32.f32 %v807_v2  ;;  %v833_v19 = vcvt.s32.f32 %v831_v18  ;;  %v880_v34 = vsub.s32 3, %v5254_v12  ;;  %v884_v54 = vsub.s32 4, %v5254_v12 }
 0x1bc   :  { %v832_v52 = vcvt.s32.f32 %v830_v11  ;;  %v856_v38 = vcvt.s32.f32 %v854_v25  ;;  %v896_v4 = vsub.s32 7, %v5254_v12  ;;  %v5912_v1 = vrot.slane %v5254_v12, %v892_v30 }
 0x1bd   :  { %702 = vadd.xlane.f32.xlu0 %v700_v10  ;;  %v820_v10 = vcvt.s32.f32 %v818_v15  ;;  %v5902_v42 = vrot.slane %v5254_v12, %v880_v34  ;;  %v5990_v15 = vrot.slane %v5254_v12, %v189_v26 }
 0x1be   :  { %9449 = vst [vmem:[#allocation13_spill] sm:$0xff] %v5912_v1  ;;  %v5921_v41 = vrot.slane %v5254_v12, %v896_v4 }
 0x1bf   :  { %704 = vadd.xlane.f32.xlu1 %v701_v59  ;;  %v821_v59 = vcvt.s32.f32 %v819_v8  ;;  %9446 = vst [vmem:[#allocation10_spill] sm:$0xff] %v5902_v42  ;;  %v5983_v8 = vrot.slane %v5254_v12, %v5262_v16  ;;  %9459 = vst [vmem:[#allocation22_spill] sm:$0xff] %v5990_v15 }
 0x1c0   :  { %9451 = vst [vmem:[#allocation14_spill] sm:$0xff] %v5921_v41 }
 0x1c1   :  { %714 = vadd.xlane.f32.xlu0 %v712_v23  ;;  %v845_v23 = vcvt.s32.f32 %v843_v9  ;;  %9458 = vst [vmem:[#allocation21_spill] sm:$0xff] %v5983_v8 }
 0x1c3   :  { %716 = vadd.xlane.f32.xlu1 %v713_v22  ;;  %v842_v22 = vand.u32 65535, %v480_v3 }
 0x1c4   :  { %v5897_v40 = vpop.eup %5146 }
 0x1c5   :  { %726 = vadd.xlane.f32.xlu0 %v724_v28  ;;  %v844_v24 = vcvt.s32.f32 %v842_v22  ;;  %9445 = vst [vmem:[#allocation9_spill] sm:$0xff] %v5897_v40 }
 0x1c7   :  { %728 = vadd.xlane.f32.xlu1 %v725_v49 }
 0x1c9   :  { %738 = vadd.xlane.f32.xlu0 %v736_v36  ;;  %v857_v36 = vcvt.s32.f32 %v855_v20 }
 0x1cb   :  { %740 = vadd.xlane.f32.xlu1 %v737_v33 }
 0x1cd   :  { %750 = vadd.xlane.f32.xlu0 %v748_v39 }
 0x1cf   :  { %752 = vadd.xlane.f32.xlu1 %v749_v55 }
 0x1d1   :  { %762 = vadd.xlane.f32.xlu0 %v760_v44  ;;  %v5909_v44 = vrot.slane %v5254_v12, %v888_v27 }
 0x1d3   :  { %764 = vadd.xlane.f32.xlu1 %v761_v43  ;;  %v5906_v43 = vrot.slane %v5254_v12, %v884_v54  ;;  %9448 = vst [vmem:[#allocation12_spill] sm:$0xff] %v5909_v44 }
 0x1d5   :  { %774 = vadd.xlane.f32.xlu0 %v772_v53  ;;  %9447 = vst [vmem:[#allocation11_spill] sm:$0xff] %v5906_v43 }
 0x1d7   :  { %776 = vadd.xlane.f32.xlu1 %v773_v46  ;;  %v114_v46 = vsel %vm9450_vm11, %v5897_v40, 0.0 }
 0x1d9   :  { %786 = vadd.xlane.f32.xlu0 %v784_v62 }
 0x1db   :  { %788 = vadd.xlane.f32.xlu1 %v785_v60 }
 0x1dd   :  { %798 = vadd.xlane.f32.xlu0 %v796_v58 }
 0x1df   :  { %800 = vadd.xlane.f32.xlu1 %v797_v35 }
 0x1e1   :  { %810 = vadd.xlane.f32.xlu0 %v808_v21 }
 0x1e3   :  { %812 = vadd.xlane.f32.xlu1 %v809_v7 }
 0x1e5   :  { %822 = vadd.xlane.f32.xlu0 %v820_v10 }
 0x1e7   :  { %824 = vadd.xlane.f32.xlu1 %v821_v59 }
 0x1e9   :  { %834 = vadd.xlane.f32.xlu0 %v832_v52 }
 0x1eb   :  { %836 = vadd.xlane.f32.xlu1 %v833_v19  ;;  %v487_v49 = vpop.xlane.xlu1 %486  ;;  %v489_v32 = vpop.xlane.xlu0 %488 }
 0x1ec   :  { %v491_v28 = vcvt.f32.s32 %v489_v32  ;;  %v490_v14 = vcvt.f32.s32 %v487_v49 }
 0x1ed   :  { %846 = vadd.xlane.f32.xlu0 %v844_v24 }
 0x1ee   :  { %v492_v33 = vshll.u32 %v491_v28, 16 }
 0x1ef   :  { %848 = vadd.xlane.f32.xlu1 %v845_v23  ;;  %v501_v50 = vpop.xlane.xlu1 %500  ;;  %v499_v55 = vpop.xlane.xlu0 %498 }
 0x1f0   :  { %v5899_v39 = vadd.s32 %v492_v33, %v490_v14  ;;  %v503_v48 = vcvt.f32.s32 %v501_v50  ;;  %v502_v45 = vcvt.f32.s32 %v499_v55 }
 0x1f1   :  { %858 = vadd.xlane.f32.xlu0 %v856_v38 }
 0x1f2   :  { %v504_v37 = vshll.u32 %v503_v48, 16  ;;  %vm946_vm0 = vcmp.eq.s32.totalorder %v5899_v39, %v5902_v42  ;;  %vm962_vm1 = vcmp.eq.s32.totalorder %v5899_v39, %v5906_v43  ;;  %vm978_vm13 = vcmp.eq.s32.totalorder %v5899_v39, %v5909_v44 }
 0x1f3   :  { %860 = vadd.xlane.f32.xlu1 %v857_v36  ;;  %vm994_vm9 = vcmp.eq.s32.totalorder %v5899_v39, %v5912_v1  ;;  %v5932_v56 = vsel %vm946_vm0, 1.0, %v9178_v6  ;;  %v5940_v62 = vsel %vm962_vm1, 1.0, %v9178_v6  ;;  %v5943_v63 = vsel %vm978_vm13, 1.0, %v9178_v6 }
 0x1f4   :  { %v5916_v53 = vadd.s32 %v504_v37, %v502_v45  ;;  %9452 = vst [vmem:[#allocation15_spill] sm:$0xff] %v5943_v63  ;;  %vm1010_vm5 = vcmp.eq.s32.totalorder %v5899_v39, %v5921_v41  ;;  %v5954_v0 = vsel %vm994_vm9, 1.0, %v9178_v6  ;;  %vm898_vm10 = vcmp.eq.s32.totalorder %v5899_v39, %v5983_v8 }
 0x1f5   :  { %115 = vadd.xlane.f32.xlu0 %v114_v46  ;;  %9453 = vst [vmem:[#allocation16_spill] sm:$0xff] %v5954_v0  ;;  %v5974_v57 = vsel %vm1010_vm5, 1.0, %v9178_v6  ;;  %v4132_v31 = vsel %vm898_vm10, 1.0, %v9178_v6  ;;  %vm914_vm15 = vcmp.eq.s32.totalorder %v5899_v39, %v5990_v15 }
 0x1f6   :  { %vm947_vm8 = vcmp.eq.s32.totalorder %v5916_v53, %v5902_v42  ;;  %vm963_vm14 = vcmp.eq.s32.totalorder %v5916_v53, %v5906_v43  ;;  %vm979_vm6 = vcmp.eq.s32.totalorder %v5916_v53, %v5909_v44  ;;  %vm995_vm12 = vcmp.eq.s32.totalorder %v5916_v53, %v5912_v1  ;;  %9456 = vst [vmem:[#allocation19_spill] sm:$0xff] %v5974_v57 }
 0x1f7   :  { %v5935_v61 = vsel %vm947_vm8, 1.0, %v9178_v6  ;;  %v5957_v17 = vsel %vm963_vm14, 1.0, %v9178_v6  ;;  %v5960_v35 = vsel %vm979_vm6, 1.0, %v9178_v6  ;;  %v5963_v58 = vsel %vm995_vm12, 1.0, %v9178_v6 }
 0x1f8   :  { %9454 = vst [vmem:[#allocation17_spill] sm:$0xff] %v5960_v35  ;;  %9455 = vst [vmem:[#allocation18_spill] sm:$0xff] %v5963_v58  ;;  %vm1011_vm2 = vcmp.eq.s32.totalorder %v5916_v53, %v5921_v41  ;;  %vm899_vm4 = vcmp.eq.s32.totalorder %v5916_v53, %v5983_v8  ;;  %vm915_vm3 = vcmp.eq.s32.totalorder %v5916_v53, %v5990_v15  ;;  %v4148_v11 = vsel %vm914_vm15, 1.0, %v9178_v6 }
 0x1f9   :  { %v5977_v7 = vsel %vm1011_vm2, 1.0, %v9178_v6  ;;  %v4133_v51 = vsel %vm899_vm4, 1.0, %v9178_v6  ;;  %v4149_v18 = vsel %vm915_vm3, 1.0, %v9178_v6  ;;  %v9476_v63 = vpack.i.bf16 %v5935_v61, %v5932_v56 }
 0x1fa   :  { %9457 = vst [vmem:[#allocation20_spill] sm:$0xff] %v5977_v7  ;;  %v4505_v16 = vpack.i.bf16 %v4133_v51, %v4132_v31  ;;  %v4546_v52 = vpack.i.bf16 %v4149_v18, %v4148_v11 }
 0x209   :  { %v513_v59 = vpop.xlane.xlu1 %512  ;;  %v511_v10 = vpop.xlane.xlu0 %510 }
 0x20a   :  { %v515_v26 = vcvt.f32.s32 %v513_v59  ;;  %v514_v19 = vcvt.f32.s32 %v511_v10 }
 0x20b   :  { %4506 = vperm.xlu0 %4504, %v4505_v16  }
 0x20c   :  { %v516_v3 = vshll.u32 %v515_v26, 16 }
 0x20d   :  { %v525_v9 = vpop.xlane.xlu1 %524  ;;  %v523_v22 = vpop.xlane.xlu0 %522 }
 0x20e   :  { %v6002_v47 = vadd.s32 %v516_v3, %v514_v19  ;;  %v527_v23 = vcvt.f32.s32 %v525_v9  ;;  %v526_v20 = vcvt.f32.s32 %v523_v22 }
 0x20f   :  { %4547 = vperm.xlu0 %4504, %v4546_v52  }
 0x210   :  { %v528_v24 = vshll.u32 %v527_v23, 16  ;;  %vm900_vm7 = vcmp.eq.s32.totalorder %v6002_v47, %v5983_v8  ;;  %vm916_vm3 = vcmp.eq.s32.totalorder %v6002_v47, %v5990_v15 }
 0x211   :  { %v537_v25 = vpop.xlane.xlu1 %536  ;;  %v535_v49 = vpop.xlane.xlu0 %534  ;;  %v4134_v14 = vsel %vm900_vm7, 1.0, %v9178_v6  ;;  %vm948_vm7 = vcmp.eq.s32.totalorder %v6002_v47, %v5902_v42 }
 0x212   :  { %v6004_v32 = vadd.s32 %v528_v24, %v526_v20  ;;  %v539_v28 = vcvt.f32.s32 %v537_v25  ;;  %v538_v54 = vcvt.f32.s32 %v535_v49 }
 0x214   :  { %v540_v34 = vshll.u32 %v539_v28, 16  ;;  %vm901_vm11 = vcmp.eq.s32.totalorder %v6004_v32, %v5983_v8  ;;  %v876_v28 = vsub.s32 2, %v5254_v12 }
 0x215   :  { %v549_v27 = vpop.xlane.xlu1 %548  ;;  %v547_v30 = vpop.xlane.xlu0 %546  ;;  %v4135_v33 = vsel %vm901_vm11, 1.0, %v9178_v6  ;;  %vm917_vm11 = vcmp.eq.s32.totalorder %v6004_v32, %v5990_v15 }
 0x216   :  { %v6012_v36 = vadd.s32 %v540_v34, %v538_v54  ;;  %v551_v38 = vcvt.f32.s32 %v549_v27  ;;  %v4511_v50 = vpack.i.bf16 %v4135_v33, %v4134_v14  ;;  %v550_v48 = vcvt.f32.s32 %v547_v30 }
 0x218   :  { %v552_v55 = vshll.u32 %v551_v38, 16  ;;  %4512 = vperm.xlu1 %4510, %v4511_v50   ;;  %vm918_vm0 = vcmp.eq.s32.totalorder %v6012_v36, %v5990_v15  ;;  %vm902_vm1 = vcmp.eq.s32.totalorder %v6012_v36, %v5983_v8 }
 0x219   :  { %v561_v4 = vpop.xlane.xlu1 %560  ;;  %v559_v37 = vpop.xlane.xlu0 %558  ;;  %v4152_v10 = vsel %vm918_vm0, 1.0, %v9178_v6  ;;  %v4136_v52 = vsel %vm902_vm1, 1.0, %v9178_v6 }
 0x21a   :  { %v6014_v45 = vadd.s32 %v552_v55, %v550_v48  ;;  %v563_v46 = vcvt.f32.s32 %v561_v4  ;;  %v562_v31 = vcvt.f32.s32 %v559_v37  ;;  %v6042_v48 = vrot.slane %v5254_v12, %v876_v28 }
 0x21c   :  { %v564_v51 = vshll.u32 %v563_v46, 16  ;;  %vm919_vm13 = vcmp.eq.s32.totalorder %v6014_v45, %v5990_v15  ;;  %vm903_vm8 = vcmp.eq.s32.totalorder %v6014_v45, %v5983_v8  ;;  %9460 = vst [vmem:[#allocation23_spill] sm:$0xff] %v6042_v48  ;;  %vm931_vm14 = vcmp.eq.s32.totalorder %v5916_v53, %v6042_v48 }
 0x21d   :  { %v573_v16 = vpop.xlane.xlu1 %572  ;;  %v571_v59 = vpop.xlane.xlu0 %570  ;;  %v4153_v18 = vsel %vm919_vm13, 1.0, %v9178_v6  ;;  %v4137_v26 = vsel %vm903_vm8, 1.0, %v9178_v6  ;;  %vm930_vm2 = vcmp.eq.s32.totalorder %v5899_v39, %v6042_v48  ;;  %vm932_vm15 = vcmp.eq.s32.totalorder %v6002_v47, %v6042_v48 }
 0x21e   :  { %v6027_v11 = vadd.s32 %v564_v51, %v562_v31  ;;  %v575_v3 = vcvt.f32.s32 %v573_v16  ;;  %v4556_v19 = vpack.i.bf16 %v4153_v18, %v4152_v10  ;;  %v4516_v9 = vpack.i.bf16 %v4137_v26, %v4136_v52 }
 0x21f   :  { %v574_v23 = vcvt.f32.s32 %v571_v59  ;;  %v6055_v59 = vsel %vm931_vm14, 1.0, %v9178_v6  ;;  %v2710_v10 = vadd.s32 4294967288, %v5278_v29  ;;  %v6077_v28 = vsel %vm930_vm2, 1.0, %v9178_v6 }
 0x220   :  { %v576_v22 = vshll.u32 %v575_v3, 16  ;;  %4557 = vperm.xlu0 %4504, %v4556_v19   ;;  %4517 = vperm.xlu1 %4510, %v4516_v9   ;;  %vm904_vm9 = vcmp.eq.s32.totalorder %v6027_v11, %v5983_v8  ;;  %vm933_vm0 = vcmp.eq.s32.totalorder %v6004_v32, %v6042_v48  ;;  %vm949_vm13 = vcmp.eq.s32.totalorder %v6004_v32, %v5902_v42 }
 0x221   :  { %v585_v24 = vpop.xlane.xlu1 %584  ;;  %v583_v20 = vpop.xlane.xlu0 %582  ;;  %v4138_v14 = vsel %vm904_vm9, 1.0, %v9178_v6  ;;  %vm934_vm9 = vcmp.eq.s32.totalorder %v6012_v36, %v6042_v48  ;;  %vm964_vm14 = vcmp.eq.s32.totalorder %v6002_v47, %v5906_v43  ;;  %vm966_vm2 = vcmp.eq.s32.totalorder %v6012_v36, %v5906_v43 }
 0x222   :  { %v6030_v25 = vadd.s32 %v576_v22, %v574_v23  ;;  %v587_v49 = vcvt.f32.s32 %v585_v24  ;;  %v586_v54 = vcvt.f32.s32 %v583_v20 }
 0x224   :  { %v588_v34 = vshll.u32 %v587_v49, 16  ;;  %vm905_vm5 = vcmp.eq.s32.totalorder %v6030_v25, %v5983_v8 }
 0x225   :  { %v597_v27 = vpop.xlane.xlu1 %596  ;;  %v4139_v33 = vsel %vm905_vm5, 1.0, %v9178_v6  ;;  %vm950_vm5 = vcmp.eq.s32.totalorder %v6012_v36, %v5902_v42 }
 0x226   :  { %v595_v30 = vpop.xlane.xlu0 %594  ;;  %v6039_v38 = vadd.s32 %v588_v34, %v586_v54  ;;  %v599_v50 = vcvt.f32.s32 %v597_v27  ;;  %v4521_v55 = vpack.i.bf16 %v4139_v33, %v4138_v14  ;;  %v6093_v14 = vsel %vm916_vm3, 1.0, %v9178_v6 }
 0x227   :  { %v598_v37 = vcvt.f32.s32 %v595_v30  ;;  %v4586_v30 = vpack.i.bf16 %v6055_v59, %v6077_v28  ;;  %v6097_v33 = vsub.s32 %v5278_v29, %v5254_v12 }
 0x228   :  { %v600_v4 = vshll.u32 %v599_v50, 16  ;;  %4522 = vperm.xlu1 %4510, %v4521_v55   ;;  %vm922_vm6 = vcmp.eq.s32.totalorder %v6039_v38, %v5990_v15  ;;  %vm906_vm12 = vcmp.eq.s32.totalorder %v6039_v38, %v5983_v8  ;;  %v6100_v50 = vsub.s32 %v2710_v10, %v5254_v12 }
 0x229   :  { %v609_v46 = vpop.xlane.xlu1 %608  ;;  %v4156_v19 = vsel %vm922_vm6, 1.0, %v9178_v6  ;;  %v4140_v20 = vsel %vm906_vm12, 1.0, %v9178_v6  ;;  %9461 = vst [vmem:[#allocation24_spill] sm:$0xff] %v6097_v33  ;;  %vm935_vm6 = vcmp.eq.s32.totalorder %v6014_v45, %v6042_v48  ;;  %vm951_vm12 = vcmp.eq.s32.totalorder %v6014_v45, %v5902_v42 }
 0x22a   :  { %v607_v51 = vpop.xlane.xlu0 %606  ;;  %v6046_v31 = vadd.s32 %v600_v4, %v598_v37  ;;  %v611_v16 = vcvt.f32.s32 %v609_v46  ;;  %9462 = vst [vmem:[#allocation25_spill] sm:$0xff] %v6100_v50  ;;  %v6110_v37 = vsel %vm932_vm15, 1.0, %v9178_v6  ;;  %v6113_v46 = vsel %vm917_vm11, 1.0, %v9178_v6 }
 0x22b   :  { %v610_v18 = vcvt.f32.s32 %v607_v51  ;;  %v6116_v51 = vsel %vm933_vm0, 1.0, %v9178_v6  ;;  %vm920_vm15 = vcmp.eq.s32.totalorder %v6027_v11, %v5990_v15  ;;  %v9469_v7 = vpack.i.bf16 %v6113_v46, %v6093_v14 }
 0x22c   :  { %v612_v53 = vshll.u32 %v611_v16, 16  ;;  %vm923_vm4 = vcmp.eq.s32.totalorder %v6046_v31, %v5990_v15  ;;  %vm907_vm10 = vcmp.eq.s32.totalorder %v6046_v31, %v5983_v8  ;;  %v6124_v16 = vsel %vm948_vm7, 1.0, %v9178_v6 }
 0x22d   :  { %v4157_v52 = vsel %vm923_vm4, 1.0, %v9178_v6  ;;  %v4141_v9 = vsel %vm907_vm10, 1.0, %v9178_v6  ;;  %vm982_vm4 = vcmp.eq.s32.totalorder %v6012_v36, %v5909_v44  ;;  %vm967_vm7 = vcmp.eq.s32.totalorder %v6014_v45, %v5906_v43 }
 0x22e   :  { %v619_v3 = vpop.xlane.xlu0 %618  ;;  %v6067_v22 = vadd.s32 %v612_v53, %v610_v18  ;;  %v4566_v24 = vpack.i.bf16 %v4157_v52, %v4156_v19  ;;  %v4526_v49 = vpack.i.bf16 %v4141_v9, %v4140_v20  ;;  %v6144_v20 = vsel %vm934_vm9, 1.0, %v9178_v6 }
 0x22f   :  { %v622_v54 = vcvt.f32.s32 %v619_v3  ;;  %vm952_vm9 = vcmp.eq.s32.totalorder %v6027_v11, %v5902_v42 }
 0x230   :  { %v621_v26 = vpop.xlane.xlu1 %620  ;;  %4567 = vperm.xlu0 %4504, %v4566_v24   ;;  %4527 = vperm.xlu1 %4510, %v4526_v49   ;;  %vm908_vm1 = vcmp.eq.s32.totalorder %v6067_v22, %v5983_v8  ;;  %v6139_v24 = vsel %vm949_vm13, 1.0, %v9178_v6  ;;  %v6204_v49 = vsel %vm920_vm15, 1.0, %v9178_v6  ;;  %vm921_vm13 = vcmp.eq.s32.totalorder %v6030_v25, %v5990_v15 }
 0x231   :  { %v623_v23 = vcvt.f32.s32 %v621_v26  ;;  %v4142_v3 = vsel %vm908_vm1, 1.0, %v9178_v6  ;;  %vm936_vm1 = vcmp.eq.s32.totalorder %v6027_v11, %v6042_v48  ;;  %vm955_vm15 = vcmp.eq.s32.totalorder %v6046_v31, %v5902_v42 }
 0x232   :  { %v631_v39 = vpop.xlane.xlu0 %630 }
 0x233   :  { %v624_v34 = vshll.u32 %v623_v23, 16  ;;  %v634_v53 = vcvt.f32.s32 %v631_v39  ;;  %v6153_v39 = vsel %vm950_vm5, 1.0, %v9178_v6 }
 0x234   :  { %v633_v27 = vpop.xlane.xlu1 %632 }
 0x235   :  { %v6102_v55 = vadd.s32 %v624_v34, %v622_v54  ;;  %v635_v4 = vcvt.f32.s32 %v633_v27 }
 0x236   :  { %v643_v26 = vpop.xlane.xlu0 %642 }
 0x237   :  { %v636_v10 = vshll.u32 %v635_v4, 16  ;;  %vm909_vm8 = vcmp.eq.s32.totalorder %v6102_v55, %v5983_v8  ;;  %v646_v27 = vcvt.f32.s32 %v643_v26 }
 0x238   :  { %v645_v18 = vpop.xlane.xlu1 %644  ;;  %v4143_v19 = vsel %vm909_vm8, 1.0, %v9178_v6  ;;  %vm937_vm8 = vcmp.eq.s32.totalorder %v6030_v25, %v6042_v48 }
 0x239   :  { %v6136_v52 = vadd.s32 %v636_v10, %v634_v53  ;;  %v647_v9 = vcvt.f32.s32 %v645_v18  ;;  %v4531_v23 = vpack.i.bf16 %v4143_v19, %v4142_v3  ;;  %v6165_v18 = vsel %vm964_vm14, 1.0, %v9178_v6 }
 0x23a   :  { %v655_v10 = vpop.xlane.xlu0 %654  ;;  %v4169_v19 = vsel %vm935_vm6, 1.0, %v9178_v6  ;;  %vm983_vm14 = vcmp.eq.s32.totalorder %v6014_v45, %v5909_v44  ;;  %vm987_vm6 = vcmp.eq.s32.totalorder %v6046_v31, %v5909_v44 }
 0x23b   :  { %v648_v54 = vshll.u32 %v647_v9, 16  ;;  %4532 = vperm.xlu1 %4510, %v4531_v23   ;;  %vm926_vm10 = vcmp.eq.s32.totalorder %v6136_v52, %v5990_v15  ;;  %vm910_vm3 = vcmp.eq.s32.totalorder %v6136_v52, %v5983_v8  ;;  %v6180_v9 = vsel %vm951_vm12, 1.0, %v9178_v6 }
 0x23c   :  { %v657_v4 = vpop.xlane.xlu1 %656  ;;  %v4160_v21 = vsel %vm926_vm10, 1.0, %v9178_v6  ;;  %v4144_v2 = vsel %vm910_vm3, 1.0, %v9178_v6  ;;  %v4596_v60 = vpack.i.bf16 %v4169_v19, %v6144_v20  ;;  %v6232_v20 = vsel %vm967_vm7, 1.0, %v9178_v6 }
 0x23d   :  { %v6167_v26 = vadd.s32 %v648_v54, %v646_v27  ;;  %v659_v3 = vcvt.f32.s32 %v657_v4  ;;  %v658_v54 = vcvt.f32.s32 %v655_v10  ;;  %vm939_vm12 = vcmp.eq.s32.totalorder %v6046_v31, %v6042_v48 }
 0x23e   :  { %v667_v4 = vpop.xlane.xlu0 %666  ;;  %v6247_v19 = vsel %vm921_vm13, 1.0, %v9178_v6  ;;  %vm938_vm10 = vcmp.eq.s32.totalorder %v6039_v38, %v6042_v48  ;;  %vm986_vm3 = vcmp.eq.s32.totalorder %v6039_v38, %v5909_v44  ;;  %v6278_v28 = vsel %vm987_vm6, 1.0, %v9178_v6 }
 0x23f   :  { %v660_v23 = vshll.u32 %v659_v3, 16  ;;  %vm927_vm11 = vcmp.eq.s32.totalorder %v6167_v26, %v5990_v15  ;;  %vm911_vm0 = vcmp.eq.s32.totalorder %v6167_v26, %v5983_v8  ;;  %9464 = vst [vmem:[#allocation27_spill] sm:$0xff] %v6278_v28  ;;  %v4561_v40 = vpack.i.bf16 %v6247_v19, %v6204_v49 }
 0x240   :  { %v669_v27 = vpop.xlane.xlu1 %668  ;;  %v4161_v13 = vsel %vm927_vm11, 1.0, %v9178_v6  ;;  %v4145_v5 = vsel %vm911_vm0, 1.0, %v9178_v6  ;;  %vm953_vm7 = vcmp.eq.s32.totalorder %v6030_v25, %v5902_v42  ;;  %v4172_v49 = vsel %vm938_vm10, 1.0, %v9178_v6 }
 0x241   :  { %v6193_v53 = vadd.s32 %v660_v23, %v658_v54  ;;  %v671_v10 = vcvt.f32.s32 %v669_v27  ;;  %v4576_v3 = vpack.i.bf16 %v4161_v13, %v4160_v21  ;;  %v4536_v34 = vpack.i.bf16 %v4145_v5, %v4144_v2 }
 0x242   :  { %v670_v27 = vcvt.f32.s32 %v667_v4  ;;  %v6214_v5 = vpop.xlane.xlu0 %678  ;;  %v6220_v13 = vsel %vm936_vm1, 1.0, %v9178_v6  ;;  %v6226_v21 = vsel %vm966_vm2, 1.0, %v9178_v6  ;;  %v6250_v4 = vsel %vm937_vm8, 1.0, %v9178_v6 }
 0x243   :  { %v672_v54 = vshll.u32 %v671_v10, 16  ;;  %4577 = vperm.xlu0 %4504, %v4576_v3   ;;  %4537 = vperm.xlu1 %4510, %v4536_v34   ;;  %vm912_vm5 = vcmp.eq.s32.totalorder %v6193_v53, %v5983_v8  ;;  %v6256_v10 = vsel %vm982_vm4, 1.0, %v9178_v6  ;;  %vm954_vm4 = vcmp.eq.s32.totalorder %v6039_v38, %v5902_v42 }
 0x244   :  { %v6212_v2 = vpop.xlane.xlu1 %680  ;;  %9463 = vst [vmem:[#allocation26_spill] sm:$0xff] %v6256_v10  ;;  %v4146_v23 = vsel %vm912_vm5, 1.0, %v9178_v6  ;;  %v4173_v3 = vsel %vm939_vm12, 1.0, %v9178_v6  ;;  %vm943_vm11 = vcmp.eq.s32.totalorder %v6167_v26, %v6042_v48  ;;  %v6308_v19 = vsel %vm954_vm4, 1.0, %v9178_v6 }
 0x245   :  { %v6236_v34 = vadd.s32 %v672_v54, %v670_v27  ;;  %vm970_vm0 = vcmp.eq.s32.totalorder %v6039_v38, %v5906_v43  ;;  %vm990_vm1 = vcmp.eq.s32.totalorder %v6136_v52, %v5909_v44  ;;  %vm991_vm13 = vcmp.eq.s32.totalorder %v6167_v26, %v5909_v44 }
 0x246   :  { %v6271_v27 = vpop.xlane.xlu0 %690  ;;  %vm942_vm8 = vcmp.eq.s32.totalorder %v6136_v52, %v6042_v48  ;;  %vm971_vm5 = vcmp.eq.s32.totalorder %v6046_v31, %v5906_v43  ;;  %vm940_vm6 = vcmp.eq.s32.totalorder %v6067_v22, %v6042_v48  ;;  %v6341_v33 = vsel %vm991_vm13, 1.0, %v9178_v6 }
 0x247   :  { %4587 = vperm.xlu0 %4504, %v4586_v30   ;;  %vm913_vm2 = vcmp.eq.s32.totalorder %v6236_v34, %v5983_v8  ;;  %9468 = vst [vmem:[#allocation31_spill] sm:$0xff] %v6341_v33  ;;  %vm925_vm12 = vcmp.eq.s32.totalorder %v6102_v55, %v5990_v15  ;;  %v6352_v0 = vsel %vm953_vm7, 1.0, %v9178_v6  ;;  %v6358_v58 = vsel %vm983_vm14, 1.0, %v9178_v6 }
 0x248   :  { %v6269_v54 = vpop.xlane.xlu1 %692  ;;  %v4147_v59 = vsel %vm913_vm2, 1.0, %v9178_v6  ;;  %9470 = vst [vmem:[#allocation32_spill] sm:$0xff] %v6352_v0  ;;  %9471 = vst [vmem:[#allocation33_spill] sm:$0xff] %v6358_v58  ;;  %v4176_v46 = vsel %vm942_vm8, 1.0, %v9178_v6  ;;  %vm941_vm14 = vcmp.eq.s32.totalorder %v6102_v55, %v6042_v48  ;;  %v6388_v33 = vsel %vm970_vm0, 1.0, %v9178_v6 }
 0x249   :  { %v4541_v30 = vpack.i.bf16 %v4147_v59, %v4146_v23  ;;  %v6296_v23 = vsel %vm952_vm9, 1.0, %v9178_v6  ;;  %v6299_v59 = vsel %vm986_vm3, 1.0, %v9178_v6  ;;  %vm924_vm9 = vcmp.eq.s32.totalorder %v6067_v22, %v5990_v15 }
 0x24a   :  { %9465 = vst [vmem:[#allocation28_spill] sm:$0xff] %v6296_v23  ;;  %9466 = vst [vmem:[#allocation29_spill] sm:$0xff] %v6299_v59  ;;  %v6314_v57 = vpop.xlane.xlu0 %702  ;;  %v4158_v59 = vsel %vm924_vm9, 1.0, %v9178_v6  ;;  %v6394_v28 = vsel %vm971_vm5, 1.0, %v9178_v6  ;;  %vm956_vm2 = vcmp.eq.s32.totalorder %v6067_v22, %v5902_v42  ;;  %vm976_vm10 = vcmp.eq.s32.totalorder %v6193_v53, %v5906_v43 }
 0x24b   :  { %4597 = vperm.xlu0 %4504, %v4596_v60   ;;  %4542 = vperm.xlu1 %4510, %v4541_v30   ;;  %v4606_v60 = vpack.i.bf16 %v4173_v3, %v4172_v49  ;;  %v6330_v3 = vsel %vm955_vm15, 1.0, %v9178_v6  ;;  %v4177_v30 = vsel %vm943_vm11, 1.0, %v9178_v6  ;;  %v6338_v49 = vsel %vm990_vm1, 1.0, %v9178_v6 }
 0x24c   :  { %v6312_v50 = vpop.xlane.xlu1 %704  ;;  %9467 = vst [vmem:[#allocation30_spill] sm:$0xff] %v6338_v49  ;;  %v6382_v49 = vsel %vm940_vm6, 1.0, %v9178_v6  ;;  %vm929_vm3 = vcmp.eq.s32.totalorder %v6236_v34, %v5990_v15  ;;  %v6406_v8 = vsel %vm941_vm14, 1.0, %v9178_v6  ;;  %vm977_vm4 = vcmp.eq.s32.totalorder %v6236_v34, %v5906_v43 }
 0x24d   :  { %v6417_v12 = vsel %vm976_vm10, 1.0, %v9178_v6  ;;  %vm1002_vm15 = vcmp.eq.s32.totalorder %v6039_v38, %v5912_v1  ;;  %vm1003_vm7 = vcmp.eq.s32.totalorder %v6046_v31, %v5912_v1  ;;  %vm928_vm11 = vcmp.eq.s32.totalorder %v6193_v53, %v5990_v15 }
 0x24e   :  { %9472 = vst [vmem:[#allocation34_spill] sm:$0xff] %v6417_v12  ;;  %v4163_v58 = vsel %vm929_vm3, 1.0, %v9178_v6  ;;  %vm957_vm0 = vcmp.eq.s32.totalorder %v6102_v55, %v5902_v42  ;;  %vm965_vm1 = vcmp.eq.s32.totalorder %v6004_v32, %v5906_v43  ;;  %v6438_v23 = vsel %vm1002_vm15, 1.0, %v9178_v6 }
 0x24f   :  { %4607 = vperm.xlu0 %4504, %v4606_v60   ;;  %4552 = vperm.xlu1 %4510, %v9469_v7   ;;  %v6364_v7 = vpop.xlane.xlu0 %714  ;;  %v4616_v60 = vpack.i.bf16 %v4177_v30, %v4176_v46  ;;  %v4159_v30 = vsel %vm925_vm12, 1.0, %v9178_v6  ;;  %9474 = vst [vmem:[#allocation36_spill] sm:$0xff] %v6438_v23  ;;  %vm959_vm13 = vcmp.eq.s32.totalorder %v6167_v26, %v5902_v42 }
 0x250   :  { %v6362_v14 = vpop.xlane.xlu1 %716  ;;  %vm1006_vm8 = vcmp.eq.s32.totalorder %v6136_v52, %v5912_v1  ;;  %vm958_vm9 = vcmp.eq.s32.totalorder %v6136_v52, %v5902_v42  ;;  %vm975_vm5 = vcmp.eq.s32.totalorder %v6167_v26, %v5906_v43  ;;  %vm1007_vm6 = vcmp.eq.s32.totalorder %v6167_v26, %v5912_v1 }
 0x251   :  { %vm945_vm12 = vcmp.eq.s32.totalorder %v6236_v34, %v6042_v48  ;;  %vm974_vm14 = vcmp.eq.s32.totalorder %v6136_v52, %v5906_v43  ;;  %v9480_v23 = vpack.i.bf16 %v6180_v9, %v6153_v39  ;;  %vm944_vm10 = vcmp.eq.s32.totalorder %v6193_v53, %v6042_v48 }
 0x252   :  { %vm960_vm3 = vcmp.eq.s32.totalorder %v6193_v53, %v5902_v42  ;;  %vm969_vm15 = vcmp.eq.s32.totalorder %v6030_v25, %v5906_v43 }
 0x253   :  { %4617 = vperm.xlu0 %4504, %v4616_v60   ;;  %4562 = vperm.xlu1 %4510, %v4561_v40   ;;  %v6414_v35 = vpop.xlane.xlu0 %726  ;;  %v6420_v40 = vsel %vm977_vm4, 1.0, %v9178_v6  ;;  %v4571_v60 = vpack.i.bf16 %v4159_v30, %v4158_v59  ;;  %v6441_v59 = vsel %vm1003_vm7, 1.0, %v9178_v6  ;;  %v683_v30 = vcvt.f32.s32 %v6212_v2 }
 0x254   :  { %v6412_v46 = vpop.xlane.xlu1 %728  ;;  %9473 = vst [vmem:[#allocation35_spill] sm:$0xff] %v6420_v40  ;;  %9475 = vst [vmem:[#allocation37_spill] sm:$0xff] %v6441_v59  ;;  %v9477_v40 = vmov 0.0   ;;  %vm992_vm4 = vcmp.eq.s32.totalorder %v6193_v53, %v5909_v44  ;;  %vm993_vm7 = vcmp.eq.s32.totalorder %v6236_v34, %v5909_v44 }
 0x255   :  { %v4162_v56 = vsel %vm928_vm11, 1.0, %v9477_v40  ;;  %v6473_v2 = vsel %vm1007_vm6, 1.0, %v9477_v40  ;;  %v6488_v59 = vsel %vm975_vm5, 1.0, %v9477_v40  ;;  %v6494_v10 = vsel %vm957_vm0, 1.0, %v9477_v40 }
 0x256   :  { %v4581_v61 = vpack.i.bf16 %v4163_v58, %v4162_v56  ;;  %9479 = vst [vmem:[#allocation39_spill] sm:$0xff] %v6473_v2  ;;  %v684_v56 = vshll.u32 %v683_v30, 16  ;;  %v695_v58 = vcvt.f32.s32 %v6269_v54  ;;  %v4192_v39 = vsel %vm958_vm9, 1.0, %v9477_v40 }
 0x257   :  { %4627 = vperm.xlu0 %4504, %v9476_v63   ;;  %4572 = vperm.xlu1 %4510, %v4571_v60   ;;  %v6455_v6 = vpop.xlane.xlu0 %738  ;;  %v6470_v63 = vsel %vm1006_vm8, 1.0, %v9477_v40  ;;  %v4193_v60 = vsel %vm959_vm13, 1.0, %v9477_v40  ;;  %v6509_v9 = vsel %vm945_vm12, 1.0, %v9477_v40  ;;  %v6515_v54 = vsel %vm956_vm2, 1.0, %v9477_v40 }
 0x258   :  { %v6453_v12 = vpop.xlane.xlu1 %740  ;;  %9478 = vst [vmem:[#allocation38_spill] sm:$0xff] %v6470_v63  ;;  %v6522_v2 = vsel %vm974_vm14, 1.0, %v9477_v40  ;;  %v6527_v48 = vsel %vm944_vm10, 1.0, %v9477_v40  ;;  %vm961_vm2 = vcmp.eq.s32.totalorder %v6236_v34, %v5902_v42  ;;  %v696_v0 = vshll.u32 %v695_v58, 16 }
 0x259   :  { %v4621_v15 = vpack.i.bf16 %v6509_v9, %v6527_v48  ;;  %v6561_v48 = vsel %vm961_vm2, 1.0, %v9477_v40  ;;  %vm968_vm11 = vcmp.eq.s32.totalorder %v6027_v11, %v5906_v43  ;;  %vm980_vm0 = vcmp.eq.s32.totalorder %v6002_v47, %v5909_v44 }
 0x25a   :  { %vm1018_vm13 = vcmp.eq.s32.totalorder %v6039_v38, %v5921_v41  ;;  %vm1019_vm8 = vcmp.eq.s32.totalorder %v6046_v31, %v5921_v41  ;;  %v719_v58 = vcvt.f32.s32 %v6362_v14  ;;  %vm972_vm9 = vcmp.eq.s32.totalorder %v6067_v22, %v5906_v43 }
 0x25b   :  { %4637 = vperm.xlu0 %4504, %v9480_v23   ;;  %4582 = vperm.xlu1 %4510, %v4581_v61   ;;  %v6499_v63 = vpop.xlane.xlu0 %750  ;;  %v682_v23 = vcvt.f32.s32 %v6214_v5  ;;  %v4656_v61 = vpack.i.bf16 %v4193_v60, %v4192_v39  ;;  %v694_v60 = vcvt.f32.s32 %v6271_v27  ;;  %v9482_v39 = vpack.i.bf16 %v6330_v3, %v6308_v19 }
 0x25c   :  { %v6497_v30 = vpop.xlane.xlu1 %752  ;;  %9481 = vst [vmem:[#allocation40_spill] sm:$0xff] %v6499_v63  ;;  %v9483_v63 = vpack.i.bf16 %v6116_v51, %v6110_v37  ;;  %v6553_v27 = vsel %vm960_vm3, 1.0, %v9477_v40  ;;  %v707_v37 = vcvt.f32.s32 %v6312_v50  ;;  %v6567_v51 = vsel %vm965_vm1, 1.0, %v9477_v40 }
 0x25d   :  { %v6535_v5 = vadd.s32 %v684_v56, %v682_v23  ;;  %v6574_v19 = vsel %vm992_vm4, 1.0, %v9477_v40  ;;  %v6577_v50 = vsel %vm993_vm7, 1.0, %v9477_v40  ;;  %v9486_v3 = vpack.i.bf16 %v6250_v4, %v6220_v13 }
 0x25e   :  { %9484 = vst [vmem:[#allocation41_spill] sm:$0xff] %v6574_v19  ;;  %9485 = vst [vmem:[#allocation42_spill] sm:$0xff] %v6577_v50  ;;  %v6592_v9 = vsel %vm1018_vm13, 1.0, %v9477_v40  ;;  %v6595_v23 = vsel %vm1019_vm8, 1.0, %v9477_v40  ;;  %v6597_v38 = vadd.s32 %v696_v0, %v694_v60  ;;  %v6614_v0 = vsel %vm968_vm11, 1.0, %v9477_v40  ;;  %v9503_v19 = vld [vmem:[#allocation32_spill] sm:$0xff] }
 0x25f   :  { %4647 = vperm.xlu0 %4504, %v9482_v39   ;;  %4592 = vperm.xlu1 %4510, %v9483_v63   ;;  %v6550_v56 = vpop.xlane.xlu0 %762  ;;  %v6587_v63 = vsel %vm969_vm15, 1.0, %v9477_v40  ;;  %9487 = vst [vmem:[#allocation43_spill] sm:$0xff] %v6592_v9  ;;  %9488 = vst [vmem:[#allocation44_spill] sm:$0xff] %v6595_v23  ;;  %vm973_vm1 = vcmp.eq.s32.totalorder %v6102_v55, %v5906_v43  ;;  %v731_v60 = vcvt.f32.s32 %v6412_v46  ;;  %v706_v14 = vcvt.f32.s32 %v6314_v57  ;;  %v9504_v50 = vld [vmem:[#allocation28_spill] sm:$0xff] }
 0x260   :  { %v6548_v42 = vpop.xlane.xlu1 %764  ;;  %vm999_vm5 = vcmp.eq.s32.totalorder %v6014_v45, %v5912_v1  ;;  %v9490_v39 = vpack.i.bf16 %v6406_v8, %v6382_v49  ;;  %vm981_vm6 = vcmp.eq.s32.totalorder %v6004_v32, %v5909_v44  ;;  %vm1022_vm12 = vcmp.eq.s32.totalorder %v6136_v52, %v5921_v41 }
 0x261   :  { %vm1023_vm14 = vcmp.eq.s32.totalorder %v6167_v26, %v5921_v41  ;;  %vm998_vm10 = vcmp.eq.s32.totalorder %v6012_v36, %v5912_v1  ;;  %v720_v49 = vshll.u32 %v719_v58, 16  ;;  %v6659_v26 = vsel %vm972_vm9, 1.0, %v9477_v40 }
 0x262   :  { %v6651_v8 = vsel %vm1023_vm14, 1.0, %v9477_v40  ;;  %v732_v4 = vshll.u32 %v731_v60, 16  ;;  %v6668_v13 = vsel %vm999_vm5, 1.0, %v9477_v40  ;;  %v6674_v58 = vsel %vm981_vm6, 1.0, %v9477_v40 }
 0x263   :  { %4657 = vperm.xlu0 %4504, %v4656_v61   ;;  %4602 = vperm.xlu1 %4510, %v9486_v3   ;;  %v6601_v61 = vpop.xlane.xlu0 %774  ;;  %v708_v3 = vshll.u32 %v707_v37, 16  ;;  %v9489_v37 = vpack.i.bf16 %v5957_v17, %v5940_v62  ;;  %v6643_v62 = vsel %vm973_vm1, 1.0, %v9477_v40  ;;  %v6648_v17 = vsel %vm1022_vm12, 1.0, %v9477_v40  ;;  %9492 = vst [vmem:[#allocation46_spill] sm:$0xff] %v6651_v8 }
 0x264   :  { %v6599_v31 = vpop.xlane.xlu1 %776  ;;  %9491 = vst [vmem:[#allocation45_spill] sm:$0xff] %v6648_v17  ;;  %v6683_v60 = vsel %vm998_vm10, 1.0, %v9477_v40  ;;  %vm984_vm3 = vcmp.eq.s32.totalorder %v6027_v11, %v5909_v44  ;;  %vm996_vm2 = vcmp.eq.s32.totalorder %v6002_v47, %v5912_v1  ;;  %vm985_vm4 = vcmp.eq.s32.totalorder %v6030_v25, %v5909_v44 }
 0x265   :  { %v6653_v52 = vadd.s32 %v708_v3, %v706_v14  ;;  %v743_v3 = vcvt.f32.s32 %v6453_v12  ;;  %v9494_v14 = vpack.i.bf16 %v6232_v20, %v6226_v21  ;;  %vm989_vm15 = vcmp.eq.s32.totalorder %v6102_v55, %v5909_v44  ;;  %v9501_v20 = vld [vmem:[#allocation40_spill] sm:$0xff] }
 0x266   :  { %v742_v17 = vcvt.f32.s32 %v6455_v6  ;;  %v6715_v8 = vsel %vm984_vm3, 1.0, %v9477_v40  ;;  %vm988_vm7 = vcmp.eq.s32.totalorder %v6067_v22, %v5909_v44  ;;  %v6729_v6 = vsel %vm989_vm15, 1.0, %v9477_v40 }
 0x267   :  { %4667 = vperm.xlu0 %4504, %v9489_v37   ;;  %4612 = vperm.xlu1 %4510, %v9490_v39   ;;  %v6640_v57 = vpop.xlane.xlu0 %786  ;;  %9493 = vst [vmem:[#allocation47_spill] sm:$0xff] %v6653_v52  ;;  %v718_v37 = vcvt.f32.s32 %v6364_v7  ;;  %v730_v39 = vcvt.f32.s32 %v6414_v35  ;;  %v755_v35 = vcvt.f32.s32 %v6497_v30  ;;  %v9497_v30 = vpack.i.bf16 %v6394_v28, %v6388_v33 }
 0x268   :  { %v6638_v46 = vpop.xlane.xlu1 %788  ;;  %vm1008_vm11 = vcmp.eq.s32.totalorder %v6193_v53, %v5912_v1  ;;  %v2717_v33 = vadd.s32 4294967280, %v5278_v29  ;;  %vm1014_vm13 = vcmp.eq.s32.totalorder %v6012_v36, %v5921_v41  ;;  %vm1015_vm8 = vcmp.eq.s32.totalorder %v6014_v45, %v5921_v41 }
 0x269   :  { %v6704_v21 = vadd.s32 %v720_v49, %v718_v37  ;;  %v6711_v7 = vadd.s32 %v732_v4, %v730_v39  ;;  %v744_v49 = vshll.u32 %v743_v3, 16  ;;  %v9498_v37 = vpack.i.bf16 %v6139_v24, %v6124_v16 }
 0x26a   :  { %v6726_v4 = vsel %vm985_vm4, 1.0, %v9477_v40  ;;  %v767_v39 = vcvt.f32.s32 %v6548_v42  ;;  %v2724_v16 = vadd.s32 4294967272, %v5278_v29  ;;  %v756_v24 = vshll.u32 %v755_v35, 16 }
 0x26b   :  { %4677 = vperm.xlu0 %4504, %v9494_v14   ;;  %4622 = vperm.xlu1 %4510, %v4621_v15   ;;  %v6692_v43 = vpop.xlane.xlu0 %798  ;;  %v6698_v15 = vsel %vm980_vm0, 1.0, %v9477_v40  ;;  %9496 = vst [vmem:[#allocation49_spill] sm:$0xff] %v6704_v21  ;;  %vm1009_vm0 = vcmp.eq.s32.totalorder %v6236_v34, %v5912_v1  ;;  %v6745_v28 = vsel %vm1008_vm11, 1.0, %v9477_v40  ;;  %vm997_vm1 = vcmp.eq.s32.totalorder %v6004_v32, %v5912_v1 }
 0x26c   :  { %v6690_v12 = vpop.xlane.xlu1 %800  ;;  %9495 = vst [vmem:[#allocation48_spill] sm:$0xff] %v6698_v15  ;;  %9499 = vst [vmem:[#allocation50_spill] sm:$0xff] %v6745_v28  ;;  %v6748_v42 = vsel %vm1009_vm0, 1.0, %v9477_v40  ;;  %v754_v9 = vcvt.f32.s32 %v9501_v20  ;;  %v779_v23 = vcvt.f32.s32 %v6599_v31  ;;  %v9502_v44 = vpack.i.bf16 %v6488_v59, %v6522_v2 }
 0x26d   :  { %9500 = vst [vmem:[#allocation51_spill] sm:$0xff] %v6748_v42  ;;  %v9505_v21 = vpack.i.bf16 %v9503_v19, %v9504_v50  ;;  %v768_v15 = vshll.u32 %v767_v39, 16  ;;  %v6783_v59 = vsel %vm1014_vm13, 1.0, %v9477_v40  ;;  %v6796_v50 = vsel %vm1015_vm8, 1.0, %v9477_v40 }
 0x26e   :  { %v6802_v36 = vsel %vm997_vm1, 1.0, %v9477_v40  ;;  %v791_v31 = vcvt.f32.s32 %v6638_v46  ;;  %v6810_v20 = vsel %vm996_vm2, 1.0, %v9477_v40  ;;  %v2731_v45 = vadd.s32 4294967264, %v5278_v29 }
 0x26f   :  { %4687 = vperm.xlu0 %4504, %v9497_v30   ;;  %4632 = vperm.xlu1 %4510, %v9498_v37   ;;  %v6736_v14 = vpop.xlane.xlu0 %810  ;;  %v6754_v30 = vsel %vm988_vm7, 1.0, %v9477_v40  ;;  %v6762_v37 = vadd.s32 %v744_v49, %v742_v17  ;;  %v9506_v49 = vld [vmem:[#allocation8_spill] sm:$0xff]  ;;  %v780_v39 = vshll.u32 %v779_v23, 16  ;;  %v9512_v17 = vpack.i.bf16 %v6494_v10, %v6515_v54  ;;  %v9513_v54 = vld [vmem:[#allocation21_spill] sm:$0xff] }
 0x270   :  { %v6734_v3 = vpop.xlane.xlu1 %812  ;;  %v6777_v35 = vsub.s32 %v2717_v33, %v9506_v49  ;;  %v6790_v19 = vsub.s32 %v2724_v16, %v9506_v49  ;;  %v9509_v33 = vld [vmem:[#allocation17_spill] sm:$0xff]  ;;  %v9510_v16 = vld [vmem:[#allocation15_spill] sm:$0xff]  ;;  %vm1001_vm9 = vcmp.eq.s32.totalorder %v6030_v25, %v5912_v1  ;;  %vm1005_vm5 = vcmp.eq.s32.totalorder %v6102_v55, %v5912_v1 }
 0x271   :  { %v778_v23 = vcvt.f32.s32 %v6601_v61  ;;  %v803_v10 = vcvt.f32.s32 %v6690_v12  ;;  %vm1000_vm6 = vcmp.eq.s32.totalorder %v6027_v11, %v5912_v1  ;;  %vm1004_vm12 = vcmp.eq.s32.totalorder %v6067_v22, %v5912_v1 }
 0x272   :  { %9507 = vst [vmem:[#allocation40_spill] sm:$0xff] %v6777_v35  ;;  %9508 = vst [vmem:[#allocation32_spill] sm:$0xff] %v6790_v19  ;;  %vm1027_vm14 = vcmp.eq.s32.totalorder %v6597_v38, %v9513_v54  ;;  %v6839_v61 = vsub.s32 %v2731_v45, %v9506_v49  ;;  %vm1012_vm10 = vcmp.eq.s32.totalorder %v6002_v47, %v5921_v41  ;;  %v815_v42 = vcvt.f32.s32 %v6734_v3  ;;  %v9520_v19 = vld [vmem:[#allocation27_spill] sm:$0xff] }
 0x273   :  { %4697 = vperm.xlu0 %4504, %v9502_v44   ;;  %4642 = vperm.xlu1 %4510, %v9505_v21   ;;  %v6785_v44 = vadd.s32 %v756_v24, %v754_v9  ;;  %v6787_v2 = vpop.xlane.xlu0 %822  ;;  %v766_v9 = vcvt.f32.s32 %v6550_v56  ;;  %v9511_v24 = vpack.i.bf16 %v9509_v33, %v9510_v16  ;;  %v2738_v56 = vadd.s32 4294967256, %v5278_v29  ;;  %v9515_v16 = vld [vmem:[#allocation33_spill] sm:$0xff]  ;;  %v9516_v33 = vld [vmem:[#allocation26_spill] sm:$0xff] }
 0x274   :  { %v825_v21 = vpop.xlane.xlu1 %824  ;;  %9514 = vst [vmem:[#allocation28_spill] sm:$0xff] %v6839_v61  ;;  %v6849_v12 = vadd.s32 %v780_v39, %v778_v23  ;;  %v9517_v52 = vpack.i.bf16 %v9515_v16, %v9516_v33  ;;  %vm1026_vm3 = vcmp.eq.s32.totalorder %v6535_v5, %v9513_v54  ;;  %v2745_v61 = vadd.s32 4294967248, %v5278_v29 }
 0x275   :  { %v6824_v46 = vadd.s32 %v768_v15, %v766_v9  ;;  %v792_v15 = vshll.u32 %v791_v31, 16  ;;  %v6845_v9 = vsel %vm1005_vm5, 1.0, %v9477_v40  ;;  %v9518_v31 = vpack.i.bf16 %v6561_v48, %v6553_v27 }
 0x276   :  { %v6860_v45 = vsub.s32 %v2738_v56, %v9506_v49  ;;  %v790_v39 = vcvt.f32.s32 %v6640_v57  ;;  %v6876_v27 = vsel %vm1004_vm12, 1.0, %v9477_v40  ;;  %v6882_v48 = vsel %vm1027_vm14, 1.0, %v9477_v40 }
 0x277   :  { %4707 = vperm.xlu0 %4504, %v9511_v24   ;;  %4652 = vperm.xlu1 %4510, %v9512_v17   ;;  %v6842_v17 = vsel %vm1001_vm9, 1.0, %v9477_v40  ;;  %v6851_v24 = vpop.xlane.xlu0 %834  ;;  %v804_v57 = vshll.u32 %v803_v10, 16  ;;  %v2752_v16 = vadd.s32 4294967240, %v5278_v29  ;;  %v827_v1 = vcvt.f32.s32 %v825_v21  ;;  %v9521_v10 = vld [vmem:[#allocation29_spill] sm:$0xff] }
 0x278   :  { %9519 = vst [vmem:[#allocation8_spill] sm:$0xff] %v6860_v45  ;;  %v837_v23 = vpop.xlane.xlu1 %836  ;;  %v802_v45 = vcvt.f32.s32 %v6692_v43  ;;  %v6893_v28 = vsel %vm1026_vm3, 1.0, %v9477_v40  ;;  %v9522_v35 = vpack.i.bf16 %v9520_v19, %v9521_v10  ;;  %v9523_v56 = vpack.i.bf16 %v6567_v51, %v6165_v18 }
 0x279   :  { %vm1024_vm2 = vcmp.eq.s32.totalorder %v6193_v53, %v5921_v41  ;;  %v839_v43 = vcvt.f32.s32 %v837_v23  ;;  %vm1030_vm4 = vcmp.eq.s32.totalorder %v6711_v7, %v9513_v54  ;;  %vm1031_vm15 = vcmp.eq.s32.totalorder %v6762_v37, %v9513_v54 }
 0x27a   :  { %vm1025_vm7 = vcmp.eq.s32.totalorder %v6236_v34, %v5921_v41  ;;  %v6915_v18 = vadd.s32 %v804_v57, %v802_v45  ;;  %v814_v51 = vcvt.f32.s32 %v6736_v14  ;;  %vm1013_vm11 = vcmp.eq.s32.totalorder %v6004_v32, %v5921_v41  ;;  %v9528_v45 = vld [vmem:[#allocation30_spill] sm:$0xff] }
 0x27b   :  { %4717 = vperm.xlu0 %4504, %v9517_v52   ;;  %4662 = vperm.xlu1 %4510, %v9518_v31   ;;  %v6870_v52 = vsel %vm1000_vm6, 1.0, %v9477_v40  ;;  %v6889_v31 = vadd.s32 %v792_v15, %v790_v39  ;;  %v6905_v39 = vsub.s32 %v2745_v61, %v9506_v49  ;;  %v6918_v3 = vpop.xlane.xlu0 %846  ;;  %v828_v53 = vshll.u32 %v827_v1, 16  ;;  %v9527_v61 = vld [vmem:[#allocation31_spill] sm:$0xff]  ;;  %v9534_v15 = vld [vmem:[#allocation16_spill] sm:$0xff] }
 0x27c   :  { %v849_v19 = vpop.xlane.xlu1 %848  ;;  %v6928_v21 = vsel %vm1024_vm2, 1.0, %v9477_v40  ;;  %v6931_v34 = vsel %vm1025_vm7, 1.0, %v9477_v40  ;;  %v816_v14 = vshll.u32 %v815_v42, 16  ;;  %v9529_v23 = vpack.i.bf16 %v9527_v61, %v9528_v45  ;;  %v9533_v42 = vld [vmem:[#allocation18_spill] sm:$0xff] }
 0x27d   :  { %vm1035_vm0 = vcmp.eq.s32.totalorder %v6889_v31, %v9513_v54  ;;  %9525 = vst [vmem:[#allocation15_spill] sm:$0xff] %v6928_v21  ;;  %9526 = vst [vmem:[#allocation21_spill] sm:$0xff] %v6931_v34  ;;  %v9530_v57 = vpack.i.bf16 %v6587_v63, %v6614_v0  ;;  %v6943_v1 = vsel %vm1030_vm4, 1.0, %v9477_v40  ;;  %v6949_v32 = vsel %vm1031_vm15, 1.0, %v9477_v40 }
 0x27e   :  { %v6955_v63 = vsel %vm1013_vm11, 1.0, %v9477_v40  ;;  %vm1034_vm13 = vcmp.eq.s32.totalorder %v6849_v12, %v9513_v54  ;;  %v6963_v0 = vsel %vm1012_vm10, 1.0, %v9477_v40  ;;  %v6966_v10 = vsel %vm1035_vm0, 1.0, %v9477_v40 }
 0x27f   :  { %4727 = vperm.xlu0 %4504, %v9522_v35   ;;  %4672 = vperm.xlu1 %4510, %v9523_v56   ;;  %v6921_v35 = vsub.s32 %v2752_v16, %v9506_v49  ;;  %v826_v56 = vcvt.f32.s32 %v6787_v2  ;;  %v840_v16 = vshll.u32 %v839_v43, 16  ;;  %v2759_v61 = vadd.s32 4294967232, %v5278_v29 }
 0x280   :  { %v2766_v2 = vadd.s32 4294967224, %v5278_v29  ;;  %v838_v45 = vcvt.f32.s32 %v6851_v24  ;;  %vm1017_vm8 = vcmp.eq.s32.totalorder %v6030_v25, %v5921_v41  ;;  %v6977_v47 = vadd.s32 %v816_v14, %v814_v51  ;;  %v861_v14 = vpop.xlane.xlu1 %860  ;;  %v9542_v25 = vld [vmem:[#allocation35_spill] sm:$0xff]  ;;  %v9550_v24 = vld [vmem:[#allocation37_spill] sm:$0xff] }
 0x281   :  { %9524 = vst [vmem:[#allocation17_spill] sm:$0xff] %v6921_v35  ;;  %v6970_v43 = vadd.s32 %v828_v53, %v826_v56  ;;  %v9535_v33 = vpack.i.bf16 %v9533_v42, %v9534_v15  ;;  %v9536_v21 = vpack.i.bf16 %v6643_v62, %v6659_v26  ;;  %v6988_v53 = vsel %vm1034_vm13, 1.0, %v9477_v40  ;;  %v9538_v62 = vld [vmem:[#allocation22_spill] sm:$0xff]  ;;  %v9575_v35 = vld [vmem:[#allocation19_spill] sm:$0xff] }
 0x282   :  { %9532 = vst [vmem:[#allocation26_spill] sm:$0xff] %v6977_v47  ;;  %vm1016_vm1 = vcmp.eq.s32.totalorder %v6027_v11, %v5921_v41  ;;  %v6992_v51 = vadd.s32 %v840_v16, %v838_v45  ;;  %vm1021_vm9 = vcmp.eq.s32.totalorder %v6102_v55, %v5921_v41  ;;  %vm1043_vm5 = vcmp.eq.s32.totalorder %v6597_v38, %v9538_v62  ;;  %v9543_v56 = vld [vmem:[#allocation34_spill] sm:$0xff] }
 0x283   :  { %4737 = vperm.xlu0 %4504, %v9529_v23   ;;  %4682 = vperm.xlu1 %4510, %v9530_v57   ;;  %9531 = vst [vmem:[#allocation33_spill] sm:$0xff] %v6970_v43  ;;  %v859_v57 = vpop.xlane.xlu0 %858  ;;  %v851_v26 = vcvt.f32.s32 %v849_v19  ;;  %v7010_v11 = vsel %vm1017_vm8, 1.0, %v9477_v40  ;;  %v7013_v42 = vsel %vm1016_vm1, 1.0, %v9477_v40  ;;  %vm1038_vm6 = vcmp.eq.s32.totalorder %v6970_v43, %v9513_v54  ;;  %v9551_v23 = vld [vmem:[#allocation36_spill] sm:$0xff] }
 0x284   :  { %9537 = vst [vmem:[#allocation27_spill] sm:$0xff] %v6992_v51  ;;  %vm1020_vm12 = vcmp.eq.s32.totalorder %v6067_v22, %v5921_v41  ;;  %vm1042_vm14 = vcmp.eq.s32.totalorder %v6535_v5, %v9538_v62  ;;  %v863_v55 = vcvt.f32.s32 %v861_v14  ;;  %v9541_v19 = vpack.i.bf16 %v6668_v13, %v6683_v60 }
 0x285   :  { %v9544_v16 = vpack.i.bf16 %v9542_v25, %v9543_v56  ;;  %v2773_v22 = vadd.s32 4294967216, %v5278_v29  ;;  %vm1039_vm10 = vcmp.eq.s32.totalorder %v6992_v51, %v9513_v54  ;;  %v2780_v13 = vadd.s32 4294967208, %v5278_v29 }
 0x286   :  { %vm1047_vm3 = vcmp.eq.s32.totalorder %v6762_v37, %v9538_v62  ;;  %v852_v60 = vshll.u32 %v851_v26, 16  ;;  %v7047_v25 = vsel %vm1020_vm12, 1.0, %v9477_v40  ;;  %v7050_v56 = vsel %vm1042_vm14, 1.0, %v9477_v40 }
 0x287   :  { %4747 = vperm.xlu0 %4504, %v9535_v33   ;;  %4692 = vperm.xlu1 %4510, %v9536_v21   ;;  %v7001_v33 = vsub.s32 %v2759_v61, %v9506_v49  ;;  %v7004_v21 = vsub.s32 %v2766_v2, %v9506_v49  ;;  %v7028_v61 = vsel %vm1021_vm9, 1.0, %v9477_v40  ;;  %v7031_v2 = vsel %vm1043_vm5, 1.0, %v9477_v40  ;;  %v7041_v14 = vpop.xlane.xlu0 %115  ;;  %9548 = vst [vmem:[#allocation22_spill] sm:$0xff] %v7047_v25  ;;  %v9581_v25 = vld [vmem:[#allocation42_spill] sm:$0xff] }
 0x288   :  { %9545 = vst [vmem:[#allocation30_spill] sm:$0xff] %v7028_v61  ;;  %9546 = vst [vmem:[#allocation18_spill] sm:$0xff] %v7031_v2  ;;  %vm1046_vm2 = vcmp.eq.s32.totalorder %v6711_v7, %v9538_v62  ;;  %v864_v26 = vshll.u32 %v863_v55, 16  ;;  %v7069_v45 = vsub.s32 %v2773_v22, %v9506_v49  ;;  %v7072_v15 = vsel %vm1047_vm3, 1.0, %v9477_v40  ;;  %v9558_v55 = vld [vmem:[#allocation47_spill] sm:$0xff] }
 0x289   :  { %9539 = vst [vmem:[#allocation29_spill] sm:$0xff] %v7001_v33  ;;  %9540 = vst [vmem:[#allocation31_spill] sm:$0xff] %v7004_v21  ;;  %v9553_v21 = vld [vmem:[#allocation48_spill] sm:$0xff]  ;;  %v7075_v34 = vsub.s32 %v2780_v13, %v9506_v49  ;;  %vm1028_vm4 = vcmp.eq.s32.totalorder %v9558_v55, %v9513_v54  ;;  %vm1051_vm7 = vcmp.eq.s32.totalorder %v6889_v31, %v9538_v62  ;;  %vm9275_vm0 = vcmask 130112  }
 0x28a   :  { %9547 = vst [vmem:[#allocation16_spill] sm:$0xff] %v7041_v14  ;;  %9549 = vst [vmem:[#allocation35_spill] sm:$0xff] %v7050_v56  ;;  %v9552_v14 = vpack.i.bf16 %v9550_v24, %v9551_v23  ;;  %v9554_v33 = vpack.i.bf16 %v6674_v58, %v9553_v21  ;;  %v9559_v23 = vld [vmem:[#allocation49_spill] sm:$0xff]  ;;  %v862_v24 = vcvt.f32.s32 %v859_v57  ;;  %v7086_v21 = vsel %vm1046_vm2, 1.0, %v9477_v40  ;;  %v9563_v57 = vld [vmem:[#allocation39_spill] sm:$0xff] }
 0x28b   :  { %4757 = vperm.xlu0 %4504, %v9541_v19   ;;  %4702 = vperm.xlu1 %4510, %v9544_v16   ;;  %v7044_v19 = vsel %vm1038_vm6, 1.0, %v9477_v40  ;;  %v850_v16 = vcvt.f32.s32 %v6918_v3  ;;  %v7066_v3 = vsel %vm1039_vm10, 1.0, %v9477_v40  ;;  %9555 = vst [vmem:[#allocation34_spill] sm:$0xff] %v7069_v45  ;;  %9556 = vst [vmem:[#allocation37_spill] sm:$0xff] %v7072_v15  ;;  %vm1029_vm15 = vcmp.eq.s32.totalorder %v9559_v23, %v9513_v54 }
 0x28c   :  { %9557 = vst [vmem:[#allocation36_spill] sm:$0xff] %v7075_v34  ;;  %9561 = vst [vmem:[#allocation47_spill] sm:$0xff] %v7086_v21  ;;  %vm1050_vm11 = vcmp.eq.s32.totalorder %v6849_v12, %v9538_v62  ;;  %v9564_v34 = vld [vmem:[#allocation38_spill] sm:$0xff]  ;;  %v9566_v41 = vpack.i.bf16 %v6726_v4, %v6715_v8  ;;  %v7108_v22 = vsel %vm1028_vm4, 1.0, %v9477_v40  ;;  %vm1032_vm13 = vcmp.eq.s32.totalorder %v6785_v44, %v9513_v54 }
 0x28d   :  { %v7083_v58 = vadd.s32 %v852_v60, %v850_v16  ;;  %v2794_v60 = vadd.s32 4294967192, %v5278_v29  ;;  %v7096_v16 = vadd.s32 %v864_v26, %v862_v24  ;;  %v9565_v45 = vpack.i.bf16 %v9563_v57, %v9564_v34  ;;  %9567 = vst [vmem:[#allocation39_spill] sm:$0xff] %v7108_v22 }
 0x28e   :  { %v7114_v26 = vsel %vm1029_vm15, 1.0, %v9477_v40  ;;  %v7120_v34 = vsel %vm1051_vm7, 1.0, %v9477_v40  ;;  %vm1033_vm8 = vcmp.eq.s32.totalorder %v6824_v46, %v9513_v54  ;;  %vm1055_vm1 = vcmp.eq.s32.totalorder %v6992_v51, %v9538_v62 }
 0x28f   :  { %4767 = vperm.xlu0 %4504, %v9552_v14   ;;  %4712 = vperm.xlu1 %4510, %v9554_v33   ;;  %9560 = vst [vmem:[#allocation48_spill] sm:$0xff] %v7083_v58  ;;  %v4507_v33 = vpop.permute.xlu0 %4506  ;;  %v2787_v14 = vadd.s32 4294967200, %v5278_v29  ;;  %9562 = vst [vmem:[#allocation49_spill] sm:$0xff] %v7096_v16  ;;  %vm1037_vm9 = vcmp.eq.s32.totalorder %v6977_v47, %v9513_v54  ;;  %v7143_v21 = vsub.s32 %v2794_v60, %v9506_v49  ;;  %vm2722_vm15 = vcmask 195712  }
 0x290   :  { %9568 = vst [vmem:[#allocation38_spill] sm:$0xff] %v7114_v26  ;;  %9569 = vst [vmem:[#allocation52_spill] sm:$0xff] %v7120_v34  ;;  %v4509_v8 = vunpack.i.h.bf16 %v4507_v33  ;;  %v4508_v4 = vunpack.i.l.bf16 %v4507_v33  ;;  %v9574_v33 = vld [vmem:[#allocation20_spill] sm:$0xff]  ;;  %v9577_v2 = vpack.i.bf16 %v6729_v6, %v6754_v30  ;;  %v7152_v24 = vsel %vm1032_vm13, 1.0, %v9477_v40 }
 0x291   :  { %v7140_v13 = vsub.s32 %v2787_v14, %v9506_v49  ;;  %9573 = vst [vmem:[#allocation54_spill] sm:$0xff] %v7143_v21  ;;  %v9576_v56 = vpack.i.bf16 %v9574_v33, %v9575_v35  ;;  %v7155_v57 = vsel %vm1033_vm8, 1.0, %v9477_v40  ;;  %vm1054_vm6 = vcmp.eq.s32.totalorder %v6970_v43, %v9538_v62  ;;  %v9579_v14 = vld [vmem:[#allocation24_spill] sm:$0xff] }
 0x292   :  { %vm1036_vm12 = vcmp.eq.s32.totalorder %v6915_v18, %v9513_v54  ;;  %v7165_v35 = vsel %vm1055_vm1, 1.0, %v9477_v40  ;;  %v7168_v6 = vsel %vm1037_vm9, 1.0, %v9477_v40  ;;  %v2709_v60 = vrot.slane %v4508_v4, %v9579_v14 }
 0x293   :  { %4777 = vperm.xlu0 %4504, %v9565_v45   ;;  %4722 = vperm.xlu1 %4510, %v9566_v41   ;;  %v7123_v41 = vsel %vm1050_vm11, 1.0, %v9477_v40  ;;  %v9571_v45 = vld [vmem:[#allocation23_spill] sm:$0xff]  ;;  %v4548_v15 = vpop.permute.xlu0 %4547  ;;  %v2801_v33 = vadd.s32 4294967184, %v5278_v29  ;;  %v2808_v21 = vadd.s32 4294967176, %v5278_v29  ;;  %v7182_v22 = vsel %vm1054_vm6, 1.0, %v9477_v40 }
 0x294   :  { %9570 = vst [vmem:[#allocation53_spill] sm:$0xff] %v7123_v41  ;;  %vm1059_vm5 = vcmp.eq.s32.totalorder %v6597_v38, %v9571_v45  ;;  %9572 = vst [vmem:[#allocation23_spill] sm:$0xff] %v7140_v13  ;;  %vm1058_vm14 = vcmp.eq.s32.totalorder %v6535_v5, %v9571_v45  ;;  %v4550_v13 = vunpack.i.h.bf16 %v4548_v15  ;;  %v4549_v41 = vunpack.i.l.bf16 %v4548_v15 }
 0x295   :  { %v7173_v30 = vsel %vm1059_vm5, 1.0, %v9477_v40  ;;  %v9580_v26 = vpack.i.bf16 %v6796_v50, %v6783_v59  ;;  %v7191_v4 = vsel %vm1036_vm12, 1.0, %v9477_v40  ;;  %v7194_v29 = vsel %vm1058_vm14, 1.0, %v9477_v40 }
 0x296   :  { %vm1063_vm10 = vcmp.eq.s32.totalorder %v6762_v37, %v9571_v45  ;;  %vm1041_vm3 = vcmp.eq.s32.totalorder %v7096_v16, %v9513_v54  ;;  %vm1062_vm2 = vcmp.eq.s32.totalorder %v6711_v7, %v9571_v45  ;;  %vm1040_vm4 = vcmp.eq.s32.totalorder %v7083_v58, %v9513_v54 }
 0x297   :  { %4787 = vperm.xlu0 %4504, %v9576_v56   ;;  %4732 = vperm.xlu1 %4510, %v9577_v2   ;;  %v9578_v2 = vld [vmem:[#allocation25_spill] sm:$0xff]  ;;  %v2818_v50 = vrot.slane %v4549_v41, %v9579_v14  ;;  %v4513_v15 = vpop.permute.xlu1 %4512  ;;  %v7220_v59 = vsel %vm1063_vm10, 1.0, %v9477_v40  ;;  %v7232_v54 = vsel %vm1062_vm2, 1.0, %v9477_v40  ;;  %vm1066_vm7 = vcmp.eq.s32.totalorder %v6849_v12, %v9571_v45 }
 0x298   :  { %v2714_v56 = vrot.slane %v4509_v8, %v9578_v2  ;;  %v9582_v8 = vld [vmem:[#allocation41_spill] sm:$0xff]  ;;  %vm1067_vm11 = vcmp.eq.s32.totalorder %v6889_v31, %v9571_v45  ;;  %vm1044_vm13 = vcmp.eq.s32.totalorder %v9558_v55, %v9538_v62  ;;  %vm1045_vm8 = vcmp.eq.s32.totalorder %v9559_v23, %v9538_v62 }
 0x299   :  { %v9583_v61 = vpack.i.bf16 %v9581_v25, %v9582_v8  ;;  %v7210_v25 = vsub.s32 %v2801_v33, %v9506_v49  ;;  %v2822_v8 = vrot.slane %v4550_v13, %v9578_v2  ;;  %v9587_v33 = vld [vmem:[#allocation43_spill] sm:$0xff]  ;;  %vm1070_vm1 = vcmp.eq.s32.totalorder %v6970_v43, %v9571_v45 }
 0x29a   :  { %vm1071_vm9 = vcmp.eq.s32.totalorder %v6992_v51, %v9571_v45  ;;  %vm2729_vm5 = vcmask 261312   ;;  %vm1049_vm6 = vcmp.eq.s32.totalorder %v6824_v46, %v9538_v62  ;;  %v7259_v41 = vsel %vm1066_vm7, 1.0, %v9477_v40 }
 0x29b   :  { %4797 = vperm.xlu0 %4504, %v9580_v26   ;;  %4742 = vperm.xlu1 %4510, %v9583_v61   ;;  %v2716_v61 = vsel %vm9275_vm0, %v2714_v56, %v2709_v60  ;;  %9584 = vst [vmem:[#allocation20_spill] sm:$0xff] %v7210_v25  ;;  %v7213_v26 = vsub.s32 %v2808_v21, %v9506_v49  ;;  %v7223_v56 = vsel %vm1041_vm3, 1.0, %v9477_v40  ;;  %v9586_v60 = vld [vmem:[#allocation44_spill] sm:$0xff]  ;;  %v7241_v21 = vsel %vm1040_vm4, 1.0, %v9477_v40 }
 0x29c   :  { %v9588_v34 = vpack.i.bf16 %v9586_v60, %v9587_v33  ;;  %v9589_v49 = vpack.i.bf16 %v6802_v36, %v6810_v20  ;;  %v4514_v36 = vunpack.i.l.bf16 %v4513_v15  ;;  %v7262_v60 = vsel %vm1067_vm11, 1.0, %v9477_v40  ;;  %v9592_v20 = vld [vmem:[#allocation45_spill] sm:$0xff] }
 0x29d   :  { %9585 = vst [vmem:[#allocation19_spill] sm:$0xff] %v7213_v26  ;;  %v7265_v33 = vsel %vm1044_vm13, 1.0, %v9477_v40  ;;  %v9594_v13 = vpack.i.bf16 %v6842_v17, %v6870_v52  ;;  %v7280_v26 = vsel %vm1071_vm9, 1.0, %v9477_v40  ;;  %vm1048_vm12 = vcmp.eq.s32.totalorder %v6785_v44, %v9538_v62  ;;  %v9599_v17 = vld [vmem:[#allocation40_spill] sm:$0xff] }
 0x29e   :  { %9596 = vst [vmem:[#allocation44_spill] sm:$0xff] %v7280_v26  ;;  %v4515_v25 = vunpack.i.h.bf16 %v4513_v15  ;;  %v2721_v52 = vrot.slane %v4514_v36, %v9599_v17  ;;  %vm1052_vm3 = vcmp.eq.s32.totalorder %v6915_v18, %v9538_v62  ;;  %vm1053_vm2 = vcmp.eq.s32.totalorder %v6977_v47, %v9538_v62 }
 0x29f   :  { %4807 = vperm.xlu0 %4504, %v9588_v34   ;;  %4752 = vperm.xlu1 %4510, %v9589_v49   ;;  %v7256_v34 = vsel %vm9275_vm0, %v2822_v8, %v2818_v50  ;;  %v9591_v49 = vld [vmem:[#allocation46_spill] sm:$0xff]  ;;  %v7274_v50 = vsel %vm1045_vm8, 1.0, %v9477_v40  ;;  %v7277_v8 = vsel %vm1070_vm1, 1.0, %v9477_v40  ;;  %v7305_v36 = vsel %vm1048_vm12, 1.0, %v9477_v40 }
 0x2a0   :  { %9590 = vst [vmem:[#allocation42_spill] sm:$0xff] %v7256_v34  ;;  %v9593_v51 = vpack.i.bf16 %v9591_v49, %v9592_v20  ;;  %9595 = vst [vmem:[#allocation41_spill] sm:$0xff] %v7277_v8  ;;  %v7285_v20 = vsel %vm1049_vm6, 1.0, %v9477_v40  ;;  %v9601_v43 = vpack.i.bf16 %v6845_v9, %v6876_v27  ;;  %v9602_v14 = vpack.i.bf16 %v6882_v48, %v6893_v28  ;;  %v9605_v49 = vld [vmem:[#allocation11_spill] sm:$0xff]  ;;  %v9606_v8 = vld [vmem:[#allocation32_spill] sm:$0xff]  ;;  %v4518_v9 = vpop.permute.xlu1 %4517 }
 0x2a1   :  { %9597 = vst [vmem:[#allocation43_spill] sm:$0xff] %v7285_v20  ;;  %9600 = vst [vmem:[#allocation46_spill] sm:$0xff] %v7305_v36  ;;  %vm1090_vm7 = vcmp.eq.s32.totalorder %v6535_v5, %v9605_v49  ;;  %v2728_v26 = vrot.slane %v4515_v25, %v9606_v8  ;;  %vm2736_vm11 = vcmask 326912   ;;  %v7328_v28 = vsel %vm1052_vm3, 1.0, %v9477_v40  ;;  %v9612_v36 = vld [vmem:[#allocation51_spill] sm:$0xff]  ;;  %v9613_v20 = vld [vmem:[#allocation50_spill] sm:$0xff] }
 0x2a2   :  { %9607 = vst [vmem:[#allocation55_spill] sm:$0xff] %v7328_v28  ;;  %v7334_v27 = vsel %vm1053_vm2, 1.0, %v9477_v40  ;;  %vm1056_vm13 = vcmp.eq.s32.totalorder %v7083_v58, %v9538_v62  ;;  %vm1057_vm8 = vcmp.eq.s32.totalorder %v7096_v16, %v9538_v62  ;;  %v7352_v15 = vsel %vm1090_vm7, 1.0, %v9477_v40 }
 0x2a3   :  { %4817 = vperm.xlu0 %4504, %v9593_v51   ;;  %4762 = vperm.xlu1 %4510, %v9594_v13   ;;  %v9598_v51 = vld [vmem:[#allocation10_spill] sm:$0xff]  ;;  %9608 = vst [vmem:[#allocation56_spill] sm:$0xff] %v7334_v27  ;;  %vm1061_vm6 = vcmp.eq.s32.totalorder %v9559_v23, %v9571_v45  ;;  %v9614_v62 = vpack.i.bf16 %v9612_v36, %v9613_v20  ;;  %v7372_v8 = vsel %vm1056_vm13, 1.0, %v9477_v40  ;;  %v7375_v20 = vsel %vm1057_vm8, 1.0, %v9477_v40 }
 0x2a4   :  { %vm1074_vm14 = vcmp.eq.s32.totalorder %v6535_v5, %v9598_v51  ;;  %vm1075_vm10 = vcmp.eq.s32.totalorder %v6597_v38, %v9598_v51  ;;  %vm1078_vm4 = vcmp.eq.s32.totalorder %v6711_v7, %v9598_v51  ;;  %v9615_v34 = vpack.i.bf16 %v6949_v32, %v6943_v1 }
 0x2a5   :  { %v7316_v2 = vsel %vm1074_vm14, 1.0, %v9477_v40  ;;  %v7319_v13 = vsel %vm1075_vm10, 1.0, %v9477_v40  ;;  %v7340_v48 = vsel %vm1078_vm4, 1.0, %v9477_v40  ;;  %vm1060_vm14 = vcmp.eq.s32.totalorder %v9558_v55, %v9571_v45 }
 0x2a6   :  { %9603 = vst [vmem:[#allocation45_spill] sm:$0xff] %v7316_v2  ;;  %9604 = vst [vmem:[#allocation10_spill] sm:$0xff] %v7319_v13  ;;  %v9616_v13 = vld [vmem:[#allocation13_spill] sm:$0xff]  ;;  %vm1065_vm3 = vcmp.eq.s32.totalorder %v6824_v46, %v9571_v45  ;;  %vm2743_vm2 = vcmask 392512   ;;  %v9621_v25 = vpack.i.bf16 %v6955_v63, %v6963_v0  ;;  %vm9297_vm4 = vcmask 458112  }
 0x2a7   :  { %4772 = vperm.xlu1 %4510, %v9601_v43   ;;  %4827 = vperm.xlu0 %4504, %v9602_v14   ;;  %9609 = vst [vmem:[#allocation57_spill] sm:$0xff] %v7340_v48  ;;  %v2723_v43 = vsel %vm2722_vm15, %v2721_v52, %v2716_v61  ;;  %v9610_v14 = vld [vmem:[#allocation12_spill] sm:$0xff]  ;;  %v4519_v61 = vunpack.i.l.bf16 %v4518_v9  ;;  %v4558_v52 = vpop.permute.xlu0 %4557  ;;  %vm1123_vm12 = vcmp.eq.s32.totalorder %v6597_v38, %v9616_v13  ;;  %v4523_v27 = vpop.permute.xlu1 %4522 }
 0x2a8   :  { %vm1107_vm1 = vcmp.eq.s32.totalorder %v6597_v38, %v9610_v14  ;;  %9611 = vst [vmem:[#allocation12_spill] sm:$0xff] %v7352_v15  ;;  %vm1106_vm9 = vcmp.eq.s32.totalorder %v6535_v5, %v9610_v14  ;;  %v2730_v17 = vsel %vm2729_vm5, %v2728_v26, %v2723_v43  ;;  %vm1122_vm10 = vcmp.eq.s32.totalorder %v6535_v5, %v9616_v13 }
 0x2a9   :  { %v7378_v1 = vsel %vm1107_vm1, 1.0, %v9477_v40  ;;  %v7381_v32 = vsel %vm1106_vm9, 1.0, %v9477_v40  ;;  %v4520_v26 = vunpack.i.h.bf16 %v4518_v9  ;;  %v4560_v36 = vunpack.i.h.bf16 %v4558_v52 }
 0x2aa   :  { %9617 = vst [vmem:[#allocation51_spill] sm:$0xff] %v7381_v32  ;;  %v7391_v43 = vsel %vm1123_vm12, 1.0, %v9477_v40  ;;  %v9622_v48 = vpack.i.bf16 %v6966_v10, %v6988_v53  ;;  %v4559_v28 = vunpack.i.l.bf16 %v4558_v52  ;;  %v7413_v63 = vsel %vm1122_vm10, 1.0, %v9477_v40 }
 0x2ab   :  { %4782 = vperm.xlu1 %4510, %v9614_v62   ;;  %4837 = vperm.xlu0 %4504, %v9615_v34   ;;  %v7386_v34 = vsel %vm1061_vm6, 1.0, %v9477_v40  ;;  %9619 = vst [vmem:[#allocation13_spill] sm:$0xff] %v7391_v43  ;;  %v9620_v62 = vld [vmem:[#allocation28_spill] sm:$0xff]  ;;  %9624 = vst [vmem:[#allocation59_spill] sm:$0xff] %v7413_v63  ;;  %vm1064_vm7 = vcmp.eq.s32.totalorder %v6785_v44, %v9571_v45  ;;  %v7422_v53 = vsel %vm1065_vm3, 1.0, %v9477_v40  ;;  %v4524_v10 = vunpack.i.l.bf16 %v4523_v27  ;;  %v9638_v63 = vld [vmem:[#allocation35_spill] sm:$0xff] }
 0x2ac   :  { %9618 = vst [vmem:[#allocation50_spill] sm:$0xff] %v7386_v34  ;;  %v2735_v2 = vrot.slane %v4519_v61, %v9620_v62  ;;  %v7410_v61 = vsel %vm1060_vm14, 1.0, %v9477_v40  ;;  %9625 = vst [vmem:[#allocation60_spill] sm:$0xff] %v7422_v53  ;;  %vm1109_vm13 = vcmp.eq.s32.totalorder %v9559_v23, %v9610_v14  ;;  %vm1124_vm8 = vcmp.eq.s32.totalorder %v9558_v55, %v9616_v13  ;;  %v9637_v53 = vld [vmem:[#allocation18_spill] sm:$0xff] }
 0x2ad   :  { %9623 = vst [vmem:[#allocation58_spill] sm:$0xff] %v7410_v61  ;;  %vm1069_vm1 = vcmp.eq.s32.totalorder %v6977_v47, %v9571_v45  ;;  %v9627_v15 = vpack.i.bf16 %v7010_v11, %v7013_v42  ;;  %v9628_v9 = vpack.i.bf16 %v7066_v3, %v7044_v19  ;;  %vm1080_vm9 = vcmp.eq.s32.totalorder %v6785_v44, %v9598_v51 }
 0x2ae   :  { %v2737_v0 = vsel %vm2736_vm11, %v2735_v2, %v2730_v17  ;;  %vm9276_vm6 = vcmask 523712   ;;  %v7452_v11 = vsel %vm1109_vm13, 1.0, %v9477_v40  ;;  %vm1068_vm12 = vcmp.eq.s32.totalorder %v6915_v18, %v9571_v45  ;;  %v9635_v2 = vld [vmem:[#allocation22_spill] sm:$0xff] }
 0x2af   :  { %4792 = vperm.xlu1 %4510, %v9621_v25   ;;  %4847 = vperm.xlu0 %4504, %v9622_v48   ;;  %v9626_v48 = vld [vmem:[#allocation8_spill] sm:$0xff]  ;;  %9630 = vst [vmem:[#allocation62_spill] sm:$0xff] %v7452_v11  ;;  %v7457_v42 = vsel %vm1124_vm8, 1.0, %v9477_v40  ;;  %v7460_v19 = vsel %vm1069_vm1, 1.0, %v9477_v40  ;;  %vm1095_vm14 = vcmp.eq.s32.totalorder %v6762_v37, %v9605_v49  ;;  %vm1073_vm10 = vcmp.eq.s32.totalorder %v7096_v16, %v9571_v45  ;;  %v9647_v16 = vld [vmem:[#allocation21_spill] sm:$0xff] }
 0x2b0   :  { %v2742_v25 = vrot.slane %v4520_v26, %v9626_v48  ;;  %v7428_v52 = vrot.slane %v4560_v36, %v9626_v48  ;;  %v7442_v26 = vsel %vm1064_vm7, 1.0, %v9477_v40  ;;  %v7447_v36 = vrot.slane %v4559_v28, %v9620_v62  ;;  %9631 = vst [vmem:[#allocation63_spill] sm:$0xff] %v7457_v42  ;;  %9632 = vst [vmem:[#allocation64_spill] sm:$0xff] %v7460_v19  ;;  %v9651_v19 = vld [vmem:[#allocation47_spill] sm:$0xff]  ;;  %v9659_v62 = vld [vmem:[#allocation52_spill] sm:$0xff] }
 0x2b1   :  { %9629 = vst [vmem:[#allocation61_spill] sm:$0xff] %v7442_v26  ;;  %v4525_v17 = vunpack.i.h.bf16 %v4523_v27  ;;  %vm1077_vm3 = vcmp.eq.s32.totalorder %v9559_v23, %v9598_v51  ;;  %v2749_v28 = vrot.slane %v4524_v10, %v6905_v39  ;;  %v9639_v43 = vpack.i.bf16 %v9637_v53, %v9638_v63  ;;  %v9646_v10 = vld [vmem:[#allocation14_spill] sm:$0xff]  ;;  %v9660_v48 = vld [vmem:[#allocation53_spill] sm:$0xff] }
 0x2b2   :  { %v2744_v3 = vsel %vm2743_vm2, %v2742_v25, %v2737_v0  ;;  %v7482_v27 = vsel %vm1068_vm12, 1.0, %v9477_v40  ;;  %vm1072_vm7 = vcmp.eq.s32.totalorder %v7083_v58, %v9571_v45  ;;  %v7489_v25 = vsel %vm1095_vm14, 1.0, %v9477_v40  ;;  %v9644_v45 = vld [vmem:[#allocation17_spill] sm:$0xff]  ;;  %v4568_v0 = vpop.permute.xlu0 %4567 }
 0x2b3   :  { %4802 = vperm.xlu1 %4510, %v9627_v15   ;;  %4857 = vperm.xlu0 %4504, %v9628_v9   ;;  %v7468_v15 = vsel %vm1080_vm9, 1.0, %v9477_v40  ;;  %v9634_v9 = vld [vmem:[#allocation30_spill] sm:$0xff]  ;;  %9641 = vst [vmem:[#allocation22_spill] sm:$0xff] %v7489_v25  ;;  %vm1076_vm13 = vcmp.eq.s32.totalorder %v9558_v55, %v9598_v51  ;;  %vm2764_vm8 = vcmask 589312   ;;  %v7499_v53 = vsel %vm1077_vm3, 1.0, %v9477_v40 }
 0x2b4   :  { %9633 = vst [vmem:[#allocation65_spill] sm:$0xff] %v7468_v15  ;;  %v9636_v26 = vpack.i.bf16 %v9634_v9, %v9635_v2  ;;  %9640 = vst [vmem:[#allocation30_spill] sm:$0xff] %v7482_v27  ;;  %vm1081_vm1 = vcmp.eq.s32.totalorder %v6824_v46, %v9598_v51  ;;  %vm1092_vm9 = vcmp.eq.s32.totalorder %v9558_v55, %v9605_v49  ;;  %v7507_v9 = vsel %vm1072_vm7, 1.0, %v9477_v40  ;;  %v9648_v15 = vld [vmem:[#allocation15_spill] sm:$0xff]  ;;  %v9650_v27 = vld [vmem:[#allocation37_spill] sm:$0xff] }
 0x2b5   :  { %9643 = vst [vmem:[#allocation35_spill] sm:$0xff] %v7499_v53  ;;  %v2756_v2 = vrot.slane %v4525_v17, %v9644_v45  ;;  %9645 = vst [vmem:[#allocation17_spill] sm:$0xff] %v7507_v9  ;;  %vm1140_vm12 = vcmp.eq.s32.totalorder %v9558_v55, %v9646_v10  ;;  %vm1091_vm14 = vcmp.eq.s32.totalorder %v6597_v38, %v9605_v49  ;;  %v7526_v42 = vsel %vm1076_vm13, 1.0, %v9477_v40  ;;  %v9656_v9 = vld [vmem:[#allocation38_spill] sm:$0xff] }
 0x2b6   :  { %v2751_v63 = vsel %vm9297_vm4, %v2749_v28, %v2744_v3  ;;  %v9649_v25 = vpack.i.bf16 %v9647_v16, %v9648_v15  ;;  %v9652_v11 = vpack.i.bf16 %v9650_v27, %v9651_v19  ;;  %9653 = vst [vmem:[#allocation14_spill] sm:$0xff] %v7526_v42  ;;  %vm2771_vm3 = vcmask 654912  }
 0x2b7   :  { %4812 = vperm.xlu1 %4510, %v9636_v26   ;;  %4867 = vperm.xlu0 %4504, %v9639_v43   ;;  %v7492_v26 = vsel %vm1073_vm10, 1.0, %v9477_v40  ;;  %v4528_v43 = vpop.permute.xlu1 %4527  ;;  %vm1126_vm10 = vcmp.eq.s32.totalorder %v6711_v7, %v9616_v13  ;;  %v7542_v19 = vsel %vm1092_vm9, 1.0, %v9477_v40  ;;  %v7545_v15 = vsel %vm1140_vm12, 1.0, %v9477_v40 }
 0x2b8   :  { %9642 = vst [vmem:[#allocation18_spill] sm:$0xff] %v7492_v26  ;;  %v4529_v3 = vunpack.i.l.bf16 %v4528_v43  ;;  %v7548_v28 = vsel %vm1091_vm14, 1.0, %v9477_v40  ;;  %vm1141_vm7 = vcmp.eq.s32.totalorder %v9559_v23, %v9646_v10  ;;  %vm1093_vm13 = vcmp.eq.s32.totalorder %v9559_v23, %v9605_v49  ;;  %v9657_v26 = vld [vmem:[#allocation39_spill] sm:$0xff] }
 0x2b9   :  { %9654 = vst [vmem:[#allocation21_spill] sm:$0xff] %v7548_v28  ;;  %v4570_v27 = vunpack.i.h.bf16 %v4568_v0  ;;  %v7555_v16 = vsel %vm1126_vm10, 1.0, %v9477_v40  ;;  %v2758_v17 = vsel %vm9276_vm6, %v2756_v2, %v2751_v63  ;;  %v4530_v42 = vunpack.i.h.bf16 %v4528_v43 }
 0x2ba   :  { %9655 = vst [vmem:[#allocation15_spill] sm:$0xff] %v7555_v16  ;;  %vm9279_vm9 = vcmask 720512   ;;  %v9658_v58 = vpack.i.bf16 %v9656_v9, %v9657_v26  ;;  %v9661_v61 = vpack.i.bf16 %v9659_v62, %v9660_v48  ;;  %v7572_v43 = vsel %vm1141_vm7, 1.0, %v9477_v40 }
 0x2bb   :  { %4822 = vperm.xlu1 %4510, %v9649_v25   ;;  %4877 = vperm.xlu0 %4504, %v9652_v11   ;;  %v7536_v11 = vsel %vm1081_vm1, 1.0, %v9477_v40  ;;  %v4569_v25 = vunpack.i.l.bf16 %v4568_v0  ;;  %vm1108_vm1 = vcmp.eq.s32.totalorder %v9558_v55, %v9610_v14  ;;  %v4533_v53 = vpop.permute.xlu1 %4532  ;;  %v9662_v55 = vld [vmem:[#allocation29_spill] sm:$0xff]  ;;  %9663 = vst [vmem:[#allocation37_spill] sm:$0xff] %v7572_v43  ;;  %v7575_v63 = vsel %vm1093_vm13, 1.0, %v9477_v40 }
 0x2bc   :  { %v2763_v32 = vrot.slane %v4529_v3, %v9662_v55  ;;  %9664 = vst [vmem:[#allocation47_spill] sm:$0xff] %v7575_v63  ;;  %vm1112_vm12 = vcmp.eq.s32.totalorder %v6785_v44, %v9610_v14  ;;  %v7582_v62 = vsel %vm1108_vm1, 1.0, %v9477_v40  ;;  %vm1127_vm14 = vcmp.eq.s32.totalorder %v6762_v37, %v9616_v13 }
 0x2bd   :  { %9665 = vst [vmem:[#allocation38_spill] sm:$0xff] %v7582_v62  ;;  %vm1079_vm10 = vcmp.eq.s32.totalorder %v6762_v37, %v9598_v51  ;;  %v7592_v26 = vrot.slane %v4569_v25, %v9662_v55  ;;  %vm2785_vm7 = vcmask 786112   ;;  %v4534_v2 = vunpack.i.l.bf16 %v4533_v53 }
 0x2be   :  { %vm1098_vm13 = vcmp.eq.s32.totalorder %v6849_v12, %v9605_v49  ;;  %v7608_v34 = vsel %vm1112_vm12, 1.0, %v9477_v40  ;;  %vm1094_vm1 = vcmp.eq.s32.totalorder %v6711_v7, %v9605_v49  ;;  %v2765_v0 = vsel %vm2764_vm8, %v2763_v32, %v2758_v17 }
 0x2bf   :  { %4832 = vperm.xlu1 %4510, %v9658_v58   ;;  %4887 = vperm.xlu0 %4504, %v9661_v61   ;;  %v9666_v61 = vld [vmem:[#allocation31_spill] sm:$0xff]  ;;  %v9667_v58 = vpack.i.bf16 %v7155_v57, %v7152_v24  ;;  %9669 = vst [vmem:[#allocation39_spill] sm:$0xff] %v7608_v34  ;;  %v7617_v24 = vsel %vm1079_vm10, 1.0, %v9477_v40  ;;  %vm1113_vm0 = vcmp.eq.s32.totalorder %v6824_v46, %v9610_v14  ;;  %v7622_v57 = vsel %vm1098_vm13, 1.0, %v9477_v40 }
 0x2c0   :  { %v7589_v48 = vrot.slane %v4570_v27, %v9666_v61  ;;  %v2770_v3 = vrot.slane %v4530_v42, %v9666_v61  ;;  %v9668_v27 = vpack.i.bf16 %v7165_v35, %v7182_v22  ;;  %v7614_v42 = vsel %vm1127_vm14, 1.0, %v9477_v40  ;;  %9671 = vst [vmem:[#allocation53_spill] sm:$0xff] %v7617_v24  ;;  %9672 = vst [vmem:[#allocation29_spill] sm:$0xff] %v7622_v57  ;;  %v9673_v35 = vld [vmem:[#allocation34_spill] sm:$0xff] }
 0x2c1   :  { %9670 = vst [vmem:[#allocation52_spill] sm:$0xff] %v7614_v42  ;;  %v4535_v22 = vunpack.i.h.bf16 %v4533_v53  ;;  %vm1139_vm12 = vcmp.eq.s32.totalorder %v6597_v38, %v9646_v10  ;;  %vm1084_vm6 = vcmp.eq.s32.totalorder %v6915_v18, %v9598_v51  ;;  %v2777_v32 = vrot.slane %v4534_v2, %v9673_v35 }
 0x2c2   :  { %v7594_v9 = vpop.permute.xlu0 %4577  ;;  %v7629_v17 = vpop.permute.xlu1 %4537  ;;  %v7636_v53 = vsel %vm1094_vm1, 1.0, %v9477_v40  ;;  %vm1138_vm14 = vcmp.eq.s32.totalorder %v6535_v5, %v9646_v10  ;;  %v2772_v25 = vsel %vm2771_vm3, %v2770_v3, %v2765_v0  ;;  %v9675_v63 = vpack.i.bf16 %v7168_v6, %v7191_v4 }
 0x2c3   :  { %4842 = vperm.xlu1 %4510, %v9667_v58   ;;  %4897 = vperm.xlu0 %4504, %v9668_v27   ;;  %9674 = vst [vmem:[#allocation31_spill] sm:$0xff] %v7636_v53  ;;  %v9676_v2 = vpack.i.bf16 %v7173_v30, %v7194_v29  ;;  %v7648_v62 = vsel %vm1113_vm0, 1.0, %v9477_v40  ;;  %vm1099_vm10 = vcmp.eq.s32.totalorder %v6889_v31, %v9605_v49  ;;  %v7662_v30 = vsel %vm1139_vm12, 1.0, %v9477_v40  ;;  %v9680_v29 = vld [vmem:[#allocation36_spill] sm:$0xff] }
 0x2c4   :  { %9677 = vst [vmem:[#allocation66_spill] sm:$0xff] %v7648_v62  ;;  %vm1110_vm13 = vcmp.eq.s32.totalorder %v6711_v7, %v9610_v14  ;;  %9678 = vst [vmem:[#allocation67_spill] sm:$0xff] %v7662_v30  ;;  %v7668_v4 = vsel %vm1084_vm6, 1.0, %v9477_v40  ;;  %v2784_v0 = vrot.slane %v4535_v22, %v9680_v29  ;;  %vm1125_vm0 = vcmp.eq.s32.totalorder %v9559_v23, %v9616_v13 }
 0x2c5   :  { %9679 = vst [vmem:[#allocation68_spill] sm:$0xff] %v7668_v4  ;;  %vm1085_vm1 = vcmp.eq.s32.totalorder %v6977_v47, %v9598_v51  ;;  %v2779_v38 = vsel %vm9279_vm9, %v2777_v32, %v2772_v25  ;;  %v7684_v6 = vsel %vm1099_vm10, 1.0, %v9477_v40  ;;  %v7687_v22 = vsel %vm1110_vm13, 1.0, %v9477_v40 }
 0x2c6   :  { %v7631_v58 = vpop.permute.xlu0 %4587  ;;  %9682 = vst [vmem:[#allocation69_spill] sm:$0xff] %v7684_v6  ;;  %9683 = vst [vmem:[#allocation70_spill] sm:$0xff] %v7687_v22  ;;  %vm1096_vm6 = vcmp.eq.s32.totalorder %v6785_v44, %v9605_v49  ;;  %vm2792_vm12 = vcmask 851712   ;;  %v9684_v23 = vpack.i.bf16 %v7220_v59, %v7232_v54  ;;  %v9685_v25 = vpack.i.bf16 %v7223_v56, %v7241_v21 }
 0x2c7   :  { %4852 = vperm.xlu1 %4510, %v9675_v63   ;;  %4907 = vperm.xlu0 %4504, %v9676_v2   ;;  %v7672_v63 = vsel %vm1138_vm14, 1.0, %v9477_v40  ;;  %vm1130_vm14 = vcmp.eq.s32.totalorder %v6849_v12, %v9616_v13  ;;  %v7704_v27 = vsel %vm1125_vm0, 1.0, %v9477_v40  ;;  %vm1144_vm10 = vcmp.eq.s32.totalorder %v6785_v44, %v9646_v10 }
 0x2c8   :  { %9681 = vst [vmem:[#allocation36_spill] sm:$0xff] %v7672_v63  ;;  %9686 = vst [vmem:[#allocation71_spill] sm:$0xff] %v7704_v27  ;;  %v7709_v59 = vsel %vm1085_vm1, 1.0, %v9477_v40  ;;  %vm1111_vm13 = vcmp.eq.s32.totalorder %v6762_v37, %v9610_v14  ;;  %v2786_v56 = vsel %vm2785_vm7, %v2784_v0, %v2779_v38  ;;  %v7717_v21 = vsel %vm1096_vm6, 1.0, %v9477_v40 }
 0x2c9   :  { %9687 = vst [vmem:[#allocation72_spill] sm:$0xff] %v7709_v59  ;;  %9688 = vst [vmem:[#allocation73_spill] sm:$0xff] %v7717_v21  ;;  %vm1145_vm0 = vcmp.eq.s32.totalorder %v6824_v46, %v9646_v10  ;;  %vm2799_vm9 = vcmask 917312   ;;  %v4579_v5 = vunpack.i.l.bf16 %v7594_v9  ;;  %v7727_v0 = vsel %vm1130_vm14, 1.0, %v9477_v40  ;;  %v9698_v21 = vld [vmem:[#allocation54_spill] sm:$0xff] }
 0x2ca   :  { %v7679_v3 = vpop.permute.xlu1 %4542  ;;  %v7681_v2 = vpop.permute.xlu0 %4597  ;;  %9689 = vst [vmem:[#allocation74_spill] sm:$0xff] %v7727_v0  ;;  %v9690_v22 = vpack.i.bf16 %v7262_v60, %v7259_v41  ;;  %v9691_v27 = vpack.i.bf16 %v7274_v50, %v7265_v33  ;;  %v7745_v6 = vsel %vm1111_vm13, 1.0, %v9477_v40  ;;  %v7755_v33 = vsel %vm1145_vm0, 1.0, %v9477_v40  ;;  %v9700_v41 = vld [vmem:[#allocation44_spill] sm:$0xff]  ;;  %v9701_v0 = vld [vmem:[#allocation41_spill] sm:$0xff] }
 0x2cb   :  { %4917 = vperm.xlu0 %4504, %v9684_v23   ;;  %4862 = vperm.xlu1 %4510, %v9685_v25   ;;  %v4539_v23 = vunpack.i.l.bf16 %v7629_v17  ;;  %v4580_v25 = vunpack.i.h.bf16 %v7594_v9  ;;  %v7739_v9 = vsel %vm1144_vm10, 1.0, %v9477_v40  ;;  %9693 = vst [vmem:[#allocation76_spill] sm:$0xff] %v7745_v6  ;;  %9694 = vst [vmem:[#allocation77_spill] sm:$0xff] %v7755_v33  ;;  %vm1082_vm1 = vcmp.eq.s32.totalorder %v6849_v12, %v9598_v51  ;;  %v9704_v33 = vld [vmem:[#allocation46_spill] sm:$0xff] }
 0x2cc   :  { %9692 = vst [vmem:[#allocation75_spill] sm:$0xff] %v7739_v9  ;;  %v4540_v50 = vunpack.i.h.bf16 %v7629_v17  ;;  %v9697_v9 = vld [vmem:[#allocation23_spill] sm:$0xff]  ;;  %vm1097_vm6 = vcmp.eq.s32.totalorder %v6824_v46, %v9605_v49  ;;  %v9699_v17 = vld [vmem:[#allocation42_spill] sm:$0xff]  ;;  %v4590_v53 = vunpack.i.h.bf16 %v7631_v58  ;;  %vm2806_vm14 = vcmask 982912  }
 0x2cd   :  { %v2791_v60 = vrot.slane %v4539_v23, %v9697_v9  ;;  %v7766_v6 = vrot.slane %v4580_v25, %v9698_v21  ;;  %v7769_v59 = vrot.slane %v4579_v5, %v9697_v9  ;;  %v9702_v23 = vpack.i.bf16 %v9700_v41, %v9701_v0  ;;  %v9703_v25 = vld [vmem:[#allocation43_spill] sm:$0xff] }
 0x2ce   :  { %v4553_v32 = vpop.permute.xlu1 %4552  ;;  %v7724_v4 = vpop.permute.xlu0 %4607  ;;  %v9705_v24 = vpack.i.bf16 %v9703_v25, %v9704_v33  ;;  %v7787_v5 = vsel %vm1082_vm1, 1.0, %v9477_v40  ;;  %vm1116_vm10 = vcmp.eq.s32.totalorder %v6915_v18, %v9610_v14  ;;  %v2798_v0 = vrot.slane %v4540_v50, %v9698_v21 }
 0x2cf   :  { %v4555_v38 = vunpack.i.h.bf16 %v4553_v32  ;;  %v4554_v54 = vunpack.i.l.bf16 %v4553_v32  ;;  %4927 = vperm.xlu0 %4504, %v9690_v22   ;;  %4872 = vperm.xlu1 %4510, %v9691_v27   ;;  %v9695_v27 = vld [vmem:[#allocation32_spill] sm:$0xff]  ;;  %v7808_v50 = vsel %vm1097_vm6, 1.0, %v9477_v40  ;;  %vm1131_vm13 = vcmp.eq.s32.totalorder %v6889_v31, %v9616_v13 }
 0x2d0   :  { %v9696_v32 = vld [vmem:[#allocation40_spill] sm:$0xff]  ;;  %9706 = vst [vmem:[#allocation32_spill] sm:$0xff] %v7787_v5  ;;  %vm2813_vm0 = vcmask 1048512   ;;  %vm1083_vm1 = vcmp.eq.s32.totalorder %v6889_v31, %v9598_v51  ;;  %vm9717_vm6 = vcmask 523712  }
 0x2d1   :  { %v2832_v22 = vrot.slane %v4555_v38, %v9695_v27  ;;  %v2827_v63 = vrot.slane %v4554_v54, %v9696_v32  ;;  %9707 = vst [vmem:[#allocation40_spill] sm:$0xff] %v7808_v50  ;;  %v9725_v50 = vpack.i.bf16 %v7375_v20, %v7372_v8 }
 0x2d2   :  { %v4563_v30 = vpop.permute.xlu1 %4562  ;;  %v7771_v57 = vpop.permute.xlu0 %4617 }
 0x2d3   :  { %v2828_v54 = vsel %vm2722_vm15, %v2827_v63, %v9699_v17  ;;  %v4565_v38 = vunpack.i.h.bf16 %v4563_v30  ;;  %v4564_v62 = vunpack.i.l.bf16 %v4563_v30  ;;  %4937 = vperm.xlu0 %4504, %v9702_v23   ;;  %4882 = vperm.xlu1 %4510, %v9705_v24   ;;  %v4589_v63 = vunpack.i.l.bf16 %v7631_v58 }
 0x2d4   :  { %v2833_v30 = vsel %vm2729_vm5, %v2832_v22, %v2828_v54  ;;  %v2793_v17 = vsel %vm2792_vm12, %v2791_v60, %v2786_v56  ;;  %v9708_v56 = vld [vmem:[#allocation10_spill] sm:$0xff]  ;;  %v9709_v60 = vld [vmem:[#allocation45_spill] sm:$0xff]  ;;  %v9711_v22 = vld [vmem:[#allocation56_spill] sm:$0xff] }
 0x2d5   :  { %v2838_v24 = vsel %vm2736_vm11, %v7447_v36, %v2833_v30  ;;  %v2852_v41 = vrot.slane %v4565_v38, %v9644_v45  ;;  %v2847_v33 = vrot.slane %v4564_v62, %v6905_v39  ;;  %v4544_v36 = vunpack.i.l.bf16 %v7679_v3  ;;  %v9712_v54 = vld [vmem:[#allocation55_spill] sm:$0xff] }
 0x2d6   :  { %v2843_v58 = vsel %vm2743_vm2, %v7428_v52, %v2838_v24  ;;  %v4573_v23 = vpop.permute.xlu1 %4572  ;;  %v7802_v25 = vpop.permute.xlu0 %4627  ;;  %v9710_v52 = vpack.i.bf16 %v9708_v56, %v9709_v60  ;;  %v9713_v38 = vpack.i.bf16 %v9711_v22, %v9712_v54  ;;  %v7824_v30 = vsel %vm1116_vm10, 1.0, %v9477_v40  ;;  %v9715_v24 = vld [vmem:[#allocation25_spill] sm:$0xff]  ;;  %v9722_v22 = vld [vmem:[#allocation12_spill] sm:$0xff] }
 0x2d7   :  { %v2848_v62 = vsel %vm9297_vm4, %v2847_v33, %v2843_v58  ;;  %9714 = vst [vmem:[#allocation23_spill] sm:$0xff] %v7824_v30  ;;  %v2901_v34 = vrot.slane %v4590_v53, %v9715_v24  ;;  %v9716_v33 = vld [vmem:[#allocation24_spill] sm:$0xff]  ;;  %vm1142_vm4 = vcmp.eq.s32.totalorder %v6711_v7, %v9646_v10  ;;  %v2800_v60 = vsel %vm2799_vm9, %v2798_v0, %v2793_v17  ;;  %v9730_v7 = vld [vmem:[#allocation19_spill] sm:$0xff] }
 0x2d8   :  { %4947 = vperm.xlu0 %4504, %v9710_v52   ;;  %4892 = vperm.xlu1 %4510, %v9713_v38   ;;  %v2897_v58 = vrot.slane %v4589_v63, %v9716_v33  ;;  %v2853_v56 = vsel %vm9717_vm6, %v2852_v41, %v2848_v62  ;;  %v4574_v52 = vunpack.i.l.bf16 %v4573_v23  ;;  %v7837_v54 = vsel %vm1131_vm13, 1.0, %v9477_v40  ;;  %v9720_v41 = vld [vmem:[#allocation33_spill] sm:$0xff]  ;;  %v9721_v0 = vld [vmem:[#allocation20_spill] sm:$0xff] }
 0x2d9   :  { %9718 = vst [vmem:[#allocation54_spill] sm:$0xff] %v7837_v54  ;;  %v4545_v38 = vunpack.i.h.bf16 %v7679_v3  ;;  %v7845_v63 = vsel %vm1083_vm1, 1.0, %v9477_v40  ;;  %vm1102_vm10 = vcmp.eq.s32.totalorder %v9720_v41, %v9605_v49  ;;  %vm1117_vm6 = vcmp.eq.s32.totalorder %v6977_v47, %v9610_v14  ;;  %v9723_v3 = vld [vmem:[#allocation57_spill] sm:$0xff]  ;;  %v9736_v30 = vld [vmem:[#allocation8_spill] sm:$0xff] }
 0x2da   :  { %v7840_v42 = vpop.permute.xlu1 %4582  ;;  %v7842_v53 = vpop.permute.xlu0 %4637  ;;  %9719 = vst [vmem:[#allocation42_spill] sm:$0xff] %v7845_v63  ;;  %v2805_v17 = vrot.slane %v4544_v36, %v9721_v0  ;;  %v2858_v62 = vsel %vm2764_vm8, %v7592_v26, %v2853_v56  ;;  %v9724_v5 = vpack.i.bf16 %v9722_v22, %v9723_v3  ;;  %v7866_v47 = vsel %vm1142_vm4, 1.0, %v9477_v40  ;;  %v9737_v41 = vld [vmem:[#allocation28_spill] sm:$0xff] }
 0x2db   :  { %9726 = vst [vmem:[#allocation44_spill] sm:$0xff] %v7866_v47  ;;  %vm9727_vm13 = vcmask 130112   ;;  %v4600_v26 = vunpack.i.h.bf16 %v7681_v2  ;;  %v4599_v56 = vunpack.i.l.bf16 %v7681_v2  ;;  %v2867_v22 = vrot.slane %v4574_v52, %v9673_v35 }
 0x2dc   :  { %4957 = vperm.xlu0 %4504, %v9724_v5   ;;  %4902 = vperm.xlu1 %4510, %v9725_v50   ;;  %v2902_v36 = vsel %vm9727_vm13, %v2901_v34, %v2897_v58  ;;  %v4575_v5 = vunpack.i.h.bf16 %v4573_v23  ;;  %v7875_v20 = vsel %vm1102_vm10, 1.0, %v9477_v40  ;;  %v7878_v50 = vsel %vm1117_vm6, 1.0, %v9477_v40 }
 0x2dd   :  { %9728 = vst [vmem:[#allocation41_spill] sm:$0xff] %v7875_v20  ;;  %9729 = vst [vmem:[#allocation43_spill] sm:$0xff] %v7878_v50  ;;  %v2812_v3 = vrot.slane %v4545_v38, %v9730_v7  ;;  %v2863_v34 = vsel %vm2771_vm3, %v7589_v48, %v2858_v62  ;;  %vm1128_vm4 = vcmp.eq.s32.totalorder %v6785_v44, %v9616_v13  ;;  %v4610_v23 = vunpack.i.h.bf16 %v7724_v4  ;;  %v9731_v38 = vld [vmem:[#allocation51_spill] sm:$0xff]  ;;  %v9733_v48 = vld [vmem:[#allocation50_spill] sm:$0xff] }
 0x2de   :  { %v4593_v58 = vpop.permute.xlu1 %4592  ;;  %v7883_v16 = vpop.permute.xlu0 %4647  ;;  %vm1143_vm1 = vcmp.eq.s32.totalorder %v6762_v37, %v9646_v10  ;;  %v2807_v2 = vsel %vm2806_vm14, %v2805_v17, %v2800_v60  ;;  %v9732_v47 = vpack.i.bf16 %v7378_v1, %v9731_v38  ;;  %v9734_v62 = vld [vmem:[#allocation58_spill] sm:$0xff]  ;;  %v2921_v54 = vrot.slane %v4600_v26, %v9736_v30  ;;  %v9744_v44 = vld [vmem:[#allocation60_spill] sm:$0xff] }
 0x2df   :  { %v4595_v52 = vunpack.i.h.bf16 %v4593_v58  ;;  %v4594_v8 = vunpack.i.l.bf16 %v4593_v58  ;;  %v9735_v63 = vpack.i.bf16 %v9733_v48, %v9734_v62  ;;  %v2916_v43 = vrot.slane %v4599_v56, %v9737_v41  ;;  %v9745_v62 = vld [vmem:[#allocation61_spill] sm:$0xff] }
 0x2e0   :  { %4967 = vperm.xlu0 %4504, %v9732_v47   ;;  %v2872_v28 = vrot.slane %v4575_v5, %v9680_v29  ;;  %vm9738_vm10 = vcmask 720512   ;;  %v9739_v47 = vld [vmem:[#allocation48_spill] sm:$0xff]  ;;  %v4609_v26 = vunpack.i.l.bf16 %v7724_v4  ;;  %v7917_v5 = vsel %vm1128_vm4, 1.0, %v9477_v40 }
 0x2e1   :  { %4912 = vperm.xlu1 %4510, %v9735_v63   ;;  %v2868_v17 = vsel %vm9738_vm10, %v2867_v22, %v2863_v34  ;;  %v2911_v58 = vrot.slane %v4595_v52, %v9695_v27  ;;  %v2906_v1 = vrot.slane %v4594_v8, %v9696_v32  ;;  %vm1088_vm6 = vcmp.eq.s32.totalorder %v9739_v47, %v9598_v51  ;;  %v9742_v52 = vld [vmem:[#allocation59_spill] sm:$0xff] }
 0x2e2   :  { %v7908_v63 = vsel %vm2813_vm0, %v2812_v3, %v2807_v2  ;;  %v4603_v56 = vpop.permute.xlu1 %4602  ;;  %v7911_v38 = vpop.permute.xlu0 %4657  ;;  %9740 = vst [vmem:[#allocation46_spill] sm:$0xff] %v7917_v5  ;;  %v7923_v22 = vsel %vm1143_vm1, 1.0, %v9477_v40  ;;  %v7926_v8 = vrot.slane %v4610_v23, %v9666_v61  ;;  %v9741_v2 = vld [vmem:[#allocation13_spill] sm:$0xff]  ;;  %v9746_v60 = vpack.i.bf16 %v9744_v44, %v9745_v62  ;;  %v9747_v23 = vld [vmem:[#allocation27_spill] sm:$0xff]  ;;  %v9750_v44 = vld [vmem:[#allocation62_spill] sm:$0xff] }
 0x2e3   :  { %v2907_v4 = vsel %vm2722_vm15, %v2906_v1, %v2902_v36  ;;  %v4605_v3 = vunpack.i.h.bf16 %v4603_v56  ;;  %v4604_v34 = vunpack.i.l.bf16 %v4603_v56  ;;  %v9743_v48 = vpack.i.bf16 %v9741_v2, %v9742_v52  ;;  %v9753_v62 = vld [vmem:[#allocation30_spill] sm:$0xff] }
 0x2e4   :  { %v4620_v20 = vunpack.i.h.bf16 %v7771_v57  ;;  %v2873_v37 = vsel %vm2785_vm7, %v2872_v28, %v2868_v17  ;;  %v2912_v50 = vsel %vm2729_vm5, %v2911_v58, %v2907_v4  ;;  %vm1103_vm13 = vcmp.eq.s32.totalorder %v9747_v23, %v9605_v49 }
 0x2e5   :  { %4977 = vperm.xlu0 %4504, %v9743_v48   ;;  %4922 = vperm.xlu1 %4510, %v9746_v60   ;;  %v4584_v36 = vunpack.i.l.bf16 %v7840_v42  ;;  %v2917_v1 = vsel %vm2736_vm11, %v2916_v43, %v2912_v50  ;;  %v2931_v56 = vrot.slane %v4605_v3, %v9644_v45  ;;  %v2926_v2 = vrot.slane %v4604_v34, %v6905_v39  ;;  %v9749_v34 = vld [vmem:[#allocation63_spill] sm:$0xff] }
 0x2e6   :  { %v4630_v52 = vunpack.i.h.bf16 %v7802_v25  ;;  %v4629_v60 = vunpack.i.l.bf16 %v7802_v25  ;;  %v2922_v48 = vsel %vm2743_vm2, %v2921_v54, %v2917_v1  ;;  %v4613_v28 = vpop.permute.xlu1 %4612  ;;  %v7947_v17 = vpop.permute.xlu0 %4667  ;;  %v2936_v4 = vrot.slane %v4609_v26, %v9662_v55  ;;  %v9752_v54 = vld [vmem:[#allocation64_spill] sm:$0xff] }
 0x2e7   :  { %v4619_v43 = vunpack.i.l.bf16 %v7771_v57  ;;  %v2878_v50 = vsel %vm2792_vm12, %v7769_v59, %v2873_v37  ;;  %vm9748_vm4 = vcmask 458112   ;;  %v9751_v25 = vpack.i.bf16 %v9749_v34, %v9750_v44 }
 0x2e8   :  { %v2927_v3 = vsel %vm9748_vm4, %v2926_v2, %v2922_v48  ;;  %v9754_v1 = vpack.i.bf16 %v9752_v54, %v9753_v62  ;;  %vm9328_vm1 = vcmask 1041409   ;;  %v4585_v58 = vunpack.i.h.bf16 %v7840_v42 }
 0x2e9   :  { %4987 = vperm.xlu0 %4504, %v9751_v25   ;;  %v7967_v57 = vsel %vm1088_vm6, 1.0, %v9477_v40  ;;  %v7973_v59 = vsel %vm1103_vm13, 1.0, %v9477_v40  ;;  %vm1114_vm10 = vcmp.eq.s32.totalorder %v6849_v12, %v9610_v14  ;;  %v7978_v26 = vrot.slane %v4620_v20, %v9698_v21 }
 0x2ea   :  { %4932 = vperm.xlu1 %4510, %v9754_v1   ;;  %v2887_v42 = vrot.slane %v4584_v36, %v9721_v0  ;;  %vm9755_vm4 = vcmask 523712   ;;  %vm1129_vm6 = vcmp.eq.s32.totalorder %v6824_v46, %v9616_v13  ;;  %v2980_v2 = vrot.slane %v4630_v52, %v9715_v24  ;;  %v7988_v25 = vpop.permute.xlu1 %4622  ;;  %v7990_v54 = vpop.permute.xlu0 %4677  ;;  %v9759_v52 = vld [vmem:[#allocation18_spill] sm:$0xff]  ;;  %v9760_v1 = vld [vmem:[#allocation17_spill] sm:$0xff] }
 0x2eb   :  { %v2932_v37 = vsel %vm9755_vm4, %v2931_v56, %v2927_v3  ;;  %v2976_v48 = vrot.slane %v4629_v60, %v9716_v33  ;;  %v2883_v34 = vsel %vm2799_vm9, %v7766_v6, %v2878_v50  ;;  %v4614_v44 = vunpack.i.l.bf16 %v4613_v28  ;;  %v9756_v56 = vld [vmem:[#allocation22_spill] sm:$0xff]  ;;  %v9757_v3 = vld [vmem:[#allocation65_spill] sm:$0xff] }
 0x2ec   :  { %v7993_v20 = vrot.slane %v4619_v43, %v9697_v9  ;;  %v4640_v36 = vunpack.i.h.bf16 %v7842_v53  ;;  %v9758_v62 = vpack.i.bf16 %v9756_v56, %v9757_v3  ;;  %v9761_v60 = vpack.i.bf16 %v9759_v52, %v9760_v1  ;;  %v9763_v50 = vld [vmem:[#allocation49_spill] sm:$0xff]  ;;  %v9767_v56 = vld [vmem:[#allocation35_spill] sm:$0xff] }
 0x2ed   :  { %v8003_v6 = vsel %vm1114_vm10, 1.0, %v9477_v40  ;;  %vm1089_vm13 = vcmp.eq.s32.totalorder %v9763_v50, %v9598_v51  ;;  %v2892_v47 = vrot.slane %v4585_v58, %v9730_v7  ;;  %v4639_v43 = vunpack.i.l.bf16 %v7842_v53 }
 0x2ee   :  { %4997 = vperm.xlu0 %4504, %v9758_v62   ;;  %4942 = vperm.xlu1 %4510, %v9761_v60   ;;  %9762 = vst [vmem:[#allocation10_spill] sm:$0xff] %v8003_v6  ;;  %v2937_v5 = vsel %vm2764_vm8, %v2936_v4, %v2932_v37  ;;  %v2888_v3 = vsel %vm2806_vm14, %v2887_v42, %v2883_v34  ;;  %v4615_v62 = vunpack.i.h.bf16 %v4613_v28  ;;  %v8017_v52 = vsel %vm1129_vm6, 1.0, %v9477_v40  ;;  %v4633_v4 = vpop.permute.xlu1 %4632  ;;  %v8023_v37 = vpop.permute.xlu0 %4687 }
 0x2ef   :  { %9764 = vst [vmem:[#allocation45_spill] sm:$0xff] %v8017_v52  ;;  %vm1148_vm10 = vcmp.eq.s32.totalorder %v6915_v18, %v9646_v10  ;;  %vm9765_vm4 = vcmask 130112   ;;  %v2946_v53 = vrot.slane %v4614_v44, %v9673_v35  ;;  %v8028_v28 = vsel %vm1089_vm13, 1.0, %v9477_v40 }
 0x2f0   :  { %v2981_v58 = vsel %vm9765_vm4, %v2980_v2, %v2976_v48  ;;  %9766 = vst [vmem:[#allocation56_spill] sm:$0xff] %v8028_v28  ;;  %v3000_v46 = vrot.slane %v4640_v36, %v9736_v30  ;;  %v2942_v34 = vsel %vm2771_vm3, %v7926_v8, %v2937_v5  ;;  %v4635_v1 = vunpack.i.h.bf16 %v4633_v4  ;;  %v9768_v2 = vld [vmem:[#allocation14_spill] sm:$0xff] }
 0x2f1   :  { %v4634_v60 = vunpack.i.l.bf16 %v4633_v4  ;;  %v9769_v48 = vpack.i.bf16 %v9767_v56, %v9768_v2  ;;  %v9770_v44 = vpack.i.bf16 %v7536_v11, %v7545_v15  ;;  %v2893_v42 = vsel %vm2813_vm0, %v2892_v47, %v2888_v3  ;;  %v9777_v2 = vld [vmem:[#allocation15_spill] sm:$0xff] }
 0x2f2   :  { %v2995_v6 = vrot.slane %v4639_v43, %v9737_v41  ;;  %v8042_v52 = vsel %vm1148_vm10, 1.0, %v9477_v40  ;;  %vm1100_vm6 = vcmp.eq.s32.totalorder %v6915_v18, %v9605_v49  ;;  %v4650_v5 = vunpack.i.h.bf16 %v7883_v16  ;;  %v4643_v47 = vpop.permute.xlu1 %4642  ;;  %v8052_v43 = vpop.permute.xlu0 %4697 }
 0x2f3   :  { %4952 = vperm.xlu1 %4510, %v9769_v48   ;;  %5007 = vperm.xlu0 %4504, %v9770_v44   ;;  %9771 = vst [vmem:[#allocation55_spill] sm:$0xff] %v8042_v52  ;;  %v2951_v8 = vrot.slane %v4615_v62, %v9680_v29  ;;  %v2990_v36 = vrot.slane %v4635_v1, %v9695_v27  ;;  %v4649_v11 = vunpack.i.l.bf16 %v7883_v16  ;;  %vm9772_vm13 = vcmask 720512   ;;  %v9774_v16 = vld [vmem:[#allocation21_spill] sm:$0xff] }
 0x2f4   :  { %v2985_v56 = vrot.slane %v4634_v60, %v9696_v32  ;;  %v2947_v15 = vsel %vm9772_vm13, %v2946_v53, %v2942_v34  ;;  %vm1115_vm10 = vcmp.eq.s32.totalorder %v6889_v31, %v9610_v14  ;;  %v8060_v62 = vsel %vm9328_vm1, %v2893_v42, %v7908_v63  ;;  %v9776_v34 = vld [vmem:[#allocation37_spill] sm:$0xff] }
 0x2f5   :  { %9773 = vst [vmem:[#allocation25_spill] sm:$0xff] %v8060_v62  ;;  %v4645_v1 = vunpack.i.h.bf16 %v4643_v47  ;;  %v4644_v60 = vunpack.i.l.bf16 %v4643_v47  ;;  %v9775_v53 = vpack.i.bf16 %v7542_v19, %v9774_v16  ;;  %v9778_v48 = vpack.i.bf16 %v9776_v34, %v9777_v2  ;;  %v9786_v62 = vld [vmem:[#allocation39_spill] sm:$0xff] }
 0x2f6   :  { %v2986_v4 = vsel %vm2722_vm15, %v2985_v56, %v2981_v58  ;;  %v4670_v44 = vunpack.i.h.bf16 %v7947_v17  ;;  %v8075_v63 = vsel %vm1100_vm6, 1.0, %v9477_v40  ;;  %v9780_v58 = vld [vmem:[#allocation33_spill] sm:$0xff]  ;;  %v2952_v19 = vsel %vm2785_vm7, %v2951_v8, %v2947_v15  ;;  %v4653_v34 = vpop.permute.xlu1 %4652  ;;  %v8087_v2 = vpop.permute.xlu0 %4707  ;;  %v9783_v15 = vld [vmem:[#allocation47_spill] sm:$0xff] }
 0x2f7   :  { %4962 = vperm.xlu1 %4510, %v9775_v53   ;;  %5017 = vperm.xlu0 %4504, %v9778_v48   ;;  %v2991_v3 = vsel %vm2729_vm5, %v2990_v36, %v2986_v4  ;;  %9779 = vst [vmem:[#allocation24_spill] sm:$0xff] %v8075_v63  ;;  %vm1134_vm4 = vcmp.eq.s32.totalorder %v9780_v58, %v9616_v13  ;;  %v4669_v42 = vunpack.i.l.bf16 %v7947_v17  ;;  %v4660_v16 = vunpack.i.h.bf16 %v7911_v38 }
 0x2f8   :  { %v2996_v56 = vsel %vm2736_vm11, %v2995_v6, %v2991_v3  ;;  %v3005_v47 = vrot.slane %v4644_v60, %v6905_v39  ;;  %v4624_v36 = vunpack.i.l.bf16 %v7988_v25  ;;  %v3010_v4 = vrot.slane %v4645_v1, %v9644_v45  ;;  %v9782_v6 = vld [vmem:[#allocation38_spill] sm:$0xff]  ;;  %v9785_v60 = vld [vmem:[#allocation52_spill] sm:$0xff]  ;;  %v9796_v1 = vld [vmem:[#allocation29_spill] sm:$0xff] }
 0x2f9   :  { %v3001_v53 = vsel %vm2743_vm2, %v3000_v46, %v2996_v56  ;;  %v3020_v48 = vrot.slane %v4650_v5, %v9666_v61  ;;  %v3015_v8 = vrot.slane %v4649_v11, %v9662_v55  ;;  %vm9781_vm6 = vcmask 458112   ;;  %v9789_v56 = vld [vmem:[#allocation26_spill] sm:$0xff] }
 0x2fa   :  { %v3006_v17 = vsel %vm9781_vm6, %v3005_v47, %v3001_v53  ;;  %v9784_v3 = vpack.i.bf16 %v9782_v6, %v9783_v15  ;;  %v9787_v52 = vpack.i.bf16 %v9785_v60, %v9786_v62  ;;  %v8102_v46 = vsel %vm1115_vm10, 1.0, %v9477_v40  ;;  %v8125_v6 = vpop.permute.xlu1 %4662  ;;  %v9792_v15 = vld [vmem:[#allocation31_spill] sm:$0xff] }
 0x2fb   :  { %9788 = vst [vmem:[#allocation20_spill] sm:$0xff] %v8102_v46  ;;  %v4659_v5 = vunpack.i.l.bf16 %v7911_v38  ;;  %v2957_v11 = vsel %vm2792_vm12, %v7993_v20, %v2952_v19  ;;  %vm1149_vm13 = vcmp.eq.s32.totalorder %v9789_v56, %v9646_v10  ;;  %v3059_v62 = vrot.slane %v4670_v44, %v9715_v24  ;;  %v8127_v44 = vpop.permute.xlu0 %4717 }
 0x2fc   :  { %4972 = vperm.xlu1 %4510, %v9784_v3   ;;  %5027 = vperm.xlu0 %4504, %v9787_v52   ;;  %v3055_v52 = vrot.slane %v4669_v42, %v9716_v33  ;;  %v4625_v47 = vunpack.i.h.bf16 %v7988_v25  ;;  %v8118_v38 = vsel %vm1134_vm4, 1.0, %v9477_v40  ;;  %v8121_v20 = vrot.slane %v4660_v16, %v9698_v21  ;;  %v9793_v3 = vld [vmem:[#allocation53_spill] sm:$0xff]  ;;  %v9795_v16 = vld [vmem:[#allocation66_spill] sm:$0xff] }
 0x2fd   :  { %9790 = vst [vmem:[#allocation12_spill] sm:$0xff] %v8118_v38  ;;  %v2966_v19 = vrot.slane %v4624_v36, %v9721_v0  ;;  %vm9791_vm10 = vcmask 523712   ;;  %vm1086_vm6 = vcmp.eq.s32.totalorder %v9780_v58, %v9598_v51  ;;  %v2962_v25 = vsel %vm2799_vm9, %v7978_v26, %v2957_v11  ;;  %v9804_v38 = vld [vmem:[#allocation69_spill] sm:$0xff] }
 0x2fe   :  { %v3011_v53 = vsel %vm9791_vm10, %v3010_v4, %v3006_v17  ;;  %v4654_v42 = vunpack.i.l.bf16 %v4653_v34  ;;  %v9794_v60 = vpack.i.bf16 %v9792_v15, %v9793_v3  ;;  %v9797_v36 = vpack.i.bf16 %v9795_v16, %v9796_v1  ;;  %v4673_v46 = vpop.permute.xlu1 %4672  ;;  %v9801_v15 = vld [vmem:[#allocation67_spill] sm:$0xff] }
 0x2ff   :  { %v8140_v4 = vsel %vm1149_vm13, 1.0, %v9477_v40  ;;  %vm1101_vm4 = vcmp.eq.s32.totalorder %v9789_v56, %v9605_v49  ;;  %v8145_v17 = vrot.slane %v4659_v5, %v9697_v9  ;;  %v4680_v26 = vunpack.i.h.bf16 %v7990_v54  ;;  %v8159_v28 = vpop.permute.xlu0 %4727 }
 0x300   :  { %4982 = vperm.xlu1 %4510, %v9794_v60   ;;  %5037 = vperm.xlu0 %4504, %v9797_v36   ;;  %9798 = vst [vmem:[#allocation57_spill] sm:$0xff] %v8140_v4  ;;  %v4679_v11 = vunpack.i.l.bf16 %v7990_v54  ;;  %vm9799_vm10 = vcmask 130112   ;;  %v2971_v1 = vrot.slane %v4625_v47, %v9730_v7  ;;  %v3016_v60 = vsel %vm2764_vm8, %v3015_v8, %v3011_v53  ;;  %v9802_v8 = vld [vmem:[#allocation36_spill] sm:$0xff] }
 0x301   :  { %v3060_v3 = vsel %vm9799_vm10, %v3059_v62, %v3055_v52  ;;  %v8155_v16 = vsel %vm1086_vm6, 1.0, %v9477_v40  ;;  %v2967_v36 = vsel %vm2806_vm14, %v2966_v19, %v2962_v25  ;;  %v4690_v5 = vunpack.i.h.bf16 %v8023_v37  ;;  %v9805_v4 = vld [vmem:[#allocation68_spill] sm:$0xff] }
 0x302   :  { %9800 = vst [vmem:[#allocation19_spill] sm:$0xff] %v8155_v16  ;;  %v4655_v63 = vunpack.i.h.bf16 %v4653_v34  ;;  %v8162_v54 = vsel %vm1101_vm4, 1.0, %v9477_v40  ;;  %v3025_v62 = vrot.slane %v4654_v42, %v9673_v35  ;;  %v4675_v52 = vunpack.i.h.bf16 %v4673_v46 }
 0x303   :  { %v4674_v47 = vunpack.i.l.bf16 %v4673_v46  ;;  %v9803_v53 = vpack.i.bf16 %v9801_v15, %v9802_v8  ;;  %v9806_v19 = vpack.i.bf16 %v9804_v38, %v9805_v4  ;;  %vm1135_vm13 = vcmp.eq.s32.totalorder %v9747_v23, %v9616_v13 }
 0x304   :  { %v3079_v34 = vrot.slane %v4680_v26, %v9736_v30  ;;  %v3074_v25 = vrot.slane %v4679_v11, %v9737_v41  ;;  %v3021_v49 = vsel %vm2771_vm3, %v3020_v48, %v3016_v60  ;;  %v8179_v42 = vsel %vm2813_vm0, %v2971_v1, %v2967_v36  ;;  %v8186_v11 = vpop.permute.xlu0 %4737 }
 0x305   :  { %4992 = vperm.xlu1 %4510, %v9803_v53   ;;  %5047 = vperm.xlu0 %4504, %v9806_v19   ;;  %9807 = vst [vmem:[#allocation51_spill] sm:$0xff] %v8179_v42  ;;  %v4689_v15 = vunpack.i.l.bf16 %v8023_v37  ;;  %v3069_v38 = vrot.slane %v4675_v52, %v9695_v27  ;;  %v3064_v4 = vrot.slane %v4674_v47, %v9696_v32  ;;  %v4683_v53 = vpop.permute.xlu1 %4682  ;;  %v8191_v48 = vsel %vm1135_vm13, 1.0, %v9477_v40  ;;  %v9810_v52 = vld [vmem:[#allocation71_spill] sm:$0xff]  ;;  %v9811_v47 = vld [vmem:[#allocation70_spill] sm:$0xff] }
 0x306   :  { %v3099_v8 = vrot.slane %v4690_v5, %v9666_v61  ;;  %v3030_v26 = vrot.slane %v4655_v63, %v9680_v29  ;;  %vm1150_vm6 = vcmp.eq.s32.totalorder %v9780_v58, %v9646_v10  ;;  %9808 = vst [vmem:[#allocation50_spill] sm:$0xff] %v8191_v48  ;;  %vm9809_vm4 = vcmask 720512   ;;  %v9813_v63 = vld [vmem:[#allocation72_spill] sm:$0xff]  ;;  %v9814_v19 = vld [vmem:[#allocation75_spill] sm:$0xff] }
 0x307   :  { %v3026_v1 = vsel %vm9809_vm4, %v3025_v62, %v3021_v49  ;;  %v3065_v37 = vsel %vm2722_vm15, %v3064_v4, %v3060_v3  ;;  %v4685_v60 = vunpack.i.h.bf16 %v4683_v53  ;;  %v4684_v36 = vunpack.i.l.bf16 %v4683_v53 }
 0x308   :  { %v9812_v5 = vpack.i.bf16 %v9810_v52, %v9811_v47  ;;  %v9815_v46 = vpack.i.bf16 %v9813_v63, %v9814_v19  ;;  %v4700_v42 = vunpack.i.h.bf16 %v8052_v43  ;;  %v3070_v16 = vsel %vm2729_vm5, %v3069_v38, %v3065_v37  ;;  %v8214_v52 = vpop.permute.xlu0 %4747 }
 0x309   :  { %vm1087_vm10 = vcmp.eq.s32.totalorder %v9747_v23, %v9598_v51  ;;  %vm1146_vm13 = vcmp.eq.s32.totalorder %v6849_v12, %v9646_v10  ;;  %v4699_v49 = vunpack.i.l.bf16 %v8052_v43  ;;  %v3075_v3 = vsel %vm2736_vm11, %v3074_v25, %v3070_v16  ;;  %v4693_v37 = vpop.permute.xlu1 %4692 }
 0x30a   :  { %5002 = vperm.xlu1 %4510, %v9812_v5   ;;  %5057 = vperm.xlu0 %4504, %v9815_v46   ;;  %v3089_v62 = vrot.slane %v4685_v60, %v9644_v45  ;;  %v3084_v4 = vrot.slane %v4684_v36, %v6905_v39  ;;  %v3094_v46 = vrot.slane %v4689_v15, %v9662_v55  ;;  %v8220_v43 = vsel %vm1150_vm6, 1.0, %v9477_v40  ;;  %v9817_v15 = vld [vmem:[#allocation76_spill] sm:$0xff]  ;;  %v9818_v36 = vld [vmem:[#allocation73_spill] sm:$0xff] }
 0x30b   :  { %v3031_v53 = vsel %vm2785_vm7, %v3030_v26, %v3026_v1  ;;  %v3080_v38 = vsel %vm2743_vm2, %v3079_v34, %v3075_v3  ;;  %v4710_v16 = vunpack.i.h.bf16 %v8087_v2  ;;  %v4664_v25 = vunpack.i.l.bf16 %v8125_v6  ;;  %v9820_v34 = vld [vmem:[#allocation77_spill] sm:$0xff]  ;;  %v9821_v1 = vld [vmem:[#allocation74_spill] sm:$0xff] }
 0x30c   :  { %vm9816_vm4 = vcmask 458112   ;;  %v9819_v26 = vpack.i.bf16 %v9817_v15, %v9818_v36  ;;  %v9822_v47 = vpack.i.bf16 %v9820_v34, %v9821_v1  ;;  %v8235_v5 = vsel %vm1087_vm10, 1.0, %v9477_v40  ;;  %v8258_v36 = vpop.permute.xlu0 %4757  ;;  %v9830_v1 = vld [vmem:[#allocation54_spill] sm:$0xff] }
 0x30d   :  { %v3085_v60 = vsel %vm9816_vm4, %v3084_v4, %v3080_v38  ;;  %9823 = vst [vmem:[#allocation58_spill] sm:$0xff] %v8235_v5  ;;  %v4709_v63 = vunpack.i.l.bf16 %v8087_v2  ;;  %vm9824_vm6 = vcmask 523712   ;;  %v8245_v4 = vsel %vm1146_vm13, 1.0, %v9477_v40 }
 0x30e   :  { %5012 = vperm.xlu1 %4510, %v9819_v26   ;;  %5067 = vperm.xlu0 %4504, %v9822_v47   ;;  %v3090_v19 = vsel %vm9824_vm6, %v3089_v62, %v3085_v60  ;;  %9825 = vst [vmem:[#allocation8_spill] sm:$0xff] %v8245_v4  ;;  %v8248_v38 = vrot.slane %v4700_v42, %v9698_v21  ;;  %v4694_v15 = vunpack.i.l.bf16 %v4693_v37  ;;  %v4665_v62 = vunpack.i.h.bf16 %v8125_v6  ;;  %v8256_v60 = vpop.permute.xlu1 %4702  ;;  %v9826_v42 = vld [vmem:[#allocation16_spill] sm:$0xff]  ;;  %v9831_v47 = vld [vmem:[#allocation23_spill] sm:$0xff] }
 0x30f   :  { %v8251_v51 = vrot.slane %v4699_v49, %v9697_v9  ;;  %v3036_v2 = vsel %vm2792_vm12, %v8145_v17, %v3031_v53  ;;  %vm1137_vm10 = vcmp.eq.s32.totalorder %v9763_v50, %v9616_v13  ;;  %vm1151_vm13 = vcmp.eq.s32.totalorder %v9747_v23, %v9646_v10  ;;  %v9827_v53 = vld [vmem:[#allocation40_spill] sm:$0xff] }
 0x310   :  { %5148 = vrcp.f32 %v9826_v42  ;;  %v3138_v17 = vrot.slane %v4710_v16, %v9715_v24  ;;  %v3045_v49 = vrot.slane %v4664_v25, %v9721_v0  ;;  %v3095_v6 = vsel %vm2764_vm8, %v3094_v46, %v3090_v19  ;;  %v9828_v26 = vld [vmem:[#allocation32_spill] sm:$0xff] }
 0x311   :  { %v9829_v34 = vpack.i.bf16 %v9827_v53, %v9828_v26  ;;  %v9832_v12 = vpack.i.bf16 %v9830_v1, %v9831_v47  ;;  %v3134_v3 = vrot.slane %v4709_v63, %v9716_v33  ;;  %v3041_v4 = vsel %vm2799_vm9, %v8121_v20, %v3036_v2  ;;  %v9834_v1 = vld [vmem:[#allocation44_spill] sm:$0xff] }
 0x312   :  { %v4720_v42 = vunpack.i.h.bf16 %v8127_v44  ;;  %v4695_v16 = vunpack.i.h.bf16 %v4693_v37  ;;  %v4719_v25 = vunpack.i.l.bf16 %v8127_v44  ;;  %v3104_v46 = vrot.slane %v4694_v15, %v9673_v35  ;;  %v4713_v26 = vpop.permute.xlu1 %4712  ;;  %v9833_v15 = vld [vmem:[#allocation42_spill] sm:$0xff] }
 0x313   :  { %5022 = vperm.xlu1 %4510, %v9829_v34   ;;  %5077 = vperm.xlu0 %4504, %v9832_v12   ;;  %v8283_v19 = vsel %vm1137_vm10, 1.0, %v9477_v40  ;;  %v8286_v53 = vsel %vm1151_vm13, 1.0, %v9477_v40  ;;  %v3050_v12 = vrot.slane %v4665_v62, %v9730_v7  ;;  %v3100_v63 = vsel %vm2771_vm3, %v3099_v8, %v3095_v6  ;;  %v8290_v34 = vpop.permute.xlu0 %4767  ;;  %v9836_v8 = vld [vmem:[#allocation43_spill] sm:$0xff]  ;;  %v9837_v6 = vld [vmem:[#allocation41_spill] sm:$0xff] }
 0x314   :  { %vm1132_vm4 = vcmp.eq.s32.totalorder %v6915_v18, %v9616_v13  ;;  %vm1147_vm6 = vcmp.eq.s32.totalorder %v6889_v31, %v9646_v10  ;;  %v3046_v20 = vsel %vm2806_vm14, %v3045_v49, %v3041_v4  ;;  %v4730_v44 = vunpack.i.h.bf16 %v8159_v28 }
 0x315   :  { %v4715_v37 = vunpack.i.h.bf16 %v4713_v26  ;;  %v4714_v2 = vunpack.i.l.bf16 %v4713_v26  ;;  %v9835_v62 = vpack.i.bf16 %v9833_v15, %v9834_v1  ;;  %v9838_v47 = vpack.i.bf16 %v9836_v8, %v9837_v6  ;;  %v9869_v4 = vld [vmem:[#allocation8_spill] sm:$0xff] }
 0x316   :  { %vm9839_vm10 = vcmask 130112   ;;  %v3158_v35 = vrot.slane %v4720_v42, %v9736_v30  ;;  %v3109_v48 = vrot.slane %v4695_v16, %v9680_v29  ;;  %v3153_v49 = vrot.slane %v4719_v25, %v9737_v41 }
 0x317   :  { %5032 = vperm.xlu1 %4510, %v9835_v62   ;;  %5087 = vperm.xlu0 %4504, %v9838_v47   ;;  %v3139_v5 = vsel %vm9839_vm10, %v3138_v17, %v3134_v3  ;;  %vm9840_vm13 = vcmask 720512   ;;  %v3148_v15 = vrot.slane %v4715_v37, %v9695_v27  ;;  %v3143_v1 = vrot.slane %v4714_v2, %v9696_v32  ;;  %v4723_v17 = vpop.permute.xlu1 %4722  ;;  %v8317_v42 = vpop.permute.xlu0 %4777 }
 0x318   :  { %v3105_v26 = vsel %vm9840_vm13, %v3104_v46, %v3100_v63  ;;  %v8314_v62 = vsel %vm2813_vm0, %v3050_v12, %v3046_v20  ;;  %v4729_v3 = vunpack.i.l.bf16 %v8159_v28  ;;  %v8323_v16 = vsel %vm1132_vm4, 1.0, %v9477_v40  ;;  %v9841_v63 = vld [vmem:[#allocation46_spill] sm:$0xff] }
 0x319   :  { %v8329_v25 = vsel %vm1147_vm6, 1.0, %v9477_v40  ;;  %v8332_v46 = vrot.slane %v4730_v44, %v9666_v61  ;;  %v3144_v28 = vsel %vm2722_vm15, %v3143_v1, %v3139_v5  ;;  %v4724_v12 = vunpack.i.l.bf16 %v4723_v17  ;;  %v9845_v1 = vld [vmem:[#allocation48_spill] sm:$0xff] }
 0x31a   :  { %v9842_v20 = vpack.i.bf16 %v7923_v22, %v9841_v63  ;;  %v9843_v18 = vpack.i.bf16 %v7973_v59, %v7967_v57  ;;  %vm1118_vm4 = vcmp.eq.s32.totalorder %v9780_v58, %v9610_v14  ;;  %v3110_v31 = vsel %vm2785_vm7, %v3109_v48, %v3105_v26  ;;  %v8348_v5 = vpop.eup %5148 }
 0x31b   :  { %v4750_v37 = vunpack.i.h.bf16 %v8214_v52  ;;  %v3149_v44 = vsel %vm2729_vm5, %v3148_v15, %v3144_v28  ;;  %vm1133_vm6 = vcmp.eq.s32.totalorder %v9789_v56, %v9616_v13  ;;  %v4749_v22 = vunpack.i.l.bf16 %v8214_v52  ;;  %v8355_v6 = vpop.permute.xlu1 %4732  ;;  %v8357_v47 = vpop.permute.xlu0 %4787  ;;  %v9844_v15 = vld [vmem:[#allocation11_spill] sm:$0xff] }
 0x31c   :  { %5042 = vperm.xlu1 %4510, %v9842_v20   ;;  %5097 = vperm.xlu0 %4504, %v9843_v18   ;;  %v4704_v2 = vunpack.i.l.bf16 %v8256_v60  ;;  %v3154_v57 = vsel %vm2736_vm11, %v3153_v49, %v3149_v44  ;;  %v4725_v59 = vunpack.i.h.bf16 %v4723_v17  ;;  %v3173_v8 = vrot.slane %v4729_v3, %v9662_v55  ;;  %v9846_v17 = vld [vmem:[#allocation45_spill] sm:$0xff]  ;;  %v9849_v20 = vld [vmem:[#allocation56_spill] sm:$0xff]  ;;  %v9850_v18 = vld [vmem:[#allocation55_spill] sm:$0xff] }
 0x31d   :  { %v3163_v48 = vrot.slane %v4724_v12, %v6905_v39  ;;  %vm1104_vm10 = vcmp.eq.s32.totalorder %v9845_v1, %v9844_v15  ;;  %v4740_v52 = vunpack.i.h.bf16 %v8186_v11  ;;  %v4739_v28 = vunpack.i.l.bf16 %v8186_v11  ;;  %v9847_v12 = vld [vmem:[#allocation10_spill] sm:$0xff] }
 0x31e   :  { %v3115_v49 = vsel %vm2792_vm12, %v8251_v51, %v3110_v31  ;;  %v3159_v3 = vsel %vm2743_vm2, %v3158_v35, %v3154_v57  ;;  %v9848_v63 = vpack.i.bf16 %v9846_v17, %v9847_v12  ;;  %v9851_v44 = vpack.i.bf16 %v9849_v20, %v9850_v18  ;;  %v9857_v20 = vld [vmem:[#allocation12_spill] sm:$0xff] }
 0x31f   :  { %v4705_v26 = vunpack.i.h.bf16 %v8256_v60  ;;  %v8379_v11 = vsel %vm1118_vm4, 1.0, %v9477_v40  ;;  %v8385_v35 = vsel %vm1133_vm6, 1.0, %v9477_v40  ;;  %vm1119_vm13 = vcmp.eq.s32.totalorder %v9747_v23, %v9610_v14  ;;  %v8397_v12 = vpop.permute.xlu1 %4742 }
 0x320   :  { %5052 = vperm.xlu1 %4510, %v9848_v63   ;;  %5107 = vperm.xlu0 %4504, %v9851_v44   ;;  %v3217_v51 = vrot.slane %v4750_v37, %v9715_v24  ;;  %v3213_v31 = vrot.slane %v4749_v22, %v9716_v33  ;;  %v3124_v60 = vrot.slane %v4704_v2, %v9721_v0  ;;  %v4760_v17 = vunpack.i.h.bf16 %v8258_v36  ;;  %v8399_v63 = vpop.permute.xlu0 %4797 }
 0x321   :  { %v3168_v57 = vrot.slane %v4725_v59, %v9644_v45  ;;  %v3120_v58 = vsel %vm2799_vm9, %v8248_v38, %v3115_v49  ;;  %vm9852_vm4 = vcmask 458112   ;;  %v8405_v37 = vsel %vm1104_vm10, 1.0, %v9477_v40  ;;  %v9853_v59 = vld [vmem:[#allocation20_spill] sm:$0xff] }
 0x322   :  { %v3164_v56 = vsel %vm9852_vm4, %v3163_v48, %v3159_v3  ;;  %v8408_v22 = vrot.slane %v4740_v52, %v9698_v21  ;;  %v8411_v2 = vrot.slane %v4739_v28, %v9697_v9  ;;  %v4759_v38 = vunpack.i.l.bf16 %v8258_v36  ;;  %v9854_v48 = vld [vmem:[#allocation24_spill] sm:$0xff]  ;;  %v9856_v3 = vld [vmem:[#allocation57_spill] sm:$0xff] }
 0x323   :  { %v9855_v49 = vpack.i.bf16 %v9853_v59, %v9854_v48  ;;  %v9858_v18 = vpack.i.bf16 %v9856_v3, %v9857_v20  ;;  %vm1105_vm6 = vcmp.eq.s32.totalorder %v9763_v50, %v9844_v15  ;;  %v3129_v44 = vrot.slane %v4705_v26, %v9730_v7  ;;  %v4753_v3 = vpop.permute.xlu1 %4752 }
 0x324   :  { %v8429_v36 = vsel %vm1119_vm13, 1.0, %v9477_v40  ;;  %vm1120_vm10 = vcmp.eq.s32.totalorder %v9845_v1, %v9610_v14  ;;  %vm9859_vm4 = vcmask 130112   ;;  %v3125_v59 = vsel %vm2806_vm14, %v3124_v60, %v3120_v58  ;;  %v8441_v20 = vpop.permute.xlu0 %4807 }
 0x325   :  { %5062 = vperm.xlu1 %4510, %v9855_v49   ;;  %5117 = vperm.xlu0 %4504, %v9858_v18   ;;  %v3218_v28 = vsel %vm9859_vm4, %v3217_v51, %v3213_v31  ;;  %vm9860_vm1 = vcmask 523712   ;;  %v3237_v48 = vrot.slane %v4760_v17, %v9736_v30  ;;  %v4770_v49 = vunpack.i.h.bf16 %v8290_v34  ;;  %v9863_v17 = vld [vmem:[#allocation50_spill] sm:$0xff] }
 0x326   :  { %v3169_v15 = vsel %vm9860_vm1, %v3168_v57, %v3164_v56  ;;  %v4734_v23 = vunpack.i.l.bf16 %v8355_v6  ;;  %v8444_v18 = vsel %vm1105_vm6, 1.0, %v9477_v40  ;;  %v3232_v51 = vrot.slane %v4759_v38, %v9737_v41  ;;  %v9861_v57 = vld [vmem:[#allocation19_spill] sm:$0xff] }
 0x327   :  { %v4755_v31 = vunpack.i.h.bf16 %v4753_v3  ;;  %v4754_v60 = vunpack.i.l.bf16 %v4753_v3  ;;  %v9862_v58 = vpack.i.bf16 %v8162_v54, %v9861_v57  ;;  %v9864_v56 = vpack.i.bf16 %v8220_v43, %v9863_v17 }
 0x328   :  { %v8457_v26 = vsel %vm1120_vm10, 1.0, %v9477_v40  ;;  %v8460_v52 = vsel %vm2813_vm0, %v3129_v44, %v3125_v59  ;;  %v4769_v38 = vunpack.i.l.bf16 %v8290_v34  ;;  %v3174_v3 = vsel %vm2764_vm8, %v3173_v8, %v3169_v15  ;;  %v9866_v44 = vld [vmem:[#allocation34_spill] sm:$0xff]  ;;  %v4763_v34 = vpop.permute.xlu1 %4762  ;;  %v8475_v17 = vpop.permute.xlu0 %4817  ;;  %v9867_v15 = vld [vmem:[#allocation9_spill] sm:$0xff] }
 0x329   :  { %5072 = vperm.xlu1 %4510, %v9862_v58   ;;  %5127 = vperm.xlu0 %4504, %v9864_v56   ;;  %9865 = vst [vmem:[#allocation28_spill] sm:$0xff] %v8460_v52  ;;  %vm1121_vm1 = vcmp.eq.s32.totalorder %v9763_v50, %v9610_v14  ;;  %v4735_v54 = vunpack.i.h.bf16 %v8355_v6  ;;  %v3227_v43 = vrot.slane %v4755_v31, %v9695_v27  ;;  %v4764_v56 = vunpack.i.l.bf16 %v4763_v34 }
 0x32a   :  { %v3222_v57 = vrot.slane %v4754_v60, %v9696_v32  ;;  %vm1136_vm13 = vcmp.eq.s32.totalorder %v9845_v1, %v9616_v13  ;;  %v8472_v58 = vrot.slane %v4770_v49, %v9666_v61  ;;  %v3183_v59 = vrot.slane %v4734_v23, %v9866_v44  ;;  %v9868_v49 = vld [vmem:[#allocation58_spill] sm:$0xff] }
 0x32b   :  { %v118_v6 = vmul.f32 %v8348_v5, %v9867_v15  ;;  %v3179_v31 = vsel %vm2771_vm3, %v8332_v46, %v3174_v3  ;;  %v4765_v13 = vunpack.i.h.bf16 %v4763_v34  ;;  %v9870_v52 = vpack.i.bf16 %v9868_v49, %v9869_v4  ;;  %v1666_v4 = vld [vmem:[%s9140_s3] sm:$0xff] }
 0x32c   :  { %v3223_v60 = vsel %vm2722_vm15, %v3222_v57, %v3218_v28  ;;  %v9871_v23 = vpack.i.bf16 %v8283_v19, %v8286_v53  ;;  %v8495_v5 = vsel %vm1121_vm1, 1.0, %v9477_v40  ;;  %v8498_v46 = vsel %vm1136_vm13, 1.0, %v9477_v40  ;;  %v1667_v19 = vld [vmem:[%s9140_s3 + $0x8] sm:$0xff]  ;;  %v4773_v34 = vpop.permute.xlu1 %4772  ;;  %v8515_v15 = vpop.permute.xlu0 %4827 }
 0x32d   :  { %5082 = vperm.xlu1 %4510, %v9870_v52   ;;  %v3228_v8 = vsel %vm2729_vm5, %v3227_v43, %v3223_v60  ;;  %vm1153_vm6 = vcmp.eq.s32.totalorder %v9763_v50, %v9646_v10  ;;  %119 = vst [vmem:[#allocation2] sm:$0x3] %v118_v6  ;;  %v3188_v53 = vrot.slane %v4735_v54, %v9680_v29  ;;  %v4780_v3 = vunpack.i.h.bf16 %v8317_v42  ;;  %v1668_v50 = vld [vmem:[%s9140_s3 + $0x10] sm:$0xff] }
 0x32e   :  { %5137 = vperm.xlu0 %4504, %v9871_v23   ;;  %v3233_v14 = vsel %vm2736_vm11, %v3232_v51, %v3228_v8  ;;  %v3247_v52 = vrot.slane %v4765_v13, %v9644_v45  ;;  %v3242_v28 = vrot.slane %v4764_v56, %v6905_v39  ;;  %vm9872_vm10 = vcmask 720512  }
 0x32f   :  { %v3184_v43 = vsel %vm9872_vm10, %v3183_v59, %v3179_v31  ;;  %v3238_v57 = vsel %vm2743_vm2, %v3237_v48, %v3233_v14  ;;  %v4463_v60 = vpack.c.bf16 %v1667_v19, %v1666_v4  ;;  %v4779_v6 = vunpack.i.l.bf16 %v8317_v42 }
 0x330   :  { %vm9873_vm4 = vcmask 458112   ;;  %v9874_v51 = vpack.i.bf16 %v8329_v25, %v8323_v16  ;;  %vm1152_vm1 = vcmp.eq.s32.totalorder %v9845_v1, %v9646_v10  ;;  %v8528_v48 = vsel %vm1153_vm6, 1.0, %v9477_v40  ;;  %v8547_v49 = vpop.permute.xlu1 %4782  ;;  %v8549_v23 = vpop.permute.xlu0 %4837 }
 0x331   :  { %v3243_v54 = vsel %vm9873_vm4, %v3242_v28, %v3238_v57  ;;  %v4790_v59 = vunpack.i.h.bf16 %v8357_v47  ;;  %v4789_v8 = vunpack.i.l.bf16 %v8357_v47  ;;  %vm9875_vm13 = vcmask 523712   ;;  %4464 = vmatprep.subr.bf16.mxu1 %v4463_v60  ;;  %v1669_v47 = vld [vmem:[%s9140_s3 + $0x18] sm:$0xff] }
 0x332   :  { %5092 = vperm.xlu1 %4510, %v9874_v51   ;;  %v3248_v42 = vsel %vm9875_vm13, %v3247_v52, %v3243_v54  ;;  %vm9330_vm10 = vcmask 1042434   ;;  %v3252_v16 = vrot.slane %v4769_v38, %v9662_v55  ;;  %v3189_v25 = vsel %vm2785_vm7, %v3188_v53, %v3184_v43  ;;  %4466 = vmatpush3.bf16.msra.mxu1 %v4463_v60  ;;  %v9878_v43 = vld [vmem:[#allocation51_spill] sm:$0xff]  ;;  %v1670_v54 = vld [vmem:[%s9140_s3 + $0x20] sm:$0xff] }
 0x333   :  { %v4774_v31 = vunpack.i.l.bf16 %v4773_v34  ;;  %v5131_v13 = vpack.i.bf16 %v8498_v46, %v8495_v5  ;;  %v8544_v56 = vrot.slane %v4780_v3, %v9698_v21  ;;  %v4744_v38 = vunpack.i.l.bf16 %v8397_v12  ;;  %v9877_v3 = vld [vmem:[#allocation25_spill] sm:$0xff] }
 0x334   :  { %v8555_v4 = vsel %vm1152_vm1, 1.0, %v9477_v40  ;;  %v4467_v19 = vpack.c.bf16 %v1669_v47, %v1668_v50  ;;  %v8558_v53 = vrot.slane %v4779_v6, %v9697_v9  ;;  %v3253_v14 = vsel %vm2764_vm8, %v3252_v16, %v3248_v42 }
 0x335   :  { %v9876_v52 = vpack.i.bf16 %v8385_v35, %v8379_v11  ;;  %v5141_v28 = vpack.i.bf16 %v8528_v48, %v8555_v4  ;;  %v4003_v57 = vsel %vm9330_vm10, %v9878_v43, %v9877_v3  ;;  %v3194_v40 = vsel %vm2792_vm12, %v8411_v2, %v3189_v25  ;;  %v1671_v2 = vld [vmem:[%s9140_s3 + $0x28] sm:$0xff] }
 0x336   :  { %v3296_v10 = vrot.slane %v4790_v59, %v9715_v24  ;;  %v3292_v1 = vrot.slane %v4789_v8, %v9716_v33  ;;  %v4775_v60 = vunpack.i.h.bf16 %v4773_v34  ;;  %4468 = vmatprep.subr.bf16.mxu1 %v4467_v19  ;;  %v4745_v6 = vunpack.i.h.bf16 %v8397_v12  ;;  %v4793_v59 = vpop.permute.xlu1 %4792  ;;  %v8586_v8 = vpop.permute.xlu0 %4847 }
 0x337   :  { %5102 = vperm.xlu1 %4510, %v9876_v52   ;;  %v4800_v11 = vunpack.i.h.bf16 %v8399_v63  ;;  %v3262_v35 = vrot.slane %v4774_v31, %v9866_v44  ;;  %vm9329_vm6 = vcmask 1043459   ;;  %4470 = vmatpush3.bf16.msra.mxu1 %v4467_v19  ;;  %v3203_v51 = vrot.slane %v4744_v38, %v9721_v0 }
 0x338   :  { %v4799_v34 = vunpack.i.l.bf16 %v8399_v63  ;;  %v3258_v12 = vsel %vm2771_vm3, %v8472_v58, %v3253_v14  ;;  %v4471_v42 = vpack.c.bf16 %v1671_v2, %v1670_v54  ;;  %v3199_v16 = vsel %vm2799_vm9, %v8408_v22, %v3194_v40  ;;  %v1672_v22 = vld [vmem:[%s9140_s3 + $0x30] sm:$0xff]  ;;  %v1675_v2 = vld [vmem:[%s9140_s3 + $0x48] sm:$0xff] }
 0x339   :  { %v4810_v25 = vunpack.i.h.bf16 %v8441_v20  ;;  %v4795_v31 = vunpack.i.h.bf16 %v4793_v59  ;;  %v4794_v50 = vunpack.i.l.bf16 %v4793_v59  ;;  %v9879_v47 = vpack.i.bf16 %v8429_v36, %v8405_v37  ;;  %v1673_v37 = vld [vmem:[%s9140_s3 + $0x38] sm:$0xff] }
 0x33a   :  { %vm9880_vm4 = vcmask 130112   ;;  %v4809_v38 = vunpack.i.l.bf16 %v8441_v20  ;;  %v3267_v58 = vrot.slane %v4775_v60, %v9680_v29  ;;  %v8599_v19 = vsel %vm9329_vm6, %v8314_v62, %v4003_v57  ;;  %4472 = vmatprep.subr.bf16.mxu1 %v4471_v42  ;;  %v4803_v57 = vpop.permute.xlu1 %4802  ;;  %v8614_v40 = vpop.permute.xlu0 %4857 }
 0x33b   :  { %5112 = vperm.xlu1 %4510, %v9879_v47   ;;  %v3297_v63 = vsel %vm9880_vm4, %v3296_v10, %v3292_v1  ;;  %v3208_v36 = vrot.slane %v4745_v6, %v9730_v7  ;;  %vm9881_vm1 = vcmask 720512   ;;  %v3306_v20 = vrot.slane %v4795_v31, %v9695_v27  ;;  %4474 = vmatpush3.bf16.msra.mxu1 %v4471_v42 }
 0x33c   :  { %v3263_v14 = vsel %vm9881_vm1, %v3262_v35, %v3258_v12  ;;  %v3301_v52 = vrot.slane %v4794_v50, %v9696_v32  ;;  %v3204_v62 = vsel %vm2806_vm14, %v3203_v51, %v3199_v16  ;;  %v3316_v3 = vrot.slane %v4800_v11, %v9736_v30  ;;  %v1674_v11 = vld [vmem:[%s9140_s3 + $0x40] sm:$0xff] }
 0x33d   :  { %v3311_v43 = vrot.slane %v4799_v34, %v9737_v41  ;;  %v4475_v10 = vpack.c.bf16 %v1673_v37, %v1672_v22  ;;  %v3336_v1 = vrot.slane %v4810_v25, %v9666_v61  ;;  %v4805_v6 = vunpack.i.h.bf16 %v4803_v57 }
 0x33e   :  { %v3302_v60 = vsel %vm2722_vm15, %v3301_v52, %v3297_v63  ;;  %v4804_v35 = vunpack.i.l.bf16 %v4803_v57  ;;  %v9882_v54 = vpack.i.bf16 %v8457_v26, %v8444_v18  ;;  %v3331_v51 = vrot.slane %v4809_v38, %v9662_v55  ;;  %v4813_v63 = vpop.permute.xlu1 %4812  ;;  %v8638_v38 = vpop.permute.xlu0 %4867 }
 0x33f   :  { %v3268_v34 = vsel %vm2785_vm7, %v3267_v58, %v3263_v14  ;;  %v3307_v12 = vsel %vm2729_vm5, %v3306_v20, %v3302_v60  ;;  %vm4006_vm13 = vcmask 1044484   ;;  %4476 = vmatprep.subr.bf16.mxu1 %v4475_v10  ;;  %v4479_v59 = vpack.c.bf16 %v1675_v2, %v1674_v11  ;;  %v1677_v20 = vld [vmem:[%s9140_s3 + $0x58] sm:$0xff] }
 0x340   :  { %5122 = vperm.xlu1 %4510, %v9882_v54   ;;  %v4784_v26 = vunpack.i.l.bf16 %v8547_v49  ;;  %v3312_v18 = vsel %vm2736_vm11, %v3311_v43, %v3307_v12  ;;  %v3326_v42 = vrot.slane %v4805_v6, %v9644_v45  ;;  %v3321_v16 = vrot.slane %v4804_v35, %v6905_v39  ;;  %4478 = vmatpush3.bf16.msra.mxu1 %v4475_v10 }
 0x341   :  { %v4820_v25 = vunpack.i.h.bf16 %v8475_v17  ;;  %v4819_v31 = vunpack.i.l.bf16 %v8475_v17  ;;  %v4830_v50 = vunpack.i.h.bf16 %v8515_v15  ;;  %v3317_v47 = vsel %vm2743_vm2, %v3316_v3, %v3312_v18  ;;  %4480 = vmatprep.subr.bf16.mxu1 %v4479_v59  ;;  %v1676_v17 = vld [vmem:[%s9140_s3 + $0x50] sm:$0xff]  ;;  %v1681_v18 = vld [vmem:[%s9140_s3 + $0x78] sm:$0xff] }
 0x342   :  { %vm4008_vm4 = vcmask 1045509   ;;  %v3273_v58 = vsel %vm2792_vm12, %v8558_v53, %v3268_v34  ;;  %vm9883_vm1 = vcmask 458112   ;;  %v4815_v37 = vunpack.i.h.bf16 %v4813_v63  ;;  %v4823_v6 = vpop.permute.xlu1 %4822 }
 0x343   :  { %v3322_v22 = vsel %vm9883_vm1, %v3321_v16, %v3317_v47  ;;  %v4814_v14 = vunpack.i.l.bf16 %v4813_v63  ;;  %v4829_v52 = vunpack.i.l.bf16 %v8515_v15  ;;  %v4785_v53 = vunpack.i.h.bf16 %v8547_v49  ;;  %v8661_v15 = vpop.permute.xlu0 %4877 }
 0x344   :  { %5132 = vperm.xlu1 %4510, %v5131_v13   ;;  %vm9884_vm6 = vcmask 523712   ;;  %v4483_v43 = vpack.c.bf16 %v1677_v20, %v1676_v17  ;;  %v3282_v57 = vrot.slane %v4784_v26, %v9721_v0  ;;  %v3346_v46 = vrot.slane %v4815_v37, %v9680_v29  ;;  %4482 = vmatpush3.bf16.msra.mxu1 %v4479_v59  ;;  %v1680_v26 = vld [vmem:[%s9140_s3 + $0x70] sm:$0xff] }
 0x345   :  { %v3327_v3 = vsel %vm9884_vm6, %v3326_v42, %v3322_v22  ;;  %v3341_v13 = vrot.slane %v4814_v14, %v9866_v44  ;;  %v3356_v10 = vrot.slane %v4820_v25, %v9698_v21  ;;  %v3209_v49 = vsel %vm2813_vm0, %v3208_v36, %v3204_v62  ;;  %v1679_v36 = vld [vmem:[%s9140_s3 + $0x68] sm:$0xff]  ;;  %v9886_v22 = vld [vmem:[#allocation28_spill] sm:$0xff] }
 0x346   :  { %v3332_v5 = vsel %vm2764_vm8, %v3331_v51, %v3327_v3  ;;  %v3278_v35 = vsel %vm2799_vm9, %v8544_v56, %v3273_v58  ;;  %4484 = vmatprep.subr.bf16.mxu1 %v4483_v43  ;;  %v3351_v54 = vrot.slane %v4819_v31, %v9697_v9  ;;  %vm9885_vm6 = vcmask 720512   ;;  %v4833_v25 = vpop.permute.xlu1 %4832 }
 0x347   :  { %v3337_v60 = vsel %vm2771_vm3, %v3336_v1, %v3332_v5  ;;  %v4825_v2 = vunpack.i.h.bf16 %v4823_v6  ;;  %v4824_v51 = vunpack.i.l.bf16 %v4823_v6  ;;  %v1678_v1 = vld [vmem:[%s9140_s3 + $0x60] sm:$0xff]  ;;  %v3375_v56 = vrot.slane %v4830_v50, %v9715_v24  ;;  %v8692_v31 = vpop.permute.xlu0 %4887  ;;  %s5203_s3 = smov [#allocation2]  }
 0x348   :  { %v3342_v11 = vsel %vm9885_vm6, %v3341_v13, %v3337_v60  ;;  %5142 = vperm.xlu1 %4510, %v5141_v28   ;;  %v3287_v62 = vrot.slane %v4785_v53, %v9730_v7  ;;  %v4487_v12 = vpack.c.bf16 %v1679_v36, %v1678_v1  ;;  %v3371_v59 = vrot.slane %v4829_v52, %v9716_v33  ;;  %s4106_s6 = sshll.u32 %s5203_s3, 4  ;;  %s4107_s6 = int_to_ptr.vmem [resolvable:$true] %s4106_s6 }
 0x349   :  { %v3347_v34 = vsel %vm2785_vm7, %v3346_v46, %v3342_v11  ;;  %v3361_v48 = vrot.slane %v4824_v51, %v9721_v0  ;;  %v3283_v4 = vsel %vm2806_vm14, %v3282_v57, %v3278_v35  ;;  %4486 = vmatpush3.bf16.msra.mxu1 %v4483_v43  ;;  %v4839_v42 = vunpack.i.l.bf16 %v8549_v23  ;;  %s5150_s7 = scalar_lea.vmem %s4107_s6, 32  ;;  %p5155_p1 = scmp.lt.s32.totalorder %s4107_s6, %s4107_s6 }
 0x34a   :  { %v3352_v28 = vsel %vm2792_vm12, %v3351_v54, %v3347_v34  ;;  %v3366_v16 = vrot.slane %v4825_v2, %v9730_v7  ;;  %4488 = vmatprep.subr.bf16.mxu1 %v4487_v12  ;;  %v4491_v47 = vpack.c.bf16 %v1681_v18, %v1680_v26  ;;  %v4835_v63 = vunpack.i.h.bf16 %v4833_v25  ;;  %p5151_p0 = scmp.ne.s32.totalorder %s4107_s6, %s5150_s7  ;;  %p5156_p2 = scmp.lt.s32.totalorder %s5150_s7, %s5150_s7 }
 0x34b   :  { %v3357_v50 = vsel %vm2799_vm9, %v3356_v10, %v3352_v28  ;;  %v4834_v58 = vunpack.i.l.bf16 %v4833_v25  ;;  %v4007_v37 = vsel %vm4006_vm13, %v9886_v22, %v8599_v19  ;;  %v4840_v14 = vunpack.i.h.bf16 %v8549_v23  ;;  %v4843_v23 = vpop.permute.xlu1 %4842  ;;  %v8707_v5 = vpop.permute.xlu0 %4897 }
 0x34c   :  { %v3288_v17 = vsel %vm2813_vm0, %v3287_v62, %v3283_v4  ;;  %v3362_v20 = vsel %vm2806_vm14, %v3361_v48, %v3357_v50  ;;  %vm9332_vm1 = vcmask 1046534   ;;  %v3385_v52 = vrot.slane %v4835_v63, %v9695_v27  ;;  %p5157_p3 = por %p5156_p2, %p5155_p1 }
 0x34d   :  { %v3380_v53 = vrot.slane %v4834_v58, %v9696_v32  ;;  %v4009_v3 = vsel %vm4008_vm4, %v3209_v49, %v4007_v37  ;;  %vm9331_vm6 = vcmask 1047559   ;;  %4490 = vmatpush3.bf16.msra.mxu1 %v4487_v12  ;;  %vm9887_vm10 = vcmask 130112  }
 0x34e   :  { %v3376_v43 = vsel %vm9887_vm10, %v3375_v56, %v3371_v59  ;;  %v3390_v57 = vrot.slane %v4839_v42, %v9737_v41  ;;  %v4849_v19 = vunpack.i.l.bf16 %v8586_v8  ;;  %v3367_v46 = vsel %vm2813_vm0, %v3366_v16, %v3362_v20  ;;  %4492 = vmatprep.subr.bf16.mxu1 %v4491_v47  ;;  %p5158_p4 = pnand %p5157_p3, %p5151_p0 }
 0x34f   :  { %v3381_v13 = vsel %vm2722_vm15, %v3380_v53, %v3376_v43  ;;  %v4845_v10 = vunpack.i.h.bf16 %v4843_v23  ;;  %v4844_v60 = vunpack.i.l.bf16 %v4843_v23  ;;  %v4011_v6 = vsel %vm9332_vm1, %v3288_v17, %v4009_v3  ;;  %v4853_v62 = vpop.permute.xlu1 %4852  ;;  %v8721_v34 = vpop.permute.xlu0 %4907 }
 0x350   :  { %v3395_v49 = vrot.slane %v4840_v14, %v9736_v30  ;;  %v4850_v35 = vunpack.i.h.bf16 %v8586_v8  ;;  %v3386_v54 = vsel %vm2729_vm5, %v3385_v52, %v3381_v13  ;;  %v4013_v11 = vsel %vm9331_vm6, %v3367_v46, %v4011_v6 }
 0x351   :  { %v3391_v2 = vsel %vm2736_vm11, %v3390_v57, %v3386_v54  ;;  %v3405_v51 = vrot.slane %v4845_v10, %v9644_v45  ;;  %v3400_v1 = vrot.slane %v4844_v60, %v6905_v39  ;;  %4454 = vmatprep.mubr.f32.mxu1 %v4013_v11  ;;  %v3410_v36 = vrot.slane %v4849_v19, %v9662_v55 }
 0x352   :  { %v3396_v56 = vsel %vm2743_vm2, %v3395_v49, %v3391_v2  ;;  %4494 = vmatpush3.bf16.msra.mxu1 %v4491_v47  ;;  %v4859_v8 = vunpack.i.l.bf16 %v8614_v40  ;;  %vm9888_vm10 = vcmask 458112   ;;  %v4855_v59 = vunpack.i.h.bf16 %v4853_v62 }
 0x353   :  { %v3401_v12 = vsel %vm9888_vm10, %v3400_v1, %v3396_v56  ;;  %v4854_v48 = vunpack.i.l.bf16 %v4853_v62  ;;  %v3415_v4 = vrot.slane %v4850_v35, %v9666_v61  ;;  %v4860_v28 = vunpack.i.h.bf16 %v8614_v40  ;;  %v4863_v63 = vpop.permute.xlu1 %4862  ;;  %v8734_v58 = vpop.permute.xlu0 %4917 }
 0x354   :  { %vm9889_vm6 = vcmask 523712   ;;  %v3425_v42 = vrot.slane %v4855_v59, %v9680_v29  ;;  %v4870_v25 = vunpack.i.h.bf16 %v8638_v38  ;;  %v4869_v50 = vunpack.i.l.bf16 %v8638_v38 }
 0x355   :  { %v3406_v26 = vsel %vm9889_vm6, %v3405_v51, %v3401_v12  ;;  %v3420_v16 = vrot.slane %v4854_v48, %v9866_v44  ;;  %v3430_v22 = vrot.slane %v4859_v8, %v9697_v9  ;;  %vm9890_vm10 = vcmask 720512  }
 0x356   :  { %v3411_v18 = vsel %vm2764_vm8, %v3410_v36, %v3406_v26  ;;  %v4865_v37 = vunpack.i.h.bf16 %v4863_v63  ;;  %v4864_v14 = vunpack.i.l.bf16 %v4863_v63  ;;  %v3435_v17 = vrot.slane %v4860_v28, %v9698_v21 }
 0x357   :  { %v3416_v47 = vsel %vm2771_vm3, %v3415_v4, %v3411_v18  ;;  %v3454_v3 = vrot.slane %v4870_v25, %v9715_v24  ;;  %v3450_v43 = vrot.slane %v4869_v50, %v9716_v33  ;;  %v4873_v19 = vpop.permute.xlu1 %4872  ;;  %v8746_v23 = vpop.permute.xlu0 %4927  ;;  %v4879_v46 = vunpack.i.l.bf16 %v8661_v15 }
 0x358   :  { %v3421_v40 = vsel %vm9890_vm10, %v3420_v16, %v3416_v47  ;;  %v3445_v53 = vrot.slane %v4865_v37, %v9730_v7  ;;  %v3440_v38 = vrot.slane %v4864_v14, %v9721_v0  ;;  %v4875_v10 = vunpack.i.h.bf16 %v4873_v19 }
 0x359   :  { %v3426_v20 = vsel %vm2785_vm7, %v3425_v42, %v3421_v40  ;;  %v4874_v60 = vunpack.i.l.bf16 %v4873_v19  ;;  %v4880_v6 = vunpack.i.h.bf16 %v8661_v15  ;;  %vm9891_vm6 = vcmask 130112  }
 0x35a   :  { %v3431_v52 = vsel %vm2792_vm12, %v3430_v22, %v3426_v20  ;;  %v3464_v35 = vrot.slane %v4875_v10, %v9695_v27  ;;  %v3455_v11 = vsel %vm9891_vm6, %v3454_v3, %v3450_v43  ;;  %v4889_v2 = vunpack.i.l.bf16 %v8692_v31 }
 0x35b   :  { %v3436_v57 = vsel %vm2799_vm9, %v3435_v17, %v3431_v52  ;;  %v3459_v54 = vrot.slane %v4874_v60, %v9696_v32  ;;  %v4883_v51 = vpop.permute.xlu1 %4882  ;;  %v8756_v1 = vpop.permute.xlu0 %4937  ;;  %v3469_v36 = vrot.slane %v4879_v46, %v9737_v41  ;;  %v3474_v15 = vrot.slane %v4880_v6, %v9736_v30 }
 0x35c   :  { %v3441_v13 = vsel %vm2806_vm14, %v3440_v38, %v3436_v57  ;;  %v4885_v62 = vunpack.i.h.bf16 %v4883_v51  ;;  %v4884_v8 = vunpack.i.l.bf16 %v4883_v51  ;;  %v4890_v12 = vunpack.i.h.bf16 %v8692_v31 }
 0x35d   :  { %v3446_v49 = vsel %vm2813_vm0, %v3445_v53, %v3441_v13  ;;  %v3460_v56 = vsel %vm2722_vm15, %v3459_v54, %v3455_v11  ;;  %v3489_v26 = vrot.slane %v4889_v2, %v9662_v55  ;;  %v4899_v25 = vunpack.i.l.bf16 %v8707_v5 }
 0x35e   :  { %v3465_v59 = vsel %vm2729_vm5, %v3464_v35, %v3460_v56  ;;  %v3484_v4 = vrot.slane %v4885_v62, %v9644_v45  ;;  %v3479_v28 = vrot.slane %v4884_v8, %v6905_v39  ;;  %vm9892_vm10 = vcmask 458112  }
 0x35f   :  { %v3470_v48 = vsel %vm2736_vm11, %v3469_v36, %v3465_v59  ;;  %v4893_v42 = vpop.permute.xlu1 %4892  ;;  %v8768_v16 = vpop.permute.xlu0 %4947  ;;  %v3494_v63 = vrot.slane %v4890_v12, %v9666_v61  ;;  %v4900_v22 = vunpack.i.h.bf16 %v8707_v5  ;;  %vm9893_vm6 = vcmask 523712  }
 0x360   :  { %v3475_v18 = vsel %vm2743_vm2, %v3474_v15, %v3470_v48  ;;  %v4895_v31 = vunpack.i.h.bf16 %v4893_v42  ;;  %v4894_v47 = vunpack.i.l.bf16 %v4893_v42  ;;  %v4910_v20 = vunpack.i.h.bf16 %v8721_v34 }
 0x361   :  { %v3480_v50 = vsel %vm9892_vm10, %v3479_v28, %v3475_v18  ;;  %v4909_v52 = vunpack.i.l.bf16 %v8721_v34  ;;  %v3509_v43 = vrot.slane %v4899_v25, %v9697_v9  ;;  %vm9894_vm10 = vcmask 720512  }
 0x362   :  { %v3485_v40 = vsel %vm9893_vm6, %v3484_v4, %v3480_v50  ;;  %v3504_v14 = vrot.slane %v4895_v31, %v9680_v29  ;;  %v3499_v17 = vrot.slane %v4894_v47, %v9866_v44  ;;  %v3514_v46 = vrot.slane %v4900_v22, %v9698_v21 }
 0x363   :  { %v3490_v37 = vsel %vm2764_vm8, %v3489_v26, %v3485_v40  ;;  %v4903_v38 = vpop.permute.xlu1 %4902  ;;  %v8781_v3 = vpop.permute.xlu0 %4957  ;;  %v3533_v6 = vrot.slane %v4910_v20, %v9715_v24  ;;  %v3529_v35 = vrot.slane %v4909_v52, %v9716_v33  ;;  %v4919_v51 = vunpack.i.l.bf16 %v8734_v58 }
 0x364   :  { %v3495_v53 = vsel %vm2771_vm3, %v3494_v63, %v3490_v37  ;;  %v4905_v57 = vunpack.i.h.bf16 %v4903_v38  ;;  %v4904_v19 = vunpack.i.l.bf16 %v4903_v38  ;;  %v4920_v8 = vunpack.i.h.bf16 %v8734_v58 }
 0x365   :  { %v3500_v5 = vsel %vm9894_vm10, %v3499_v17, %v3495_v53  ;;  %vm9895_vm6 = vcmask 1041409   ;;  %vm9896_vm10 = vcmask 130112   ;;  %v4929_v28 = vunpack.i.l.bf16 %v8746_v23 }
 0x366   :  { %v3505_v13 = vsel %vm2785_vm7, %v3504_v14, %v3500_v5  ;;  %v3524_v60 = vrot.slane %v4905_v57, %v9730_v7  ;;  %v3519_v34 = vrot.slane %v4904_v19, %v9721_v0  ;;  %v3534_v4 = vsel %vm9896_vm10, %v3533_v6, %v3529_v35 }
 0x367   :  { %v3510_v10 = vsel %vm2792_vm12, %v3509_v43, %v3505_v13  ;;  %v4913_v11 = vpop.permute.xlu1 %4912  ;;  %v8793_v2 = vpop.permute.xlu0 %4967  ;;  %v3548_v42 = vrot.slane %v4919_v51, %v9737_v41  ;;  %v3553_v31 = vrot.slane %v4920_v8, %v9736_v30  ;;  %v3568_v37 = vrot.slane %v4929_v28, %v9662_v55 }
 0x368   :  { %v3515_v54 = vsel %vm2799_vm9, %v3514_v46, %v3510_v10  ;;  %v4915_v56 = vunpack.i.h.bf16 %v4913_v11  ;;  %v4914_v62 = vunpack.i.l.bf16 %v4913_v11  ;;  %v4939_v52 = vunpack.i.l.bf16 %v8756_v1 }
 0x369   :  { %v3520_v36 = vsel %vm2806_vm14, %v3519_v34, %v3515_v54  ;;  %v4940_v5 = vunpack.i.h.bf16 %v8756_v1  ;;  %vm9898_vm10 = vcmask 523712  }
 0x36a   :  { %v3525_v15 = vsel %vm2813_vm0, %v3524_v60, %v3520_v36  ;;  %v3543_v59 = vrot.slane %v4915_v56, %v9695_v27  ;;  %v3538_v48 = vrot.slane %v4914_v62, %v9696_v32  ;;  %v3588_v6 = vrot.slane %v4939_v52, %v9697_v9 }
 0x36b   :  { %v4014_v12 = vsel %vm9895_vm6, %v3525_v15, %v3446_v49  ;;  %v4923_v26 = vpop.permute.xlu1 %4922  ;;  %v8804_v18 = vpop.permute.xlu0 %4977  ;;  %v4930_v49 = vunpack.i.h.bf16 %v8746_v23  ;;  %vm9897_vm6 = vcmask 458112   ;;  %v3593_v1 = vrot.slane %v4940_v5, %v9698_v21 }
 0x36c   :  { %v3539_v25 = vsel %vm2722_vm15, %v3538_v48, %v3534_v4  ;;  %v4925_v58 = vunpack.i.h.bf16 %v4923_v26  ;;  %v4924_v50 = vunpack.i.l.bf16 %v4923_v26  ;;  %v4959_v5 = vunpack.i.l.bf16 %v8781_v3 }
 0x36d   :  { %v3544_v47 = vsel %vm2729_vm5, %v3543_v59, %v3539_v25  ;;  %v3573_v43 = vrot.slane %v4930_v49, %v9666_v61 }
 0x36e   :  { %v3549_v63 = vsel %vm2736_vm11, %v3548_v42, %v3544_v47  ;;  %v3563_v22 = vrot.slane %v4925_v58, %v9644_v45  ;;  %v3558_v40 = vrot.slane %v4924_v50, %v6905_v39 }
 0x36f   :  { %v3554_v14 = vsel %vm2743_vm2, %v3553_v31, %v3549_v63  ;;  %v4933_v17 = vpop.permute.xlu1 %4932  ;;  %v8816_v20 = vpop.permute.xlu0 %4987  ;;  %v4950_v63 = vunpack.i.h.bf16 %v8768_v16 }
 0x370   :  { %v3559_v53 = vsel %vm9897_vm6, %v3558_v40, %v3554_v14  ;;  %v4935_v23 = vunpack.i.h.bf16 %v4933_v17  ;;  %v4934_v38 = vunpack.i.l.bf16 %v4933_v17  ;;  %vm9899_vm6 = vcmask 720512  }
 0x371   :  { %v3564_v57 = vsel %vm9898_vm10, %v3563_v22, %v3559_v53  ;;  %vm9900_vm10 = vcmask 1042434   ;;  %v4970_v22 = vunpack.i.h.bf16 %v8793_v2  ;;  %v4969_v40 = vunpack.i.l.bf16 %v8793_v2 }
 0x372   :  { %v3569_v19 = vsel %vm2764_vm8, %v3568_v37, %v3564_v57  ;;  %v3583_v46 = vrot.slane %v4935_v23, %v9680_v29  ;;  %v3578_v13 = vrot.slane %v4934_v38, %v9866_v44  ;;  %v4980_v37 = vunpack.i.h.bf16 %v8804_v18 }
 0x373   :  { %v3574_v10 = vsel %vm2771_vm3, %v3573_v43, %v3569_v19  ;;  %v4943_v60 = vpop.permute.xlu1 %4942  ;;  %v8827_v34 = vpop.permute.xlu0 %4997  ;;  %v4979_v14 = vunpack.i.l.bf16 %v8804_v18  ;;  %v4990_v23 = vunpack.i.h.bf16 %v8816_v20  ;;  %v3612_v38 = vrot.slane %v4950_v63, %v9715_v24 }
 0x374   :  { %v3579_v35 = vsel %vm9899_vm6, %v3578_v13, %v3574_v10  ;;  %v4945_v54 = vunpack.i.h.bf16 %v4943_v60  ;;  %v4944_v11 = vunpack.i.l.bf16 %v4943_v60  ;;  %v3770_v2 = vrot.slane %v4970_v22, %v9715_v24 }
 0x375   :  { %v3584_v51 = vsel %vm2785_vm7, %v3583_v46, %v3579_v35  ;;  %v3766_v57 = vrot.slane %v4969_v40, %v9716_v33  ;;  %v3849_v19 = vrot.slane %v4980_v37, %v9715_v24  ;;  %v3845_v46 = vrot.slane %v4979_v14, %v9716_v33 }
 0x376   :  { %v3589_v36 = vsel %vm2792_vm12, %v3588_v6, %v3584_v51  ;;  %v3603_v56 = vrot.slane %v4945_v54, %v9730_v7  ;;  %v3598_v62 = vrot.slane %v4944_v11, %v9721_v0  ;;  %v4989_v13 = vunpack.i.l.bf16 %v8816_v20 }
 0x377   :  { %v3594_v8 = vsel %vm2799_vm9, %v3593_v1, %v3589_v36  ;;  %v4953_v15 = vpop.permute.xlu1 %4952  ;;  %v8837_v59 = vpop.permute.xlu0 %5007  ;;  %v3854_v35 = vrot.slane %v4990_v23, %v9696_v32  ;;  %vm9901_vm6 = vcmask 130112   ;;  %v3627_v51 = vrot.slane %v4959_v5, %v9737_v41 }
 0x378   :  { %v3599_v48 = vsel %vm2806_vm14, %v3598_v62, %v3594_v8  ;;  %v4954_v17 = vunpack.i.l.bf16 %v4953_v15  ;;  %v4955_v18 = vunpack.i.h.bf16 %v4953_v15  ;;  %v4999_v20 = vunpack.i.l.bf16 %v8827_v34  ;;  %vm9903_vm1 = vmmov %vm9901_vm6 }
 0x379   :  { %v3604_v4 = vsel %vm2813_vm0, %v3603_v56, %v3599_v48  ;;  %v3850_v8 = vsel %vm9903_vm1, %v3849_v19, %v3845_v46  ;;  %v3780_v15 = vrot.slane %v4989_v13, %v9695_v27  ;;  %v5010_v14 = vunpack.i.h.bf16 %v8837_v59 }
 0x37a   :  { %v8842_v28 = vsel %vm9900_vm10, %v3604_v4, %v4014_v12  ;;  %v4949_v12 = vunpack.i.l.bf16 %v8768_v16  ;;  %v4960_v16 = vunpack.i.h.bf16 %v8781_v3  ;;  %v3617_v10 = vrot.slane %v4954_v17, %v9696_v32  ;;  %vm9902_vm10 = vmmov %vm9901_vm6 }
 0x37b   :  { %v4963_v26 = vpop.permute.xlu1 %4962  ;;  %v8844_v42 = vpop.permute.xlu0 %5017  ;;  %v5000_v3 = vunpack.i.h.bf16 %v8827_v34  ;;  %v3771_v36 = vsel %vm9902_vm10, %v3770_v2, %v3766_v57  ;;  %v3622_v56 = vrot.slane %v4955_v18, %v9695_v27  ;;  %v5009_v17 = vunpack.i.l.bf16 %v8837_v59 }
 0x37c   :  { %v3608_v43 = vrot.slane %v4949_v12, %v9716_v33  ;;  %v4964_v54 = vunpack.i.l.bf16 %v4963_v26  ;;  %v3687_v1 = vrot.slane %v4960_v16, %v9716_v33  ;;  %v4965_v4 = vunpack.i.h.bf16 %v4963_v26 }
 0x37d   :  { %v8898_v12 = vsel %vm2722_vm15, %v3854_v35, %v3850_v8  ;;  %v3711_v22 = vrot.slane %v5000_v3, %v9736_v30  ;;  %v5020_v23 = vunpack.i.h.bf16 %v8844_v42  ;;  %v5019_v2 = vunpack.i.l.bf16 %v8844_v42 }
 0x37e   :  { %v3613_v11 = vsel %vm9901_vm6, %v3612_v38, %v3608_v43  ;;  %v3691_v34 = vrot.slane %v4964_v54, %v9715_v24  ;;  %v3637_v38 = vrot.slane %v4999_v20, %v6905_v39  ;;  %v3933_v35 = vrot.slane %v5009_v17, %v9696_v32  ;;  %vm9904_vm6 = vmmov %vm9903_vm1 }
 0x37f   :  { %v8846_v25 = vpop.permute.xlu1 %4972  ;;  %v8848_v58 = vpop.permute.xlu0 %5027  ;;  %v3618_v48 = vsel %vm2722_vm15, %v3617_v10, %v3613_v11  ;;  %v3938_v42 = vrot.slane %v5020_v23, %v9695_v27  ;;  %vm9905_vm10 = vcmask 458112  }
 0x380   :  { %v4975_v62 = vunpack.i.h.bf16 %v8846_v25  ;;  %v4974_v40 = vunpack.i.l.bf16 %v8846_v25  ;;  %v3623_v43 = vsel %vm2729_vm5, %v3622_v56, %v3618_v48  ;;  %v3696_v25 = vrot.slane %v4965_v4, %v9696_v32 }
 0x381   :  { %v3692_v19 = vsel %vm9903_vm1, %v3691_v34, %v3687_v1  ;;  %v5030_v13 = vunpack.i.h.bf16 %v8848_v58  ;;  %v5029_v10 = vunpack.i.l.bf16 %v8848_v58  ;;  %v3628_v11 = vsel %vm2736_vm11, %v3627_v51, %v3623_v43 }
 0x382   :  { %v3775_v16 = vrot.slane %v4975_v62, %v9696_v32  ;;  %v3701_v46 = vrot.slane %v4974_v40, %v9695_v27  ;;  %v3697_v58 = vsel %vm2722_vm15, %v3696_v25, %v3692_v19  ;;  %v3864_v56 = vrot.slane %v5019_v2, %v9737_v41 }
 0x383   :  { %v8850_v50 = vpop.permute.xlu1 %4982  ;;  %v8852_v31 = vpop.permute.xlu0 %5037  ;;  %v3869_v48 = vrot.slane %v5030_v13, %v9736_v30  ;;  %v3795_v51 = vrot.slane %v5029_v10, %v6905_v39  ;;  %vm9906_vm1 = vcmask 523712  }
 0x384   :  { %v4984_v26 = vunpack.i.l.bf16 %v8850_v50  ;;  %v4985_v5 = vunpack.i.h.bf16 %v8850_v50  ;;  %v3642_v50 = vrot.slane %v5010_v14, %v9644_v45  ;;  %v5040_v4 = vunpack.i.h.bf16 %v8852_v31 }
 0x385   :  { %v5039_v40 = vunpack.i.l.bf16 %v8852_v31 }
 0x386   :  { %v3632_v3 = vrot.slane %v4984_v26, %v9736_v30  ;;  %v3706_v54 = vrot.slane %v4985_v5, %v9737_v41 }
 0x387   :  { %v8854_v49 = vpop.permute.xlu1 %4992  ;;  %v8856_v47 = vpop.permute.xlu0 %5047 }
 0x388   :  { %v4995_v57 = vunpack.i.h.bf16 %v8854_v49  ;;  %v4994_v59 = vunpack.i.l.bf16 %v8854_v49  ;;  %v3776_v49 = vsel %vm2722_vm15, %v3775_v16, %v3771_v36  ;;  %v3702_v36 = vsel %vm2729_vm5, %v3701_v46, %v3697_v58 }
 0x389   :  { %v3633_v34 = vsel %vm2743_vm2, %v3632_v3, %v3628_v11  ;;  %v5050_v16 = vunpack.i.h.bf16 %v8856_v47 }
 0x38a   :  { %v3928_v32 = vrot.slane %v4995_v57, %v9715_v24  ;;  %v3924_v62 = vrot.slane %v4994_v59, %v9716_v33  ;;  %v3781_v24 = vsel %vm2729_vm5, %v3780_v15, %v3776_v49  ;;  %v3707_v33 = vsel %vm2736_vm11, %v3706_v54, %v3702_v36 }
 0x38b   :  { %v8864_v52 = vpop.permute.xlu1 %5002  ;;  %v8866_v53 = vpop.permute.xlu0 %5057  ;;  %v5049_v15 = vunpack.i.l.bf16 %v8856_v47  ;;  %v3726_v59 = vrot.slane %v5039_v40, %v9662_v55  ;;  %v3731_v10 = vrot.slane %v5050_v16, %v9666_v61 }
 0x38c   :  { %v5005_v1 = vunpack.i.h.bf16 %v8864_v52  ;;  %v5004_v14 = vunpack.i.l.bf16 %v8864_v52  ;;  %v3929_v43 = vsel %vm9904_vm6, %v3928_v32, %v3924_v62  ;;  %v3638_v52 = vsel %vm9905_vm10, %v3637_v38, %v3633_v34  ;;  %vm9908_vm6 = vmmov %vm9906_vm1 }
 0x38d   :  { %v3934_v46 = vsel %vm2722_vm15, %v3933_v35, %v3929_v43  ;;  %v3643_v49 = vsel %vm9906_vm1, %v3642_v50, %v3638_v52  ;;  %vm9907_vm15 = vmmov %vm9905_vm10 }
 0x38e   :  { %v3859_v17 = vrot.slane %v5005_v1, %v9695_v27  ;;  %v5060_v27 = vunpack.i.h.bf16 %v8866_v53  ;;  %v3785_v19 = vrot.slane %v5004_v14, %v9737_v41  ;;  %v3939_v50 = vsel %vm2729_vm5, %v3938_v42, %v3934_v46 }
 0x38f   :  { %v8879_v60 = vpop.permute.xlu1 %5012  ;;  %v8881_v6 = vpop.permute.xlu0 %5067 }
 0x390   :  { %v5015_v23 = vunpack.i.h.bf16 %v8879_v60  ;;  %v5014_v26 = vunpack.i.l.bf16 %v8879_v60  ;;  %v3800_v60 = vrot.slane %v5040_v4, %v9644_v45  ;;  %v3860_v38 = vsel %vm2729_vm5, %v3859_v17, %v8898_v12  ;;  %vm9909_vm5 = vmmov %vm9905_vm10 }
 0x391   :  { %v3662_v35 = vrot.slane %v5060_v27, %v9680_v29  ;;  %v5059_v12 = vunpack.i.l.bf16 %v8866_v53  ;;  %v3786_v58 = vsel %vm2736_vm11, %v3785_v19, %v3781_v24  ;;  %v3865_v32 = vsel %vm2736_vm11, %v3864_v56, %v3860_v38 }
 0x392   :  { %v3790_v47 = vrot.slane %v5015_v23, %v9736_v30  ;;  %v3716_v13 = vrot.slane %v5014_v26, %v6905_v39  ;;  %v5070_v62 = vunpack.i.h.bf16 %v8881_v6  ;;  %v5069_v34 = vunpack.i.l.bf16 %v8881_v6 }
 0x393   :  { %v8895_v63 = vpop.permute.xlu1 %5022  ;;  %v8903_v37 = vpop.permute.xlu0 %5077  ;;  %vm9910_vm10 = vcmask 720512  }
 0x394   :  { %v5025_v5 = vunpack.i.h.bf16 %v8895_v63  ;;  %v5024_v31 = vunpack.i.l.bf16 %v8895_v63  ;;  %v3712_v63 = vsel %vm2743_vm2, %v3711_v22, %v3707_v33  ;;  %v3657_v22 = vrot.slane %v5049_v15, %v9866_v44 }
 0x395   :  { %v3717_v36 = vsel %vm9907_vm15, %v3716_v13, %v3712_v63  ;;  %v3791_v4 = vsel %vm2743_vm2, %v3790_v47, %v3786_v58  ;;  %v5080_v42 = vunpack.i.h.bf16 %v8903_v37  ;;  %v5079_v23 = vunpack.i.l.bf16 %v8903_v37  ;;  %vm9911_vm15 = vmmov %vm9909_vm5 }
 0x396   :  { %v3721_v3 = vrot.slane %v5025_v5, %v9644_v45  ;;  %v3647_v54 = vrot.slane %v5024_v31, %v9662_v55  ;;  %v3796_v43 = vsel %vm9909_vm5, %v3795_v51, %v3791_v4  ;;  %v3870_v5 = vsel %vm2743_vm2, %v3869_v48, %v3865_v32 }
 0x397   :  { %v8917_v18 = vpop.permute.xlu1 %5032  ;;  %v8931_v20 = vpop.permute.xlu0 %5087  ;;  %v3958_v31 = vrot.slane %v5070_v62, %v9644_v45  ;;  %v3884_v15 = vrot.slane %v5069_v34, %v9662_v55  ;;  %v3889_v63 = vrot.slane %v5080_v42, %v9666_v61  ;;  %v9014_v48 = vrot.slane %v5079_v23, %v9866_v44 }
 0x398   :  { %v5035_v2 = vunpack.i.h.bf16 %v8917_v18  ;;  %v5034_v40 = vunpack.i.l.bf16 %v8917_v18  ;;  %v3648_v53 = vsel %vm2764_vm8, %v3647_v54, %v3643_v49  ;;  %v3722_v24 = vsel %vm9908_vm6, %v3721_v3, %v3717_v36  ;;  %vm9912_vm6 = vmmov %vm9906_vm1 }
 0x399   :  { %v3953_v18 = vrot.slane %v5059_v12, %v6905_v39  ;;  %v5090_v16 = vunpack.i.h.bf16 %v8931_v20  ;;  %v5089_v37 = vunpack.i.l.bf16 %v8931_v20 }
 0x39a   :  { %v3652_v1 = vrot.slane %v5035_v2, %v9666_v61  ;;  %v3943_v52 = vrot.slane %v5034_v40, %v9737_v41  ;;  %v3801_v41 = vsel %vm9906_vm1, %v3800_v60, %v3796_v43 }
 0x39b   :  { %v8937_v8 = vpop.permute.xlu1 %5042  ;;  %v8961_v57 = vpop.permute.xlu0 %5097  ;;  %v9019_v20 = vrot.slane %v5090_v16, %v9680_v29  ;;  %v3746_v13 = vrot.slane %v5089_v37, %v9697_v9 }
 0x39c   :  { %v5045_v56 = vunpack.i.h.bf16 %v8937_v8  ;;  %v5044_v33 = vunpack.i.l.bf16 %v8937_v8  ;;  %v3653_v26 = vsel %vm2771_vm3, %v3652_v1, %v3648_v53  ;;  %v3727_v8 = vsel %vm2764_vm8, %v3726_v59, %v3722_v24 }
 0x39d   :  { %v3658_v27 = vsel %vm9910_vm10, %v3657_v22, %v3653_v26  ;;  %v5100_v38 = vunpack.i.h.bf16 %v8961_v57  ;;  %v3944_v47 = vsel %vm2736_vm11, %v3943_v52, %v3939_v50  ;;  %vm9913_vm11 = vmmov %vm9909_vm5 }
 0x39e   :  { %v3948_v2 = vrot.slane %v5045_v56, %v9736_v30  ;;  %v3874_v51 = vrot.slane %v5044_v33, %v6905_v39  ;;  %v5099_v30 = vunpack.i.l.bf16 %v8961_v57  ;;  %v3732_v39 = vsel %vm2771_vm3, %v3731_v10, %v3727_v8  ;;  %vm9915_vm5 = vmmov %vm9910_vm10 }
 0x39f   :  { %v8955_v25 = vpop.permute.xlu1 %5052  ;;  %v8990_v14 = vpop.permute.xlu0 %5107  ;;  %v9034_v32 = vrot.slane %v5100_v38, %v9698_v21  ;;  %vm9916_vm10 = vmmov %vm9915_vm5 }
 0x3a0   :  { %v5055_v6 = vunpack.i.h.bf16 %v8955_v25  ;;  %v5054_v3 = vunpack.i.l.bf16 %v8955_v25  ;;  %v3875_v60 = vsel %vm9911_vm15, %v3874_v51, %v3870_v5  ;;  %v3949_v49 = vsel %vm2743_vm2, %v3948_v2, %v3944_v47  ;;  %vm9914_vm2 = vmmov %vm9906_vm1 }
 0x3a1   :  { %v3677_v25 = vrot.slane %v5099_v30, %v9721_v0  ;;  %v3954_v50 = vsel %vm9913_vm11, %v3953_v18, %v3949_v49  ;;  %v5109_v4 = vunpack.i.l.bf16 %v8990_v14  ;;  %vm9918_vm1 = vmmov %vm9915_vm5 }
 0x3a2   :  { %v3879_v59 = vrot.slane %v5055_v6, %v9644_v45  ;;  %v3663_v45 = vsel %vm2785_vm7, %v3662_v35, %v3658_v27  ;;  %v5110_v35 = vunpack.i.h.bf16 %v8990_v14  ;;  %v3805_v36 = vrot.slane %v5054_v3, %v9662_v55 }
 0x3a3   :  { %v3959_v14 = vsel %vm9914_vm2, %v3958_v31, %v3954_v50  ;;  %v3973_v5 = vrot.slane %v5109_v4, %v9866_v44 }
 0x3a4   :  { %v8976_v11 = vpop.permute.xlu1 %5062  ;;  %v5118_v46 = vpop.permute.xlu0 %5117  ;;  %v3880_v57 = vsel %vm9912_vm6, %v3879_v59, %v3875_v60  ;;  %v3682_v6 = vrot.slane %v5110_v35, %v9730_v7  ;;  %v3806_v16 = vsel %vm2764_vm8, %v3805_v36, %v3801_v41 }
 0x3a5   :  { %v5064_v54 = vunpack.i.l.bf16 %v8976_v11  ;;  %v5065_v10 = vunpack.i.h.bf16 %v8976_v11  ;;  %v3885_v11 = vsel %vm2764_vm8, %v3884_v15, %v3880_v57  ;;  %v5120_v24 = vunpack.i.h.bf16 %v5118_v46 }
 0x3a6   :  { %v5119_v8 = vunpack.i.l.bf16 %v5118_v46  ;;  %v3890_v2 = vsel %vm2771_vm3, %v3889_v63, %v3885_v11 }
 0x3a7   :  { %v3736_v53 = vrot.slane %v5064_v54, %v9866_v44  ;;  %v3978_v15 = vrot.slane %v5120_v24, %v9680_v29 }
 0x3a8   :  { %v5073_v17 = vpop.permute.xlu1 %5072  ;;  %v5128_v34 = vpop.permute.xlu0 %5127 }
 0x3a9   :  { %v5074_v22 = vunpack.i.l.bf16 %v5073_v17  ;;  %v5075_v1 = vunpack.i.h.bf16 %v5073_v17  ;;  %v3810_v17 = vrot.slane %v5065_v10, %v9666_v61  ;;  %v3737_v37 = vsel %vm9915_vm5, %v3736_v53, %v3732_v39 }
 0x3aa   :  { %v3904_v39 = vrot.slane %v5119_v8, %v9697_v9  ;;  %v5130_v47 = vunpack.i.h.bf16 %v5128_v34  ;;  %v5129_v49 = vunpack.i.l.bf16 %v5128_v34 }
 0x3ab   :  { %v3667_v56 = vrot.slane %v5074_v22, %v9697_v9  ;;  %v3741_v42 = vrot.slane %v5075_v1, %v9680_v29  ;;  %v3811_v31 = vsel %vm2771_vm3, %v3810_v17, %v3806_v16 }
 0x3ac   :  { %v5083_v19 = vpop.permute.xlu1 %5082  ;;  %v3909_v50 = vrot.slane %v5129_v49, %v9698_v21 }
 0x3ad   :  { %v5085_v58 = vunpack.i.h.bf16 %v5083_v19  ;;  %v5084_v62 = vunpack.i.l.bf16 %v5083_v19  ;;  %v3668_v27 = vsel %vm2792_vm12, %v3667_v56, %v3663_v45  ;;  %v5138_v59 = vpop.permute.xlu0 %5137  ;;  %v3816_v45 = vsel %vm9916_vm10, %v9014_v48, %v3811_v31 }
 0x3ae   :  { %v5140_v54 = vunpack.i.h.bf16 %v5138_v59  ;;  %v3983_v48 = vrot.slane %v5130_v47, %v9697_v9  ;;  %v5139_v56 = vunpack.i.l.bf16 %v5138_v59 }
 0x3af   :  { %v3672_v23 = vrot.slane %v5085_v58, %v9698_v21  ;;  %v3963_v18 = vrot.slane %v5084_v62, %v9662_v55  ;;  %v3742_v55 = vsel %vm2785_vm7, %v3741_v42, %v3737_v37 }
 0x3b0   :  { %v3747_v60 = vsel %vm2792_vm12, %v3746_v13, %v3742_v55  ;;  %v3821_v13 = vsel %vm2785_vm7, %v9019_v20, %v3816_v45  ;;  %v3919_v24 = vrot.slane %v5140_v54, %v9730_v7 }
 0x3b1   :  { %v5093_v12 = vpop.permute.xlu1 %5092  ;;  %v3673_v19 = vsel %vm2799_vm9, %v3672_v23, %v3668_v27  ;;  %v3752_v4 = vsel %vm2799_vm9, %v9034_v32, %v3747_v60 }
 0x3b2   :  { %v5095_v40 = vunpack.i.h.bf16 %v5093_v12  ;;  %v5094_v26 = vunpack.i.l.bf16 %v5093_v12  ;;  %v3678_v22 = vsel %vm2806_vm14, %v3677_v25, %v3673_v19 }
 0x3b3   :  { %v3683_v36 = vsel %vm2813_vm0, %v3682_v6, %v3678_v22 }
 0x3b4   :  { %v3968_v52 = vrot.slane %v5095_v40, %v9666_v61  ;;  %v3894_v41 = vrot.slane %v5094_v26, %v9866_v44  ;;  %v3964_v61 = vsel %vm2764_vm8, %v3963_v18, %v3959_v14  ;;  %vm9917_vm8 = vmmov %vm9915_vm5 }
 0x3b6   :  { %v5103_v33 = vpop.permute.xlu1 %5102  ;;  %v3969_v63 = vsel %vm2771_vm3, %v3968_v52, %v3964_v61  ;;  %vm9919_vm3 = vcmask 1043459  }
 0x3b7   :  { %v5105_v43 = vunpack.i.h.bf16 %v5103_v33  ;;  %v5104_v38 = vunpack.i.l.bf16 %v5103_v33  ;;  %v3974_v10 = vsel %vm9918_vm1, %v3973_v5, %v3969_v63  ;;  %v4016_v16 = vsel %vm9919_vm3, %v3683_v36, %v8842_v28 }
 0x3b8   :  { %v3979_v11 = vsel %vm2785_vm7, %v3978_v15, %v3974_v10  ;;  %v3988_v15 = vrot.slane %v5139_v56, %v9698_v21 }
 0x3b9   :  { %v3899_v46 = vrot.slane %v5105_v43, %v9680_v29  ;;  %v3895_v29 = vsel %vm9917_vm8, %v3894_v41, %v3890_v2  ;;  %v3825_v1 = vrot.slane %v5104_v38, %v9697_v9  ;;  %v3984_v43 = vsel %vm2792_vm12, %v3983_v48, %v3979_v11 }
 0x3ba   :  { %v5113_v51 = vpop.permute.xlu1 %5112  ;;  %v3989_v28 = vsel %vm2799_vm9, %v3988_v15, %v3984_v43 }
 0x3bb   :  { %v5114_v30 = vunpack.i.l.bf16 %v5113_v51  ;;  %v5115_v3 = vunpack.i.h.bf16 %v5113_v51  ;;  %v3900_v58 = vsel %vm2785_vm7, %v3899_v46, %v3895_v29  ;;  %v3826_v33 = vsel %vm2792_vm12, %v3825_v1, %v3821_v13 }
 0x3bc   :  { %v3905_v9 = vsel %vm2792_vm12, %v3904_v39, %v3900_v58  ;;  %vm9920_vm7 = vcmask 1046534   ;;  %vm9921_vm12 = vcmask 1047559  }
 0x3bd   :  { %v3756_v35 = vrot.slane %v5114_v30, %v9721_v0  ;;  %v3830_v62 = vrot.slane %v5115_v3, %v9698_v21  ;;  %v3910_v14 = vsel %vm2799_vm9, %v3909_v50, %v3905_v9 }
 0x3bf   :  { %v5123_v44 = vpop.permute.xlu1 %5122  ;;  %v3757_v17 = vsel %vm2806_vm14, %v3756_v35, %v3752_v4  ;;  %v3831_v42 = vsel %vm2799_vm9, %v3830_v62, %v3826_v33 }
 0x3c0   :  { %v5125_v12 = vunpack.i.h.bf16 %v5123_v44  ;;  %v5124_v57 = vunpack.i.l.bf16 %v5123_v44 }
 0x3c2   :  { %v3761_v25 = vrot.slane %v5124_v57, %v9730_v7  ;;  %v3835_v34 = vrot.slane %v5125_v12, %v9721_v0 }
 0x3c3   :  { %v5133_v40 = vpop.permute.xlu1 %5132 }
 0x3c4   :  { %v5135_v53 = vunpack.i.h.bf16 %v5133_v40  ;;  %v5134_v20 = vunpack.i.l.bf16 %v5133_v40  ;;  %v3762_v32 = vsel %vm2813_vm0, %v3761_v25, %v3757_v17  ;;  %v3836_v6 = vsel %vm2806_vm14, %v3835_v34, %v3831_v42 }
 0x3c5   :  { %v4017_v27 = vsel %vm4006_vm13, %v3762_v32, %v4016_v16 }
 0x3c6   :  { %v3914_v23 = vrot.slane %v5135_v53, %v9721_v0  ;;  %v3840_v26 = vrot.slane %v5134_v20, %v9730_v7 }
 0x3c7   :  { %v5143_v18 = vpop.permute.xlu1 %5142 }
 0x3c8   :  { %v3841_v5 = vsel %vm2813_vm0, %v3840_v26, %v3836_v6  ;;  %v3915_v8 = vsel %vm2806_vm14, %v3914_v23, %v3910_v14  ;;  %v5145_v52 = vunpack.i.h.bf16 %v5143_v18  ;;  %v5144_v37 = vunpack.i.l.bf16 %v5143_v18 }
 0x3c9   :  { %v3920_v31 = vsel %vm2813_vm0, %v3919_v24, %v3915_v8  ;;  %v4018_v55 = vsel %vm4008_vm4, %v3841_v5, %v4017_v27 }
 0x3ca   :  { %v3998_v2 = vrot.slane %v5145_v52, %v9730_v7  ;;  %v3993_v51 = vrot.slane %v5144_v37, %v9721_v0  ;;  %v4019_v41 = vsel %vm9920_vm7, %v3920_v31, %v4018_v55 }
 0x3cc   :  { %v3994_v19 = vsel %vm2806_vm14, %v3993_v51, %v3989_v28 }
 0x3cd   :  { %v3999_v59 = vsel %vm2813_vm0, %v3998_v2, %v3994_v19 }
 0x3ce   :  { %v4020_v21 = vsel %vm9921_vm12, %v3999_v59, %v4019_v41 }
 0x3cf   :  { %4455 = vmatmul.mubr.f32.vlgmr.msra.gmra.mrb[0].mxu1 %v4020_v21 }
 0x3d0   :  { %5161 = shalt.err (!%p5158_p4)
}
 0x3d1   :  { %s5162_s10 = scalar_lea.hbm %s9141_s4, 32 }
 0x3d2   :  { %p5163_p5 = scmp.ne.s32.totalorder %s9141_s4, %s5162_s10  ;;  %p5166_p6 = scmp.lt.u32.totalorder %s5162_s10, %s9141_s4 }
 0x3d4   :  { %p5168_p7 = pnand %p5166_p6, %p5163_p5 }
 0x3d6   :  { %5171 = shalt.err (!%p5168_p7)
}
 0x3d7   :  { %4109 = dma.vmem_to_hbm [thread:$0]  %s4107_s6, 32, %s9141_s4, [#allocation3]   ;;  %vm9922_vm9 = vcmask 261120  }
 0x3d8   :  { %s5204_s17 = smov [#allocation4]   ;;  %vm9923_vm14 = vmmov %vm9922_vm9 }
 0x3d9   :  { %s4115_s18 = sshll.u32 %s5204_s17, 4  ;;  %s4116_s18 = int_to_ptr.vmem [resolvable:$true] %s4115_s18 }
 0x3da   :  { %s5172_s19 = scalar_lea.vmem %s4116_s18, 256  ;;  %p5177_p9 = scmp.lt.s32.totalorder %s4116_s18, %s4116_s18 }
 0x3db   :  { %p5173_p8 = scmp.ne.s32.totalorder %s4116_s18, %s5172_s19  ;;  %p5178_p10 = scmp.lt.s32.totalorder %s5172_s19, %s5172_s19 }
 0x3dd   :  { %p5179_p11 = por %p5178_p10, %p5177_p9 }
 0x3df   :  { %p5180_p12 = pnand %p5179_p11, %p5173_p8 }
 0x4a2   :  { %v4456_v0 = vpop.f32.mrb[0].mxu1 }
 0x4a3   :  { %4099 = vst.msk [vmem:[#allocation4 + $0x8] sm:$0xff] %vm9922_vm9, %v4456_v0  ;;  %v4089_v7 = vpop.f32.mrb[1].mxu1 }
 0x4a4   :  { %4098 = vst.msk [vmem:[#allocation4] sm:$0xff] %vm9923_vm14, %v4089_v7 }
 0x4a5   :  { %5183 = shalt.err (!%p5180_p12)
}
 0x4a6   :  { %s5184_s4 = scalar_lea.hbm %s9142_s5, 256 }
 0x4a7   :  { %p5185_p13 = scmp.ne.s32.totalorder %s9142_s5, %s5184_s4  ;;  %p5188_p0 = scmp.lt.u32.totalorder %s5184_s4, %s9142_s5 }
 0x4a9   :  { %p5190_p1 = pnand %p5188_p0, %p5185_p13 }
 0x4ab   :  { %5193 = shalt.err (!%p5190_p1)
}
 0x4ac   :  { %s5205_s26 = smov 128   ;;  %s5206_s27 = smov 8  }
 0x4ad   :  { %4121 = dma.vmem_to_hbm [thread:$0]  %s4116_s18, 256, %s9142_s5, [#allocation5], %s5205_s26, %s5205_s26, %s5206_s27  }
 0x4ae   :  { %5194 = dma.done.wait [#allocation3], 32  }
 0x4af   :  { %5195 = vsyncadd [#allocation3], 4294967264 }
 0x4b0   :  { %5196 = dma.done.wait [#allocation5], 256  }
 0x4b1   :  { %5197 = vsyncadd [#allocation5], 4294967040 }
 0x4b2   :  { %4128 = vsyncpa [#allocation3], 1 }
 0x4b3   :  { %4129 = vsyncpa [#allocation5], 1 }

</bundles_post_ra>
